<compile_context>
chip_gen: v7x
topology: tpu7x:2x2x1
jax: 0.10.0
libtpu: 0.0.40
codegen_flags: <defaults>
</compile_context>

<pallas_src>
import jax
import jax.numpy as jnp
from jax.experimental import pallas as pl
from jax.experimental.pallas import tpu as pltpu


def mlp_kernel(x_ref, w1_ref, b1_ref, w2_ref, b2_ref, w3t_ref, b3_ref, o_ref):
    # Layer 1: (TB,1024)bf16 @ (1024,1200)bf16 -> f32 acc, +bias, sigmoid
    h1 = jnp.dot(x_ref[...], w1_ref[...], preferred_element_type=jnp.float32)
    h1 = jax.nn.sigmoid(h1 + b1_ref[...])
    # Layer 2: (TB,1200)bf16 @ (1200,1200)bf16 -> f32 acc, +bias, sigmoid
    h2 = jnp.dot(h1.astype(jnp.bfloat16), w2_ref[...],
                 preferred_element_type=jnp.float32)
    h2 = jax.nn.sigmoid(h2 + b2_ref[...])
    # Layer 3 (N=1): VPU multiply + lane reduction instead of an almost-empty MXU matmul.
    h3 = jnp.sum(h2 * w3t_ref[...], axis=-1, keepdims=True)
    o_ref[...] = jax.nn.sigmoid(h3 + b3_ref[...]).astype(o_ref.dtype)


def neural_network_forward(x, params):
    """x: (B, 1000) f32.  params: (w1,b1,w2,b2,w3,b3) with w*: (in,out), b*: (1,out), all f32."""
    w1, b1, w2, b2, w3, b3 = params
    B, K = x.shape
    assert K == 1000, K

    # --- Pad the contraction dim 1000 -> 1024 (zero pad; exact under f32 accumulation). ---
    K_pad = 1024
    x_p = jnp.pad(x, ((0, 0), (0, K_pad - K))).astype(jnp.bfloat16)
    w1_b = jnp.pad(w1, ((0, K_pad - K), (0, 0))).astype(jnp.bfloat16)
    w2_b = w2.astype(jnp.bfloat16)
    w3t = w3.reshape(1, -1).astype(jnp.float32)  # (1,1200) for the VPU dot; tiny, keep f32

    # --- Batch tiling: weights stay VMEM-resident (constant block index) across tiles. ---
    if B <= 128:
        TB = ((B + 7) // 8) * 8          # sublane-aligned, single tile
    else:
        TB = 128
    B_pad = pl.cdiv(B, TB) * TB
    if B_pad != B:
        x_p = jnp.pad(x_p, ((0, B_pad - B), (0, 0)))
    nb = B_pad // TB

    def const_spec(shape):
        return pl.BlockSpec(shape, lambda i: (0, 0))

    out = pl.pallas_call(
        mlp_kernel,
        out_shape=jax.ShapeDtypeStruct((B_pad, 1), jnp.float32),
        grid=(nb,),
        in_specs=[
            pl.BlockSpec((TB, K_pad), lambda i: (i, 0)),   # x tile, pipelined over batch
            const_spec(w1_b.shape), const_spec(b1.shape),  # weights/biases: resident
            const_spec(w2_b.shape), const_spec(b2.shape),
            const_spec(w3t.shape), const_spec(b3.shape),
        ],
        out_specs=pl.BlockSpec((TB, 1), lambda i: (i, 0)),
        compiler_params=pltpu.CompilerParams(
            dimension_semantics=("parallel",),   # shard batch tiles across TCs (v7x megacore)
            vmem_limit_bytes=32 << 20,
        ),
    )(x_p, w1_b, b1, w2_b, b2, w3t, b3)

    return out[:B]


def init_params(key):
    """Deterministic init mimicking PyTorch Linear default: U(-1/sqrt(fan_in), +1/sqrt(fan_in))."""
    ks = jax.random.split(key, 6)

    def linear(kw, kb, fan_in, fan_out):
        bound = 1.0 / jnp.sqrt(fan_in)
        w = jax.random.uniform(kw, (fan_in, fan_out), jnp.float32, -bound, bound)
        b = jax.random.uniform(kb, (1, fan_out), jnp.float32, -bound, bound)
        return w, b

    w1, b1 = linear(ks[0], ks[1], 1000, 1200)
    w2, b2 = linear(ks[2], ks[3], 1200, 1200)
    w3, b3 = linear(ks[4], ks[5], 1200, 1)
    return (w1, b1, w2, b2, w3, b3)


def reference_forward_f32(x, params):
    w1, b1, w2, b2, w3, b3 = params
    h = jax.nn.sigmoid(x @ w1 + b1)
    h = jax.nn.sigmoid(h @ w2 + b2)
    return jax.nn.sigmoid(h @ w3 + b3)


def reference_forward_bf16(x, params):
    """Same math as the kernel (bf16 operands, f32 accumulation) for a tight check."""
    w1, b1, w2, b2, w3, b3 = params
    h = jnp.dot(x.astype(jnp.bfloat16), w1.astype(jnp.bfloat16),
                preferred_element_type=jnp.float32)
    h = jax.nn.sigmoid(h + b1)
    h = jnp.dot(h.astype(jnp.bfloat16), w2.astype(jnp.bfloat16),
                preferred_element_type=jnp.float32)
    h = jax.nn.sigmoid(h + b2)
    h = jnp.sum(h * w3.reshape(1, -1), axis=-1, keepdims=True)
    return jax.nn.sigmoid(h + b3)


if __name__ == "__main__":
    key = jax.random.PRNGKey(0)
    kx, kp = jax.random.split(key)

    B = 8  # small batch, multiple of 8 sublanes
    x = jax.random.normal(kx, (B, 1000), dtype=jnp.float32)
    params = init_params(kp)

    out = neural_network_forward(x, params)
    out = jax.block_until_ready(out)
    assert out.shape == (B, 1), out.shape

    # Tight check vs. a bf16-matched JAX reference.
    ref_bf16 = reference_forward_bf16(x, params)
    assert jnp.allclose(out, ref_bf16, atol=1e-3, rtol=1e-3), "mismatch vs bf16 reference"

    # Loose check vs. the full-f32 reference (tolerance relaxed for bf16 weights).
    ref_f32 = reference_forward_f32(x, params)
    assert jnp.allclose(out, ref_f32, atol=2e-2, rtol=2e-2), "mismatch vs f32 reference"

    print("KERNEL_OK")
</pallas_src>

<mosaic_0001>
module attributes {stable_mosaic.version = 11 : i64} {
  func.func @mlp_kernel(%arg0: i32, %arg1: memref<8x1024xbf16, #tpu.memory_space<vmem>>, %arg2: memref<1024x1200xbf16, #tpu.memory_space<vmem>>, %arg3: memref<1x1200xf32, #tpu.memory_space<vmem>>, %arg4: memref<1200x1200xbf16, #tpu.memory_space<vmem>>, %arg5: memref<1x1200xf32, #tpu.memory_space<vmem>>, %arg6: memref<1x1200xf32, #tpu.memory_space<vmem>>, %arg7: memref<1x1xf32, #tpu.memory_space<vmem>>, %arg8: memref<8x1xf32, #tpu.memory_space<vmem>>) attributes {dimension_semantics = [#tpu.dimension_semantics<parallel>], iteration_bounds = array<i64: 1>, scalar_prefetch = 0 : i64, scratch_operands = 0 : i64, tpu.core_type = #tpu.core_type<tc>, window_params = [{transform_indices = @transform_0, window_bounds = array<i64: 8, 1024>}, {pipeline_mode = #tpu.pipeline_mode<synchronous>, transform_indices = @transform_1, window_bounds = array<i64: 1024, 1200>}, {pipeline_mode = #tpu.pipeline_mode<synchronous>, transform_indices = @transform_2, window_bounds = array<i64: 1, 1200>}, {pipeline_mode = #tpu.pipeline_mode<synchronous>, transform_indices = @transform_3, window_bounds = array<i64: 1200, 1200>}, {pipeline_mode = #tpu.pipeline_mode<synchronous>, transform_indices = @transform_4, window_bounds = array<i64: 1, 1200>}, {pipeline_mode = #tpu.pipeline_mode<synchronous>, transform_indices = @transform_5, window_bounds = array<i64: 1, 1200>}, {pipeline_mode = #tpu.pipeline_mode<synchronous>, transform_indices = @transform_6, window_bounds = array<i64: 1, 1>}, {transform_indices = @transform_7, window_bounds = array<i64: 8, 1>}]} {
    %c0 = arith.constant 0 : index
    %c0_0 = arith.constant 0 : index
    %0 = vector.load %arg1[%c0, %c0_0] : memref<8x1024xbf16, #tpu.memory_space<vmem>>, vector<8x1024xbf16>
    %c0_1 = arith.constant 0 : index
    %c0_2 = arith.constant 0 : index
    %1 = vector.load %arg2[%c0_1, %c0_2] : memref<1024x1200xbf16, #tpu.memory_space<vmem>>, vector<1024x1200xbf16>
    %cst = arith.constant dense<0.000000e+00> : vector<8x1200xf32>
    %2 = tpu.matmul %0, %1, %cst {dimension_numbers = #tpu.dot_dimension_numbers<[1], [0], [0], [1], [0, 0, 1, 1], [], []>} : vector<8x1024xbf16>, vector<1024x1200xbf16>, vector<8x1200xf32> -> vector<8x1200xf32>
    %c0_3 = arith.constant 0 : index
    %c0_4 = arith.constant 0 : index
    %3 = vector.load %arg3[%c0_3, %c0_4] : memref<1x1200xf32, #tpu.memory_space<vmem>>, vector<1x1200xf32>
    %4 = vector.broadcast %3 : vector<1x1200xf32> to vector<8x1200xf32>
    %5 = arith.addf %2, %4 : vector<8x1200xf32>
    %6 = arith.negf %5 : vector<8x1200xf32>
    %7 = math.exp %6 : vector<8x1200xf32>
    %cst_5 = arith.constant 1.000000e+00 : f32
    %8 = vector.broadcast %cst_5 : f32 to vector<8x1200xf32>
    %9 = arith.addf %8, %7 : vector<8x1200xf32>
    %10 = arith.divf %8, %9 : vector<8x1200xf32>
    %11 = arith.truncf %10 : vector<8x1200xf32> to vector<8x1200xbf16>
    %c0_6 = arith.constant 0 : index
    %c0_7 = arith.constant 0 : index
    %12 = vector.load %arg4[%c0_6, %c0_7] : memref<1200x1200xbf16, #tpu.memory_space<vmem>>, vector<1200x1200xbf16>
    %cst_8 = arith.constant dense<0.000000e+00> : vector<8x1200xf32>
    %13 = tpu.matmul %11, %12, %cst_8 {dimension_numbers = #tpu.dot_dimension_numbers<[1], [0], [0], [1], [0, 0, 1, 1], [], []>} : vector<8x1200xbf16>, vector<1200x1200xbf16>, vector<8x1200xf32> -> vector<8x1200xf32>
    %c0_9 = arith.constant 0 : index
    %c0_10 = arith.constant 0 : index
    %14 = vector.load %arg5[%c0_9, %c0_10] : memref<1x1200xf32, #tpu.memory_space<vmem>>, vector<1x1200xf32>
    %15 = vector.broadcast %14 : vector<1x1200xf32> to vector<8x1200xf32>
    %16 = arith.addf %13, %15 : vector<8x1200xf32>
    %17 = arith.negf %16 : vector<8x1200xf32>
    %18 = math.exp %17 : vector<8x1200xf32>
    %cst_11 = arith.constant 1.000000e+00 : f32
    %19 = vector.broadcast %cst_11 : f32 to vector<8x1200xf32>
    %20 = arith.addf %19, %18 : vector<8x1200xf32>
    %21 = arith.divf %19, %20 : vector<8x1200xf32>
    %c0_12 = arith.constant 0 : index
    %c0_13 = arith.constant 0 : index
    %22 = vector.load %arg6[%c0_12, %c0_13] : memref<1x1200xf32, #tpu.memory_space<vmem>>, vector<1x1200xf32>
    %23 = vector.broadcast %22 : vector<1x1200xf32> to vector<8x1200xf32>
    %24 = arith.mulf %21, %23 : vector<8x1200xf32>
    %cst_14 = arith.constant dense<0.000000e+00> : vector<8xf32>
    %25 = vector.multi_reduction <add>, %24, %cst_14 [1] : vector<8x1200xf32> to vector<8xf32>
    %26 = vector.shape_cast %25 : vector<8xf32> to vector<8x1xf32>
    %c0_15 = arith.constant 0 : index
    %c0_16 = arith.constant 0 : index
    %27 = vector.load %arg7[%c0_15, %c0_16] : memref<1x1xf32, #tpu.memory_space<vmem>>, vector<1x1xf32>
    %28 = vector.broadcast %27 : vector<1x1xf32> to vector<8x1xf32>
    %29 = arith.addf %26, %28 : vector<8x1xf32>
    %30 = arith.negf %29 : vector<8x1xf32>
    %31 = math.exp %30 : vector<8x1xf32>
    %cst_17 = arith.constant 1.000000e+00 : f32
    %32 = vector.broadcast %cst_17 : f32 to vector<8x1xf32>
    %33 = arith.addf %32, %31 : vector<8x1xf32>
    %34 = arith.divf %32, %33 : vector<8x1xf32>
    %c0_18 = arith.constant 0 : index
    %c0_19 = arith.constant 0 : index
    %35 = vector.load %arg8[%c0_18, %c0_19] : memref<8x1xf32, #tpu.memory_space<vmem>>, vector<8x1xf32>
    tpu.vector_store %arg8[%c0_18, %c0_19], %34 {strides = array<i32>} : memref<8x1xf32, #tpu.memory_space<vmem>>, vector<8x1xf32>,
    return
  }
  func.func @transform_0(%arg0: i32) -> (i32, i32) {
    %c0_i32 = arith.constant 0 : i32
    %c0_i32_0 = arith.constant 0 : i32
    return %arg0, %c0_i32 : i32, i32
  }
  func.func @transform_1(%arg0: i32) -> (i32, i32) {
    %c0_i32 = arith.constant 0 : i32
    %c0_i32_0 = arith.constant 0 : i32
    %c0_i32_1 = arith.constant 0 : i32
    return %c0_i32, %c0_i32_0 : i32, i32
  }
  func.func @transform_2(%arg0: i32) -> (i32, i32) {
    %c0_i32 = arith.constant 0 : i32
    %c0_i32_0 = arith.constant 0 : i32
    %c0_i32_1 = arith.constant 0 : i32
    return %c0_i32, %c0_i32_0 : i32, i32
  }
  func.func @transform_3(%arg0: i32) -> (i32, i32) {
    %c0_i32 = arith.constant 0 : i32
    %c0_i32_0 = arith.constant 0 : i32
    %c0_i32_1 = arith.constant 0 : i32
    return %c0_i32, %c0_i32_0 : i32, i32
  }
  func.func @transform_4(%arg0: i32) -> (i32, i32) {
    %c0_i32 = arith.constant 0 : i32
    %c0_i32_0 = arith.constant 0 : i32
    %c0_i32_1 = arith.constant 0 : i32
    return %c0_i32, %c0_i32_0 : i32, i32
  }
  func.func @transform_5(%arg0: i32) -> (i32, i32) {
    %c0_i32 = arith.constant 0 : i32
    %c0_i32_0 = arith.constant 0 : i32
    %c0_i32_1 = arith.constant 0 : i32
    return %c0_i32, %c0_i32_0 : i32, i32
  }
  func.func @transform_6(%arg0: i32) -> (i32, i32) {
    %c0_i32 = arith.constant 0 : i32
    %c0_i32_0 = arith.constant 0 : i32
    %c0_i32_1 = arith.constant 0 : i32
    return %c0_i32, %c0_i32_0 : i32, i32
  }
  func.func @transform_7(%arg0: i32) -> (i32, i32) {
    %c0_i32 = arith.constant 0 : i32
    %c0_i32_0 = arith.constant 0 : i32
    return %arg0, %c0_i32 : i32, i32
  }
}

</mosaic_0001>

<bundles_post_ra>
// kernel: tpu_custom_call.1
= control target key start
LH: loop header
LB: loop body
LE: loop exit
PB: predicated region body
PF: predicated region fallthrough
CT: control target
= control target key end

     0   :  { %vm9399_vm0 = vcmask 392192   ;;  %vm10578_vm1 = vcmask 7168   ;;  %s18869_s1 = inlined_call_operand.vmem [shape: bf16[1024,1200], index: 1, kind: input, shape index: {}]   ;;  %s18870_s0 = inlined_call_operand.vmem [shape: bf16[8,1024], index: 0, kind: input, shape index: {}]   ;;  %s18871_s3 = inlined_call_operand.vmem [shape: bf16[1200,1200], index: 3, kind: input, shape index: {}]   ;;  %s18872_s2 = inlined_call_operand.vmem [shape: f32[1,1200], index: 2, kind: input, shape index: {}]   ;;  %s18873_s4 = inlined_call_operand.vmem [shape: f32[1,1200], index: 4, kind: input, shape index: {}]   ;;  %s18874_s5 = inlined_call_operand.vmem [shape: f32[1,1200], index: 5, kind: input, shape index: {}]   ;;  %s18875_s6 = inlined_call_operand.<no memory space> [shape: f32[1,1], index: 6, kind: input, shape index: {}]   ;;  %s18876_s7 = inlined_call_operand.vmem [shape: f32[8,1], index: 7, kind: output, shape index: {}]  }
   0x1   :  { %v12169_v0 = vld [vmem:[%s18869_s1 + $0x4] ss:$40 sps:$4 sm:$0xff]   ;;  %v12173_v2 = vld [vmem:[%s18869_s1] ss:$40 sps:$4 sm:$0xff]   ;;  %v12175_v4 = vld [vmem:[%s18869_s1 + $0x54] ss:$40 sps:$4 sm:$0xff]  }
   0x2   :  { %v12171_v1 = vld [vmem:[%s18869_s1 + $0xc] ss:$40 sps:$4 sm:$0xff]   ;;  %3955 = vmatprep.subr.bf16.mxu0 %v12169_v0  ;;  %v12174_v3 = vld [vmem:[%s18869_s1 + $0x8] ss:$40 sps:$4 sm:$0xff]   ;;  %v12177_v5 = vld [vmem:[%s18869_s1 + $0x5c] ss:$40 sps:$4 sm:$0xff]  }
   0x3   :  { %4119 = vmatprep.subr.bf16.mxu1 %v12171_v1  ;;  %3956 = vmatpush1.bf16.msra.mxu0 %v12173_v2  ;;  %v12179_v6 = vld [vmem:[%s18869_s1 + $0x50] ss:$40 sps:$4 sm:$0xff]   ;;  %v12181_v8 = vld [vmem:[%s18869_s1 + $0xa4] ss:$40 sps:$4 sm:$0xff]   ;;  %v12185_v10 = vld [vmem:[%s18869_s1 + $0xa0] ss:$40 sps:$4 sm:$0xff]  }
   0x4   :  { %4120 = vmatpush1.bf16.msra.mxu1 %v12174_v3  ;;  %3957 = vmatprep.subr.bf16.mxu0 %v12175_v4  ;;  %v12180_v7 = vld [vmem:[%s18869_s1 + $0x58] ss:$40 sps:$4 sm:$0xff]   ;;  %v12183_v9 = vld [vmem:[%s18869_s1 + $0xac] ss:$40 sps:$4 sm:$0xff]   ;;  %v12186_v11 = vld [vmem:[%s18869_s1 + $0xa8] ss:$40 sps:$4 sm:$0xff]  }
   0x5   :  { %4121 = vmatprep.subr.bf16.mxu1 %v12177_v5  ;;  %v12187_v12 = vld [vmem:[%s18869_s1 + $0xf4] ss:$40 sps:$4 sm:$0xff]   ;;  %v12191_v14 = vld [vmem:[%s18869_s1 + $0xf0] ss:$40 sps:$4 sm:$0xff]   ;;  %v12193_v16 = vld [vmem:[%s18869_s1 + $0x144] ss:$40 sps:$4 sm:$0xff]  }
   0x6   :  { %v12189_v13 = vld [vmem:[%s18869_s1 + $0xfc] ss:$40 sps:$4 sm:$0xff]   ;;  %v12192_v15 = vld [vmem:[%s18869_s1 + $0xf8] ss:$40 sps:$4 sm:$0xff]   ;;  %v12195_v17 = vld [vmem:[%s18869_s1 + $0x14c] ss:$40 sps:$4 sm:$0xff]  }
   0x7   :  { %3958 = vmatpush1.bf16.msra.mxu0 %v12179_v6  ;;  %v12197_v18 = vld [vmem:[%s18869_s1 + $0x140] ss:$40 sps:$4 sm:$0xff]   ;;  %v12199_v20 = vld [vmem:[%s18869_s1 + $0x194] ss:$40 sps:$4 sm:$0xff]   ;;  %v12203_v22 = vld [vmem:[%s18869_s1 + $0x190] ss:$40 sps:$4 sm:$0xff]  }
   0x8   :  { %4122 = vmatpush1.bf16.msra.mxu1 %v12180_v7  ;;  %3959 = vmatprep.subr.bf16.mxu0 %v12181_v8  ;;  %v12198_v19 = vld [vmem:[%s18869_s1 + $0x148] ss:$40 sps:$4 sm:$0xff]   ;;  %v12201_v21 = vld [vmem:[%s18869_s1 + $0x19c] ss:$40 sps:$4 sm:$0xff]   ;;  %v12204_v23 = vld [vmem:[%s18869_s1 + $0x198] ss:$40 sps:$4 sm:$0xff]  }
   0x9   :  { %4123 = vmatprep.subr.bf16.mxu1 %v12183_v9  ;;  %v12205_v24 = vld [vmem:[%s18869_s1 + $0x1e4] ss:$40 sps:$4 sm:$0xff]   ;;  %v12209_v26 = vld [vmem:[%s18869_s1 + $0x1e0] ss:$40 sps:$4 sm:$0xff]   ;;  %v12211_v28 = vld [vmem:[%s18869_s1 + $0x234] ss:$40 sps:$4 sm:$0xff]  }
   0xa   :  { %v12207_v25 = vld [vmem:[%s18869_s1 + $0x1ec] ss:$40 sps:$4 sm:$0xff]   ;;  %v12210_v27 = vld [vmem:[%s18869_s1 + $0x1e8] ss:$40 sps:$4 sm:$0xff]   ;;  %v12213_v29 = vld [vmem:[%s18869_s1 + $0x23c] ss:$40 sps:$4 sm:$0xff]  }
   0xb   :  { %3960 = vmatpush1.bf16.msra.mxu0 %v12185_v10  ;;  %v12215_v30 = vld [vmem:[%s18869_s1 + $0x230] ss:$40 sps:$4 sm:$0xff]   ;;  %v12217_v32 = vld [vmem:[%s18869_s1 + $0x284] ss:$40 sps:$4 sm:$0xff]   ;;  %v12221_v34 = vld [vmem:[%s18869_s1 + $0x280] ss:$40 sps:$4 sm:$0xff]  }
   0xc   :  { %4124 = vmatpush1.bf16.msra.mxu1 %v12186_v11  ;;  %3961 = vmatprep.subr.bf16.mxu0 %v12187_v12  ;;  %v12216_v31 = vld [vmem:[%s18869_s1 + $0x238] ss:$40 sps:$4 sm:$0xff]   ;;  %v12219_v33 = vld [vmem:[%s18869_s1 + $0x28c] ss:$40 sps:$4 sm:$0xff]   ;;  %v12222_v35 = vld [vmem:[%s18869_s1 + $0x288] ss:$40 sps:$4 sm:$0xff]  }
   0xd   :  { %4125 = vmatprep.subr.bf16.mxu1 %v12189_v13  ;;  %v12223_v36 = vld [vmem:[%s18869_s1 + $0x2d4] ss:$40 sps:$4 sm:$0xff]   ;;  %v12227_v38 = vld [vmem:[%s18869_s1 + $0x2d0] ss:$40 sps:$4 sm:$0xff]   ;;  %v12229_v40 = vld [vmem:[%s18869_s1 + $0x324] ss:$40 sps:$4 sm:$0xff]  }
   0xe   :  { %v12225_v37 = vld [vmem:[%s18869_s1 + $0x2dc] ss:$40 sps:$4 sm:$0xff]   ;;  %v12228_v39 = vld [vmem:[%s18869_s1 + $0x2d8] ss:$40 sps:$4 sm:$0xff]   ;;  %v12231_v41 = vld [vmem:[%s18869_s1 + $0x32c] ss:$40 sps:$4 sm:$0xff]  }
   0xf   :  { %3962 = vmatpush1.bf16.msra.mxu0 %v12191_v14  ;;  %v12233_v42 = vld [vmem:[%s18869_s1 + $0x320] ss:$40 sps:$4 sm:$0xff]   ;;  %v12235_v44 = vld [vmem:[%s18869_s1 + $0x374] ss:$40 sps:$4 sm:$0xff]   ;;  %v12239_v47 = vld [vmem:[%s18869_s1 + $0x370] ss:$40 sps:$4 sm:$0xff]  }
  0x10   :  { %4126 = vmatpush1.bf16.msra.mxu1 %v12192_v15  ;;  %3963 = vmatprep.subr.bf16.mxu0 %v12193_v16  ;;  %v12234_v43 = vld [vmem:[%s18869_s1 + $0x328] ss:$40 sps:$4 sm:$0xff]   ;;  %v12237_v45 = vld [vmem:[%s18869_s1 + $0x37c] ss:$40 sps:$4 sm:$0xff]   ;;  %v12240_v49 = vld [vmem:[%s18869_s1 + $0x378] ss:$40 sps:$4 sm:$0xff]  }
  0x11   :  { %4127 = vmatprep.subr.bf16.mxu1 %v12195_v17  ;;  %v29_v46 = vld [vmem:[%s18870_s0] sm:$0xff]  ;;  %v12243_v51 = vld [vmem:[%s18869_s1 + $0x3cc] ss:$40 sps:$4 sm:$0xff]   ;;  %v12246_v53 = vld [vmem:[%s18869_s1 + $0x3c8] ss:$40 sps:$4 sm:$0xff]  }
  0x12   :  { %v14534_v48 = vcombine.high %v29_v46, %v29_v46  ;;  %v12241_v50 = vld [vmem:[%s18869_s1 + $0x3c4] ss:$40 sps:$4 sm:$0xff]   ;;  %v12245_v52 = vld [vmem:[%s18869_s1 + $0x3c0] ss:$40 sps:$4 sm:$0xff]   ;;  %v12247_v54 = vld [vmem:[%s18869_s1 + $0x414] ss:$40 sps:$4 sm:$0xff]   ;;  %v14598_v5 = vcombine.low %v29_v46, %v29_v46 }
  0x13   :  { %3964 = vmatpush1.bf16.msra.mxu0 %v12197_v18  ;;  %v12249_v55 = vld [vmem:[%s18869_s1 + $0x41c] ss:$40 sps:$4 sm:$0xff]   ;;  %v12251_v56 = vld [vmem:[%s18869_s1 + $0x410] ss:$40 sps:$4 sm:$0xff]   ;;  %v12255_v59 = vld [vmem:[%s18869_s1 + $0x46c] ss:$40 sps:$4 sm:$0xff]  }
  0x14   :  { %4128 = vmatpush1.bf16.msra.mxu1 %v12198_v19  ;;  %3965 = vmatprep.subr.bf16.mxu0 %v12199_v20  ;;  %v12252_v57 = vld [vmem:[%s18869_s1 + $0x418] ss:$40 sps:$4 sm:$0xff]   ;;  %v12253_v58 = vld [vmem:[%s18869_s1 + $0x464] ss:$40 sps:$4 sm:$0xff]   ;;  %v12258_v61 = vld [vmem:[%s18869_s1 + $0x468] ss:$40 sps:$4 sm:$0xff]  }
  0x15   :  { %4129 = vmatprep.subr.bf16.mxu1 %v12201_v21  ;;  %3987 = vmatprep.mubr.bf16.mxu0 %v14534_v48  ;;  %v12257_v60 = vld [vmem:[%s18869_s1 + $0x460] ss:$40 sps:$4 sm:$0xff]   ;;  %v12259_v62 = vld [vmem:[%s18869_s1 + $0x4b4] ss:$40 sps:$4 sm:$0xff]   ;;  %v12263_v0 = vld [vmem:[%s18869_s1 + $0x4b0] ss:$40 sps:$4 sm:$0xff]  }
  0x16   :  { %4151 = vmatprep.mubr.bf16.mxu1 %v14534_v48  ;;  %v12261_v63 = vld [vmem:[%s18869_s1 + $0x4bc] ss:$40 sps:$4 sm:$0xff]   ;;  %v12264_v1 = vld [vmem:[%s18869_s1 + $0x4b8] ss:$40 sps:$4 sm:$0xff]   ;;  %v12271_v3 = vld [vmem:[%s18869_s1 + $0x50c] ss:$40 sps:$4 sm:$0xff]  }
  0x17   :  { %3966 = vmatpush1.bf16.msra.mxu0 %v12203_v22  ;;  %v12268_v2 = vld [vmem:[%s18869_s1 + $0x504] ss:$40 sps:$4 sm:$0xff]   ;;  %v12266_v4 = vld [vmem:[%s18869_s1 + $0x500] ss:$40 sps:$4 sm:$0xff]   ;;  %v12275_v7 = vld [vmem:[%s18869_s1 + $0x554] ss:$40 sps:$4 sm:$0xff]  }
  0x18   :  { %4130 = vmatpush1.bf16.msra.mxu1 %v12204_v23  ;;  %3967 = vmatprep.subr.bf16.mxu0 %v12205_v24  ;;  %v12269_v6 = vld [vmem:[%s18869_s1 + $0x508] ss:$40 sps:$4 sm:$0xff]   ;;  %v12278_v8 = vld [vmem:[%s18869_s1 + $0x55c] ss:$40 sps:$4 sm:$0xff]   ;;  %v12276_v10 = vld [vmem:[%s18869_s1 + $0x558] ss:$40 sps:$4 sm:$0xff]  }
  0x19   :  { %4131 = vmatprep.subr.bf16.mxu1 %v12207_v25  ;;  %v12273_v9 = vld [vmem:[%s18869_s1 + $0x550] ss:$40 sps:$4 sm:$0xff]   ;;  %v12281_v11 = vld [vmem:[%s18869_s1 + $0x5a4] ss:$40 sps:$4 sm:$0xff]   ;;  %v12279_v13 = vld [vmem:[%s18869_s1 + $0x5a0] ss:$40 sps:$4 sm:$0xff]  }
  0x1a   :  { %v12284_v12 = vld [vmem:[%s18869_s1 + $0x5ac] ss:$40 sps:$4 sm:$0xff]   ;;  %v12282_v14 = vld [vmem:[%s18869_s1 + $0x5a8] ss:$40 sps:$4 sm:$0xff]   ;;  %v12290_v16 = vld [vmem:[%s18869_s1 + $0x5fc] ss:$40 sps:$4 sm:$0xff]  }
  0x1b   :  { %3968 = vmatpush1.bf16.msra.mxu0 %v12209_v26  ;;  %v12287_v15 = vld [vmem:[%s18869_s1 + $0x5f4] ss:$40 sps:$4 sm:$0xff]   ;;  %v12285_v17 = vld [vmem:[%s18869_s1 + $0x5f0] ss:$40 sps:$4 sm:$0xff]   ;;  %v12293_v19 = vld [vmem:[%s18869_s1 + $0x644] ss:$40 sps:$4 sm:$0xff]  }
  0x1c   :  { %4132 = vmatpush1.bf16.msra.mxu1 %v12210_v27  ;;  %3969 = vmatprep.subr.bf16.mxu0 %v12211_v28  ;;  %v12288_v18 = vld [vmem:[%s18869_s1 + $0x5f8] ss:$40 sps:$4 sm:$0xff]   ;;  %v12296_v20 = vld [vmem:[%s18869_s1 + $0x64c] ss:$40 sps:$4 sm:$0xff]   ;;  %v12294_v22 = vld [vmem:[%s18869_s1 + $0x648] ss:$40 sps:$4 sm:$0xff]  }
  0x1d   :  { %4133 = vmatprep.subr.bf16.mxu1 %v12213_v29  ;;  %v12291_v21 = vld [vmem:[%s18869_s1 + $0x640] ss:$40 sps:$4 sm:$0xff]   ;;  %v12299_v23 = vld [vmem:[%s18869_s1 + $0x694] ss:$40 sps:$4 sm:$0xff]   ;;  %v12297_v25 = vld [vmem:[%s18869_s1 + $0x690] ss:$40 sps:$4 sm:$0xff]  }
  0x1e   :  { %v12302_v24 = vld [vmem:[%s18869_s1 + $0x69c] ss:$40 sps:$4 sm:$0xff]   ;;  %v12300_v26 = vld [vmem:[%s18869_s1 + $0x698] ss:$40 sps:$4 sm:$0xff]   ;;  %v12308_v28 = vld [vmem:[%s18869_s1 + $0x6ec] ss:$40 sps:$4 sm:$0xff]  }
  0x1f   :  { %3970 = vmatpush1.bf16.msra.mxu0 %v12215_v30  ;;  %v12305_v27 = vld [vmem:[%s18869_s1 + $0x6e4] ss:$40 sps:$4 sm:$0xff]  }
  0x20   :  { %4134 = vmatpush1.bf16.msra.mxu1 %v12216_v31  ;;  %3971 = vmatprep.subr.bf16.mxu0 %v12217_v32  ;;  %v14674_v29 = vld [vmem:[%s18870_s0 + $0x8] sm:$0xff] }
  0x21   :  { %4135 = vmatprep.subr.bf16.mxu1 %v12219_v33  ;;  %v14678_v30 = vcombine.high %v14674_v29, %v14674_v29  ;;  %v12303_v31 = vld [vmem:[%s18869_s1 + $0x6e0] ss:$40 sps:$4 sm:$0xff]   ;;  %v12311_v33 = vld [vmem:[%s18869_s1 + $0x734] ss:$40 sps:$4 sm:$0xff]  }
  0x22   :  { %v12306_v32 = vld [vmem:[%s18869_s1 + $0x6e8] ss:$40 sps:$4 sm:$0xff]   ;;  %v12332_v46 = vld [vmem:[%s18869_s1 + $0x82c] ss:$40 sps:$4 sm:$0xff]  }
  0x23   :  { %3972 = vmatpush1.bf16.msra.mxu0 %v12221_v34  ;;  %v12314_v34 = vld [vmem:[%s18869_s1 + $0x73c] ss:$40 sps:$4 sm:$0xff]  }
  0x24   :  { %4136 = vmatpush1.bf16.msra.mxu1 %v12222_v35  ;;  %3973 = vmatprep.subr.bf16.mxu0 %v12223_v36  ;;  %v12309_v35 = vld [vmem:[%s18869_s1 + $0x730] ss:$40 sps:$4 sm:$0xff]  }
  0x25   :  { %4137 = vmatprep.subr.bf16.mxu1 %v12225_v37  ;;  %v12312_v36 = vld [vmem:[%s18869_s1 + $0x738] ss:$40 sps:$4 sm:$0xff]   ;;  %v12317_v37 = vld [vmem:[%s18869_s1 + $0x784] ss:$40 sps:$4 sm:$0xff]  }
  0x27   :  { %3974 = vmatpush1.bf16.msra.mxu0 %v12227_v38  ;;  %v12320_v38 = vld [vmem:[%s18869_s1 + $0x78c] ss:$40 sps:$4 sm:$0xff]  }
  0x28   :  { %4138 = vmatpush1.bf16.msra.mxu1 %v12228_v39  ;;  %3975 = vmatprep.subr.bf16.mxu0 %v12229_v40  ;;  %v12315_v39 = vld [vmem:[%s18869_s1 + $0x780] ss:$40 sps:$4 sm:$0xff]  }
  0x29   :  { %4139 = vmatprep.subr.bf16.mxu1 %v12231_v41  ;;  %v12318_v40 = vld [vmem:[%s18869_s1 + $0x788] ss:$40 sps:$4 sm:$0xff]   ;;  %v12323_v41 = vld [vmem:[%s18869_s1 + $0x7d4] ss:$40 sps:$4 sm:$0xff]  }
  0x2b   :  { %3976 = vmatpush1.bf16.msra.mxu0 %v12233_v42  ;;  %v12326_v42 = vld [vmem:[%s18869_s1 + $0x7dc] ss:$40 sps:$4 sm:$0xff]  }
  0x2c   :  { %4140 = vmatpush1.bf16.msra.mxu1 %v12234_v43  ;;  %3977 = vmatprep.subr.bf16.mxu0 %v12235_v44  ;;  %v12321_v43 = vld [vmem:[%s18869_s1 + $0x7d0] ss:$40 sps:$4 sm:$0xff]  }
  0x2d   :  { %4141 = vmatprep.subr.bf16.mxu1 %v12237_v45  ;;  %v12324_v44 = vld [vmem:[%s18869_s1 + $0x7d8] ss:$40 sps:$4 sm:$0xff]   ;;  %v12329_v45 = vld [vmem:[%s18869_s1 + $0x824] ss:$40 sps:$4 sm:$0xff]  }
  0x2f   :  { %3978 = vmatpush1.bf16.msra.mxu0 %v12239_v47  ;;  %v12327_v47 = vld [vmem:[%s18869_s1 + $0x820] ss:$40 sps:$4 sm:$0xff]  }
  0x30   :  { %4142 = vmatpush1.bf16.msra.mxu1 %v12240_v49  ;;  %3979 = vmatprep.subr.bf16.mxu0 %v12241_v50  ;;  %v12330_v49 = vld [vmem:[%s18869_s1 + $0x828] ss:$40 sps:$4 sm:$0xff]   ;;  %v12335_v50 = vld [vmem:[%s18869_s1 + $0x874] ss:$40 sps:$4 sm:$0xff]  }
  0x31   :  { %4143 = vmatprep.subr.bf16.mxu1 %v12243_v51  ;;  %v12338_v51 = vld [vmem:[%s18869_s1 + $0x87c] ss:$40 sps:$4 sm:$0xff]  }
  0x33   :  { %3980 = vmatpush1.bf16.msra.mxu0 %v12245_v52  ;;  %v12333_v52 = vld [vmem:[%s18869_s1 + $0x870] ss:$40 sps:$4 sm:$0xff]  }
  0x34   :  { %4144 = vmatpush1.bf16.msra.mxu1 %v12246_v53  ;;  %3981 = vmatprep.subr.bf16.mxu0 %v12247_v54  ;;  %v12336_v53 = vld [vmem:[%s18869_s1 + $0x878] ss:$40 sps:$4 sm:$0xff]   ;;  %v12341_v54 = vld [vmem:[%s18869_s1 + $0x8c4] ss:$40 sps:$4 sm:$0xff]  }
  0x35   :  { %4145 = vmatprep.subr.bf16.mxu1 %v12249_v55  ;;  %v12344_v55 = vld [vmem:[%s18869_s1 + $0x8cc] ss:$40 sps:$4 sm:$0xff]  }
  0x37   :  { %3982 = vmatpush1.bf16.msra.mxu0 %v12251_v56  ;;  %v12339_v56 = vld [vmem:[%s18869_s1 + $0x8c0] ss:$40 sps:$4 sm:$0xff]  }
  0x38   :  { %4146 = vmatpush1.bf16.msra.mxu1 %v12252_v57  ;;  %3983 = vmatprep.subr.bf16.mxu0 %v12253_v58  ;;  %v12342_v57 = vld [vmem:[%s18869_s1 + $0x8c8] ss:$40 sps:$4 sm:$0xff]   ;;  %v12347_v58 = vld [vmem:[%s18869_s1 + $0x914] ss:$40 sps:$4 sm:$0xff]  }
  0x39   :  { %4147 = vmatprep.subr.bf16.mxu1 %v12255_v59  ;;  %v12350_v59 = vld [vmem:[%s18869_s1 + $0x91c] ss:$40 sps:$4 sm:$0xff]  }
  0x3b   :  { %3984 = vmatpush1.bf16.msra.mxu0 %v12257_v60  ;;  %v12345_v60 = vld [vmem:[%s18869_s1 + $0x910] ss:$40 sps:$4 sm:$0xff]  }
  0x3c   :  { %4148 = vmatpush1.bf16.msra.mxu1 %v12258_v61  ;;  %3985 = vmatprep.subr.bf16.mxu0 %v12259_v62  ;;  %v12348_v61 = vld [vmem:[%s18869_s1 + $0x918] ss:$40 sps:$4 sm:$0xff]   ;;  %v12353_v62 = vld [vmem:[%s18869_s1 + $0x964] ss:$40 sps:$4 sm:$0xff]  }
  0x3d   :  { %4149 = vmatprep.subr.bf16.mxu1 %v12261_v63  ;;  %v12356_v63 = vld [vmem:[%s18869_s1 + $0x96c] ss:$40 sps:$4 sm:$0xff]  }
  0x3f   :  { %3986 = vmatpush1.bf16.msra.mxu0 %v12263_v0  ;;  %v12351_v0 = vld [vmem:[%s18869_s1 + $0x960] ss:$40 sps:$4 sm:$0xff]  }
  0x40   :  { %4150 = vmatpush1.bf16.msra.mxu1 %v12264_v1  ;;  %3996 = vmatprep.subr.bf16.mxu0 %v12268_v2  ;;  %v12354_v1 = vld [vmem:[%s18869_s1 + $0x968] ss:$40 sps:$4 sm:$0xff]   ;;  %v12359_v2 = vld [vmem:[%s18869_s1 + $0x9b4] ss:$40 sps:$4 sm:$0xff]  }
  0x41   :  { %4160 = vmatprep.subr.bf16.mxu1 %v12271_v3  ;;  %v12362_v3 = vld [vmem:[%s18869_s1 + $0x9bc] ss:$40 sps:$4 sm:$0xff]  }
  0x42   :  { %3988 = vmatmul.mubr.bf16.vlgmr.msra.gmra.mrb[0].mxu0 %v14598_v5 }
  0x43   :  { %4152 = vmatmul.mubr.bf16.vlgmr.msra.gmra.mrb[0].mxu1 %v14598_v5  ;;  %3997 = vmatpush1.bf16.msra.mxu0 %v12266_v4  ;;  %v12357_v4 = vld [vmem:[%s18869_s1 + $0x9b0] ss:$40 sps:$4 sm:$0xff]  }
  0x44   :  { %4161 = vmatpush1.bf16.msra.mxu1 %v12269_v6  ;;  %3998 = vmatprep.subr.bf16.mxu0 %v12275_v7  ;;  %v12360_v6 = vld [vmem:[%s18869_s1 + $0x9b8] ss:$40 sps:$4 sm:$0xff]   ;;  %v12366_v7 = vld [vmem:[%s18869_s1 + $0xa04] ss:$40 sps:$4 sm:$0xff]  }
  0x45   :  { %4162 = vmatprep.subr.bf16.mxu1 %v12278_v8  ;;  %4028 = vmatprep.mubr.bf16.mxu0 %v14678_v30  ;;  %v12369_v8 = vld [vmem:[%s18869_s1 + $0xa0c] ss:$40 sps:$4 sm:$0xff]  }
  0x46   :  { %4192 = vmatprep.mubr.bf16.mxu1 %v14678_v30 }
  0x47   :  { %3999 = vmatpush1.bf16.msra.mxu0 %v12273_v9  ;;  %v12364_v9 = vld [vmem:[%s18869_s1 + $0xa00] ss:$40 sps:$4 sm:$0xff]  }
  0x48   :  { %4163 = vmatpush1.bf16.msra.mxu1 %v12276_v10  ;;  %4000 = vmatprep.subr.bf16.mxu0 %v12281_v11  ;;  %v14807_v10 = vcombine.low %v14674_v29, %v14674_v29  ;;  %v12367_v11 = vld [vmem:[%s18869_s1 + $0xa08] ss:$40 sps:$4 sm:$0xff]  }
  0x49   :  { %4164 = vmatprep.subr.bf16.mxu1 %v12284_v12  ;;  %v12373_v12 = vld [vmem:[%s18869_s1 + $0xa54] ss:$40 sps:$4 sm:$0xff]   ;;  %v12392_v29 = vld [vmem:[%s18869_s1 + $0xb48] ss:$40 sps:$4 sm:$0xff]  }
  0x4b   :  { %4001 = vmatpush1.bf16.msra.mxu0 %v12279_v13  ;;  %v14818_v13 = vld [vmem:[%s18870_s0 + $0x10] sm:$0xff] }
  0x4c   :  { %4165 = vmatpush1.bf16.msra.mxu1 %v12282_v14  ;;  %4002 = vmatprep.subr.bf16.mxu0 %v12287_v15  ;;  %v12376_v14 = vld [vmem:[%s18869_s1 + $0xa5c] ss:$40 sps:$4 sm:$0xff]   ;;  %v14825_v15 = vcombine.high %v14818_v13, %v14818_v13 }
  0x4d   :  { %4166 = vmatprep.subr.bf16.mxu1 %v12290_v16  ;;  %v12371_v16 = vld [vmem:[%s18869_s1 + $0xa50] ss:$40 sps:$4 sm:$0xff]  }
  0x4f   :  { %4003 = vmatpush1.bf16.msra.mxu0 %v12285_v17  ;;  %v12374_v17 = vld [vmem:[%s18869_s1 + $0xa58] ss:$40 sps:$4 sm:$0xff]  }
  0x50   :  { %4167 = vmatpush1.bf16.msra.mxu1 %v12288_v18  ;;  %4004 = vmatprep.subr.bf16.mxu0 %v12293_v19  ;;  %v12379_v18 = vld [vmem:[%s18869_s1 + $0xaa4] ss:$40 sps:$4 sm:$0xff]  }
  0x51   :  { %4168 = vmatprep.subr.bf16.mxu1 %v12296_v20  ;;  %v12382_v19 = vld [vmem:[%s18869_s1 + $0xaac] ss:$40 sps:$4 sm:$0xff]   ;;  %v12377_v20 = vld [vmem:[%s18869_s1 + $0xaa0] ss:$40 sps:$4 sm:$0xff]  }
  0x53   :  { %4005 = vmatpush1.bf16.msra.mxu0 %v12291_v21  ;;  %v12380_v21 = vld [vmem:[%s18869_s1 + $0xaa8] ss:$40 sps:$4 sm:$0xff]  }
  0x54   :  { %4169 = vmatpush1.bf16.msra.mxu1 %v12294_v22  ;;  %4006 = vmatprep.subr.bf16.mxu0 %v12299_v23  ;;  %v12385_v22 = vld [vmem:[%s18869_s1 + $0xaf4] ss:$40 sps:$4 sm:$0xff]  }
  0x55   :  { %4170 = vmatprep.subr.bf16.mxu1 %v12302_v24  ;;  %v12388_v23 = vld [vmem:[%s18869_s1 + $0xafc] ss:$40 sps:$4 sm:$0xff]   ;;  %v12383_v24 = vld [vmem:[%s18869_s1 + $0xaf0] ss:$40 sps:$4 sm:$0xff]  }
  0x57   :  { %4007 = vmatpush1.bf16.msra.mxu0 %v12297_v25  ;;  %v12386_v25 = vld [vmem:[%s18869_s1 + $0xaf8] ss:$40 sps:$4 sm:$0xff]  }
  0x58   :  { %4171 = vmatpush1.bf16.msra.mxu1 %v12300_v26  ;;  %4008 = vmatprep.subr.bf16.mxu0 %v12305_v27  ;;  %v12391_v26 = vld [vmem:[%s18869_s1 + $0xb44] ss:$40 sps:$4 sm:$0xff]  }
  0x59   :  { %4172 = vmatprep.subr.bf16.mxu1 %v12308_v28  ;;  %v12394_v27 = vld [vmem:[%s18869_s1 + $0xb4c] ss:$40 sps:$4 sm:$0xff]   ;;  %v12389_v28 = vld [vmem:[%s18869_s1 + $0xb40] ss:$40 sps:$4 sm:$0xff]  }
  0x5b   :  { %4009 = vmatpush1.bf16.msra.mxu0 %v12303_v31  ;;  %v12397_v31 = vld [vmem:[%s18869_s1 + $0xb94] ss:$40 sps:$4 sm:$0xff]  }
  0x5c   :  { %4173 = vmatpush1.bf16.msra.mxu1 %v12306_v32  ;;  %4010 = vmatprep.subr.bf16.mxu0 %v12311_v33  ;;  %v12400_v32 = vld [vmem:[%s18869_s1 + $0xb9c] ss:$40 sps:$4 sm:$0xff]   ;;  %v12395_v33 = vld [vmem:[%s18869_s1 + $0xb90] ss:$40 sps:$4 sm:$0xff]  }
  0x5d   :  { %4174 = vmatprep.subr.bf16.mxu1 %v12314_v34  ;;  %v12398_v34 = vld [vmem:[%s18869_s1 + $0xb98] ss:$40 sps:$4 sm:$0xff]  }
  0x5f   :  { %4011 = vmatpush1.bf16.msra.mxu0 %v12309_v35  ;;  %v12403_v35 = vld [vmem:[%s18869_s1 + $0xbe4] ss:$40 sps:$4 sm:$0xff]  }
  0x60   :  { %4175 = vmatpush1.bf16.msra.mxu1 %v12312_v36  ;;  %4012 = vmatprep.subr.bf16.mxu0 %v12317_v37  ;;  %v12406_v36 = vld [vmem:[%s18869_s1 + $0xbec] ss:$40 sps:$4 sm:$0xff]   ;;  %v12401_v37 = vld [vmem:[%s18869_s1 + $0xbe0] ss:$40 sps:$4 sm:$0xff]  }
  0x61   :  { %4176 = vmatprep.subr.bf16.mxu1 %v12320_v38  ;;  %v12404_v38 = vld [vmem:[%s18869_s1 + $0xbe8] ss:$40 sps:$4 sm:$0xff]  }
  0x63   :  { %4013 = vmatpush1.bf16.msra.mxu0 %v12315_v39  ;;  %v12409_v39 = vld [vmem:[%s18869_s1 + $0xc34] ss:$40 sps:$4 sm:$0xff]  }
  0x64   :  { %4177 = vmatpush1.bf16.msra.mxu1 %v12318_v40  ;;  %4014 = vmatprep.subr.bf16.mxu0 %v12323_v41  ;;  %v12412_v40 = vld [vmem:[%s18869_s1 + $0xc3c] ss:$40 sps:$4 sm:$0xff]   ;;  %v12407_v41 = vld [vmem:[%s18869_s1 + $0xc30] ss:$40 sps:$4 sm:$0xff]  }
  0x65   :  { %4178 = vmatprep.subr.bf16.mxu1 %v12326_v42  ;;  %v12410_v42 = vld [vmem:[%s18869_s1 + $0xc38] ss:$40 sps:$4 sm:$0xff]  }
  0x67   :  { %4015 = vmatpush1.bf16.msra.mxu0 %v12321_v43  ;;  %v12415_v43 = vld [vmem:[%s18869_s1 + $0xc84] ss:$40 sps:$4 sm:$0xff]  }
  0x68   :  { %4179 = vmatpush1.bf16.msra.mxu1 %v12324_v44  ;;  %4016 = vmatprep.subr.bf16.mxu0 %v12329_v45  ;;  %v12418_v44 = vld [vmem:[%s18869_s1 + $0xc8c] ss:$40 sps:$4 sm:$0xff]   ;;  %v12413_v45 = vld [vmem:[%s18869_s1 + $0xc80] ss:$40 sps:$4 sm:$0xff]  }
  0x69   :  { %4180 = vmatprep.subr.bf16.mxu1 %v12332_v46  ;;  %v12416_v46 = vld [vmem:[%s18869_s1 + $0xc88] ss:$40 sps:$4 sm:$0xff]  }
  0x6b   :  { %4017 = vmatpush1.bf16.msra.mxu0 %v12327_v47  ;;  %v12421_v47 = vld [vmem:[%s18869_s1 + $0xcd4] ss:$40 sps:$4 sm:$0xff]  }
  0x6c   :  { %4181 = vmatpush1.bf16.msra.mxu1 %v12330_v49  ;;  %4018 = vmatprep.subr.bf16.mxu0 %v12335_v50  ;;  %v12424_v49 = vld [vmem:[%s18869_s1 + $0xcdc] ss:$40 sps:$4 sm:$0xff]   ;;  %v12419_v50 = vld [vmem:[%s18869_s1 + $0xcd0] ss:$40 sps:$4 sm:$0xff]  }
  0x6d   :  { %4182 = vmatprep.subr.bf16.mxu1 %v12338_v51  ;;  %v12422_v51 = vld [vmem:[%s18869_s1 + $0xcd8] ss:$40 sps:$4 sm:$0xff]  }
  0x6f   :  { %4019 = vmatpush1.bf16.msra.mxu0 %v12333_v52  ;;  %v12427_v52 = vld [vmem:[%s18869_s1 + $0xd24] ss:$40 sps:$4 sm:$0xff]  }
  0x70   :  { %4183 = vmatpush1.bf16.msra.mxu1 %v12336_v53  ;;  %4020 = vmatprep.subr.bf16.mxu0 %v12341_v54  ;;  %v12430_v53 = vld [vmem:[%s18869_s1 + $0xd2c] ss:$40 sps:$4 sm:$0xff]   ;;  %v12425_v54 = vld [vmem:[%s18869_s1 + $0xd20] ss:$40 sps:$4 sm:$0xff]  }
  0x71   :  { %4184 = vmatprep.subr.bf16.mxu1 %v12344_v55  ;;  %v12428_v55 = vld [vmem:[%s18869_s1 + $0xd28] ss:$40 sps:$4 sm:$0xff]  }
  0x73   :  { %4021 = vmatpush1.bf16.msra.mxu0 %v12339_v56  ;;  %v12433_v56 = vld [vmem:[%s18869_s1 + $0xd74] ss:$40 sps:$4 sm:$0xff]  }
  0x74   :  { %4185 = vmatpush1.bf16.msra.mxu1 %v12342_v57  ;;  %4022 = vmatprep.subr.bf16.mxu0 %v12347_v58  ;;  %v12436_v57 = vld [vmem:[%s18869_s1 + $0xd7c] ss:$40 sps:$4 sm:$0xff]   ;;  %v12431_v58 = vld [vmem:[%s18869_s1 + $0xd70] ss:$40 sps:$4 sm:$0xff]  }
  0x75   :  { %4186 = vmatprep.subr.bf16.mxu1 %v12350_v59  ;;  %v12434_v59 = vld [vmem:[%s18869_s1 + $0xd78] ss:$40 sps:$4 sm:$0xff]  }
  0x77   :  { %4023 = vmatpush1.bf16.msra.mxu0 %v12345_v60  ;;  %v12439_v60 = vld [vmem:[%s18869_s1 + $0xdc4] ss:$40 sps:$4 sm:$0xff]  }
  0x78   :  { %4187 = vmatpush1.bf16.msra.mxu1 %v12348_v61  ;;  %4024 = vmatprep.subr.bf16.mxu0 %v12353_v62  ;;  %v12442_v61 = vld [vmem:[%s18869_s1 + $0xdcc] ss:$40 sps:$4 sm:$0xff]   ;;  %v12437_v62 = vld [vmem:[%s18869_s1 + $0xdc0] ss:$40 sps:$4 sm:$0xff]  }
  0x79   :  { %4188 = vmatprep.subr.bf16.mxu1 %v12356_v63  ;;  %v12440_v63 = vld [vmem:[%s18869_s1 + $0xdc8] ss:$40 sps:$4 sm:$0xff]  }
  0x7b   :  { %4025 = vmatpush1.bf16.msra.mxu0 %v12351_v0  ;;  %v12445_v0 = vld [vmem:[%s18869_s1 + $0xe14] ss:$40 sps:$4 sm:$0xff]  }
  0x7c   :  { %4189 = vmatpush1.bf16.msra.mxu1 %v12354_v1  ;;  %4026 = vmatprep.subr.bf16.mxu0 %v12359_v2  ;;  %v12448_v1 = vld [vmem:[%s18869_s1 + $0xe1c] ss:$40 sps:$4 sm:$0xff]   ;;  %v12443_v2 = vld [vmem:[%s18869_s1 + $0xe10] ss:$40 sps:$4 sm:$0xff]  }
  0x7d   :  { %4190 = vmatprep.subr.bf16.mxu1 %v12362_v3  ;;  %v12446_v3 = vld [vmem:[%s18869_s1 + $0xe18] ss:$40 sps:$4 sm:$0xff]  }
  0x7f   :  { %4027 = vmatpush1.bf16.msra.mxu0 %v12357_v4  ;;  %v12451_v4 = vld [vmem:[%s18869_s1 + $0xe64] ss:$40 sps:$4 sm:$0xff]  }
  0x80   :  { %4191 = vmatpush1.bf16.msra.mxu1 %v12360_v6  ;;  %4037 = vmatprep.subr.bf16.mxu0 %v12366_v7  ;;  %v12454_v6 = vld [vmem:[%s18869_s1 + $0xe6c] ss:$40 sps:$4 sm:$0xff]   ;;  %v12449_v7 = vld [vmem:[%s18869_s1 + $0xe60] ss:$40 sps:$4 sm:$0xff]  }
  0x81   :  { %4201 = vmatprep.subr.bf16.mxu1 %v12369_v8  ;;  %v12452_v8 = vld [vmem:[%s18869_s1 + $0xe68] ss:$40 sps:$4 sm:$0xff]  }
  0x82   :  { %4029 = vmatmul.mubr.bf16.vlgmr.msra.gmra.mrb[0].mxu0 %v14807_v10 }
  0x83   :  { %4193 = vmatmul.mubr.bf16.vlgmr.msra.gmra.mrb[0].mxu1 %v14807_v10  ;;  %4038 = vmatpush1.bf16.msra.mxu0 %v12364_v9  ;;  %v12457_v9 = vld [vmem:[%s18869_s1 + $0xeb4] ss:$40 sps:$4 sm:$0xff]  }
  0x84   :  { %4202 = vmatpush1.bf16.msra.mxu1 %v12367_v11  ;;  %4039 = vmatprep.subr.bf16.mxu0 %v12373_v12  ;;  %v12460_v11 = vld [vmem:[%s18869_s1 + $0xebc] ss:$40 sps:$4 sm:$0xff]   ;;  %v12455_v12 = vld [vmem:[%s18869_s1 + $0xeb0] ss:$40 sps:$4 sm:$0xff]  }
  0x85   :  { %4203 = vmatprep.subr.bf16.mxu1 %v12376_v14  ;;  %4069 = vmatprep.mubr.bf16.mxu0 %v14825_v15  ;;  %v12458_v14 = vld [vmem:[%s18869_s1 + $0xeb8] ss:$40 sps:$4 sm:$0xff]  }
  0x86   :  { %4233 = vmatprep.mubr.bf16.mxu1 %v14825_v15 }
  0x87   :  { %4040 = vmatpush1.bf16.msra.mxu0 %v12371_v16  ;;  %v12464_v16 = vld [vmem:[%s18869_s1 + $0xf04] ss:$40 sps:$4 sm:$0xff]  }
  0x88   :  { %4204 = vmatpush1.bf16.msra.mxu1 %v12374_v17  ;;  %4041 = vmatprep.subr.bf16.mxu0 %v12379_v18  ;;  %v12467_v17 = vld [vmem:[%s18869_s1 + $0xf0c] ss:$40 sps:$4 sm:$0xff]   ;;  %v12462_v18 = vld [vmem:[%s18869_s1 + $0xf00] ss:$40 sps:$4 sm:$0xff]  }
  0x89   :  { %4205 = vmatprep.subr.bf16.mxu1 %v12382_v19  ;;  %v12465_v19 = vld [vmem:[%s18869_s1 + $0xf08] ss:$40 sps:$4 sm:$0xff]  }
  0x8b   :  { %4042 = vmatpush1.bf16.msra.mxu0 %v12377_v20  ;;  %v15019_v20 = vcombine.low %v14818_v13, %v14818_v13 }
  0x8c   :  { %4206 = vmatpush1.bf16.msra.mxu1 %v12380_v21  ;;  %4043 = vmatprep.subr.bf16.mxu0 %v12385_v22  ;;  %v15024_v21 = vld [vmem:[%s18870_s0 + $0x18] sm:$0xff] }
  0x8d   :  { %4207 = vmatprep.subr.bf16.mxu1 %v12388_v23  ;;  %v12471_v22 = vld [vmem:[%s18869_s1 + $0xf54] ss:$40 sps:$4 sm:$0xff]   ;;  %v15034_v13 = vcombine.high %v15024_v21, %v15024_v21 }
  0x8e   :  { %v12474_v23 = vld [vmem:[%s18869_s1 + $0xf5c] ss:$40 sps:$4 sm:$0xff]  }
  0x8f   :  { %4044 = vmatpush1.bf16.msra.mxu0 %v12383_v24  ;;  %v12469_v24 = vld [vmem:[%s18869_s1 + $0xf50] ss:$40 sps:$4 sm:$0xff]  }
  0x90   :  { %4208 = vmatpush1.bf16.msra.mxu1 %v12386_v25  ;;  %4045 = vmatprep.subr.bf16.mxu0 %v12391_v26  ;;  %v12472_v25 = vld [vmem:[%s18869_s1 + $0xf58] ss:$40 sps:$4 sm:$0xff]   ;;  %v12477_v26 = vld [vmem:[%s18869_s1 + $0xfa4] ss:$40 sps:$4 sm:$0xff]  }
  0x91   :  { %4209 = vmatprep.subr.bf16.mxu1 %v12394_v27  ;;  %v12480_v27 = vld [vmem:[%s18869_s1 + $0xfac] ss:$40 sps:$4 sm:$0xff]  }
  0x93   :  { %4046 = vmatpush1.bf16.msra.mxu0 %v12389_v28  ;;  %v12475_v28 = vld [vmem:[%s18869_s1 + $0xfa0] ss:$40 sps:$4 sm:$0xff]  }
  0x94   :  { %4210 = vmatpush1.bf16.msra.mxu1 %v12392_v29  ;;  %4047 = vmatprep.subr.bf16.mxu0 %v12397_v31  ;;  %v12478_v29 = vld [vmem:[%s18869_s1 + $0xfa8] ss:$40 sps:$4 sm:$0xff]   ;;  %v12483_v31 = vld [vmem:[%s18869_s1 + $0xff4] ss:$40 sps:$4 sm:$0xff]  }
  0x95   :  { %4211 = vmatprep.subr.bf16.mxu1 %v12400_v32  ;;  %v12486_v32 = vld [vmem:[%s18869_s1 + $0xffc] ss:$40 sps:$4 sm:$0xff]  }
  0x97   :  { %4048 = vmatpush1.bf16.msra.mxu0 %v12395_v33  ;;  %v12481_v33 = vld [vmem:[%s18869_s1 + $0xff0] ss:$40 sps:$4 sm:$0xff]  }
  0x98   :  { %4212 = vmatpush1.bf16.msra.mxu1 %v12398_v34  ;;  %4049 = vmatprep.subr.bf16.mxu0 %v12403_v35  ;;  %v12484_v34 = vld [vmem:[%s18869_s1 + $0xff8] ss:$40 sps:$4 sm:$0xff]   ;;  %v12489_v35 = vld [vmem:[%s18869_s1 + $0x1044] ss:$40 sps:$4 sm:$0xff]  }
  0x99   :  { %4213 = vmatprep.subr.bf16.mxu1 %v12406_v36  ;;  %v12492_v36 = vld [vmem:[%s18869_s1 + $0x104c] ss:$40 sps:$4 sm:$0xff]  }
  0x9b   :  { %4050 = vmatpush1.bf16.msra.mxu0 %v12401_v37  ;;  %v12487_v37 = vld [vmem:[%s18869_s1 + $0x1040] ss:$40 sps:$4 sm:$0xff]  }
  0x9c   :  { %4214 = vmatpush1.bf16.msra.mxu1 %v12404_v38  ;;  %4051 = vmatprep.subr.bf16.mxu0 %v12409_v39  ;;  %v12490_v38 = vld [vmem:[%s18869_s1 + $0x1048] ss:$40 sps:$4 sm:$0xff]   ;;  %v12495_v39 = vld [vmem:[%s18869_s1 + $0x1094] ss:$40 sps:$4 sm:$0xff]  }
  0x9d   :  { %4215 = vmatprep.subr.bf16.mxu1 %v12412_v40  ;;  %v12498_v40 = vld [vmem:[%s18869_s1 + $0x109c] ss:$40 sps:$4 sm:$0xff]  }
  0x9f   :  { %4052 = vmatpush1.bf16.msra.mxu0 %v12407_v41  ;;  %v12493_v41 = vld [vmem:[%s18869_s1 + $0x1090] ss:$40 sps:$4 sm:$0xff]  }
  0xa0   :  { %4216 = vmatpush1.bf16.msra.mxu1 %v12410_v42  ;;  %4053 = vmatprep.subr.bf16.mxu0 %v12415_v43  ;;  %v12496_v42 = vld [vmem:[%s18869_s1 + $0x1098] ss:$40 sps:$4 sm:$0xff]   ;;  %v12501_v43 = vld [vmem:[%s18869_s1 + $0x10e4] ss:$40 sps:$4 sm:$0xff]  }
  0xa1   :  { %4217 = vmatprep.subr.bf16.mxu1 %v12418_v44  ;;  %v12504_v44 = vld [vmem:[%s18869_s1 + $0x10ec] ss:$40 sps:$4 sm:$0xff]  }
  0xa3   :  { %4054 = vmatpush1.bf16.msra.mxu0 %v12413_v45  ;;  %v12499_v45 = vld [vmem:[%s18869_s1 + $0x10e0] ss:$40 sps:$4 sm:$0xff]  }
  0xa4   :  { %4218 = vmatpush1.bf16.msra.mxu1 %v12416_v46  ;;  %4055 = vmatprep.subr.bf16.mxu0 %v12421_v47  ;;  %v12502_v46 = vld [vmem:[%s18869_s1 + $0x10e8] ss:$40 sps:$4 sm:$0xff]   ;;  %v12507_v47 = vld [vmem:[%s18869_s1 + $0x1134] ss:$40 sps:$4 sm:$0xff]  }
  0xa5   :  { %4219 = vmatprep.subr.bf16.mxu1 %v12424_v49  ;;  %v12510_v49 = vld [vmem:[%s18869_s1 + $0x113c] ss:$40 sps:$4 sm:$0xff]  }
  0xa7   :  { %4056 = vmatpush1.bf16.msra.mxu0 %v12419_v50  ;;  %v12505_v50 = vld [vmem:[%s18869_s1 + $0x1130] ss:$40 sps:$4 sm:$0xff]  }
  0xa8   :  { %4220 = vmatpush1.bf16.msra.mxu1 %v12422_v51  ;;  %4057 = vmatprep.subr.bf16.mxu0 %v12427_v52  ;;  %v12508_v51 = vld [vmem:[%s18869_s1 + $0x1138] ss:$40 sps:$4 sm:$0xff]   ;;  %v12513_v52 = vld [vmem:[%s18869_s1 + $0x1184] ss:$40 sps:$4 sm:$0xff]  }
  0xa9   :  { %4221 = vmatprep.subr.bf16.mxu1 %v12430_v53  ;;  %v12516_v53 = vld [vmem:[%s18869_s1 + $0x118c] ss:$40 sps:$4 sm:$0xff]  }
  0xab   :  { %4058 = vmatpush1.bf16.msra.mxu0 %v12425_v54  ;;  %v12511_v54 = vld [vmem:[%s18869_s1 + $0x1180] ss:$40 sps:$4 sm:$0xff]  }
  0xac   :  { %4222 = vmatpush1.bf16.msra.mxu1 %v12428_v55  ;;  %4059 = vmatprep.subr.bf16.mxu0 %v12433_v56  ;;  %v12514_v55 = vld [vmem:[%s18869_s1 + $0x1188] ss:$40 sps:$4 sm:$0xff]   ;;  %v12519_v56 = vld [vmem:[%s18869_s1 + $0x11d4] ss:$40 sps:$4 sm:$0xff]  }
  0xad   :  { %4223 = vmatprep.subr.bf16.mxu1 %v12436_v57  ;;  %v12522_v57 = vld [vmem:[%s18869_s1 + $0x11dc] ss:$40 sps:$4 sm:$0xff]  }
  0xaf   :  { %4060 = vmatpush1.bf16.msra.mxu0 %v12431_v58  ;;  %v12517_v58 = vld [vmem:[%s18869_s1 + $0x11d0] ss:$40 sps:$4 sm:$0xff]  }
  0xb0   :  { %4224 = vmatpush1.bf16.msra.mxu1 %v12434_v59  ;;  %4061 = vmatprep.subr.bf16.mxu0 %v12439_v60  ;;  %v12520_v59 = vld [vmem:[%s18869_s1 + $0x11d8] ss:$40 sps:$4 sm:$0xff]   ;;  %v12525_v60 = vld [vmem:[%s18869_s1 + $0x1224] ss:$40 sps:$4 sm:$0xff]  }
  0xb1   :  { %4225 = vmatprep.subr.bf16.mxu1 %v12442_v61  ;;  %v12528_v61 = vld [vmem:[%s18869_s1 + $0x122c] ss:$40 sps:$4 sm:$0xff]  }
  0xb3   :  { %4062 = vmatpush1.bf16.msra.mxu0 %v12437_v62  ;;  %v12523_v62 = vld [vmem:[%s18869_s1 + $0x1220] ss:$40 sps:$4 sm:$0xff]  }
  0xb4   :  { %4226 = vmatpush1.bf16.msra.mxu1 %v12440_v63  ;;  %4063 = vmatprep.subr.bf16.mxu0 %v12445_v0  ;;  %v12526_v63 = vld [vmem:[%s18869_s1 + $0x1228] ss:$40 sps:$4 sm:$0xff]   ;;  %v12531_v0 = vld [vmem:[%s18869_s1 + $0x1274] ss:$40 sps:$4 sm:$0xff]  }
  0xb5   :  { %4227 = vmatprep.subr.bf16.mxu1 %v12448_v1  ;;  %v12534_v1 = vld [vmem:[%s18869_s1 + $0x127c] ss:$40 sps:$4 sm:$0xff]  }
  0xb7   :  { %4064 = vmatpush1.bf16.msra.mxu0 %v12443_v2  ;;  %v12529_v2 = vld [vmem:[%s18869_s1 + $0x1270] ss:$40 sps:$4 sm:$0xff]  }
  0xb8   :  { %4228 = vmatpush1.bf16.msra.mxu1 %v12446_v3  ;;  %4065 = vmatprep.subr.bf16.mxu0 %v12451_v4  ;;  %v12532_v3 = vld [vmem:[%s18869_s1 + $0x1278] ss:$40 sps:$4 sm:$0xff]   ;;  %v12537_v4 = vld [vmem:[%s18869_s1 + $0x12c4] ss:$40 sps:$4 sm:$0xff]  }
  0xb9   :  { %4229 = vmatprep.subr.bf16.mxu1 %v12454_v6  ;;  %v12540_v6 = vld [vmem:[%s18869_s1 + $0x12cc] ss:$40 sps:$4 sm:$0xff]  }
  0xbb   :  { %4066 = vmatpush1.bf16.msra.mxu0 %v12449_v7  ;;  %v12535_v7 = vld [vmem:[%s18869_s1 + $0x12c0] ss:$40 sps:$4 sm:$0xff]  }
  0xbc   :  { %4230 = vmatpush1.bf16.msra.mxu1 %v12452_v8  ;;  %4067 = vmatprep.subr.bf16.mxu0 %v12457_v9  ;;  %v12538_v8 = vld [vmem:[%s18869_s1 + $0x12c8] ss:$40 sps:$4 sm:$0xff]   ;;  %v12543_v9 = vld [vmem:[%s18869_s1 + $0x1314] ss:$40 sps:$4 sm:$0xff]  }
  0xbd   :  { %4231 = vmatprep.subr.bf16.mxu1 %v12460_v11  ;;  %v12546_v11 = vld [vmem:[%s18869_s1 + $0x131c] ss:$40 sps:$4 sm:$0xff]  }
  0xbf   :  { %4068 = vmatpush1.bf16.msra.mxu0 %v12455_v12  ;;  %v12541_v12 = vld [vmem:[%s18869_s1 + $0x1310] ss:$40 sps:$4 sm:$0xff]  }
  0xc0   :  { %4232 = vmatpush1.bf16.msra.mxu1 %v12458_v14  ;;  %4078 = vmatprep.subr.bf16.mxu0 %v12464_v16  ;;  %v12544_v14 = vld [vmem:[%s18869_s1 + $0x1318] ss:$40 sps:$4 sm:$0xff]   ;;  %v12549_v16 = vld [vmem:[%s18869_s1 + $0x1364] ss:$40 sps:$4 sm:$0xff]  }
  0xc1   :  { %4242 = vmatprep.subr.bf16.mxu1 %v12467_v17  ;;  %v12552_v17 = vld [vmem:[%s18869_s1 + $0x136c] ss:$40 sps:$4 sm:$0xff]  }
  0xc2   :  { %4070 = vmatmul.mubr.bf16.vlgmr.msra.gmra.mrb[0].mxu0 %v15019_v20 }
  0xc3   :  { %4234 = vmatmul.mubr.bf16.vlgmr.msra.gmra.mrb[0].mxu1 %v15019_v20  ;;  %4079 = vmatpush1.bf16.msra.mxu0 %v12462_v18  ;;  %v12547_v18 = vld [vmem:[%s18869_s1 + $0x1360] ss:$40 sps:$4 sm:$0xff]  }
  0xc4   :  { %4243 = vmatpush1.bf16.msra.mxu1 %v12465_v19  ;;  %4080 = vmatprep.subr.bf16.mxu0 %v12471_v22  ;;  %v12550_v19 = vld [vmem:[%s18869_s1 + $0x1368] ss:$40 sps:$4 sm:$0xff]   ;;  %v12555_v22 = vld [vmem:[%s18869_s1 + $0x13b4] ss:$40 sps:$4 sm:$0xff]  }
  0xc5   :  { %4244 = vmatprep.subr.bf16.mxu1 %v12474_v23  ;;  %4110 = vmatprep.mubr.bf16.mxu0 %v15034_v13  ;;  %v12558_v23 = vld [vmem:[%s18869_s1 + $0x13bc] ss:$40 sps:$4 sm:$0xff]  }
  0xc6   :  { %4274 = vmatprep.mubr.bf16.mxu1 %v15034_v13 }
  0xc7   :  { %4081 = vmatpush1.bf16.msra.mxu0 %v12469_v24  ;;  %v12553_v24 = vld [vmem:[%s18869_s1 + $0x13b0] ss:$40 sps:$4 sm:$0xff]  }
  0xc8   :  { %4245 = vmatpush1.bf16.msra.mxu1 %v12472_v25  ;;  %4082 = vmatprep.subr.bf16.mxu0 %v12477_v26  ;;  %v12556_v25 = vld [vmem:[%s18869_s1 + $0x13b8] ss:$40 sps:$4 sm:$0xff]   ;;  %v12563_v26 = vld [vmem:[%s18869_s1 + $0x14] ss:$40 sps:$4 sm:$0xff]  }
  0xc9   :  { %4246 = vmatprep.subr.bf16.mxu1 %v12480_v27  ;;  %v12566_v27 = vld [vmem:[%s18869_s1 + $0x1c] ss:$40 sps:$4 sm:$0xff]  }
  0xcb   :  { %4083 = vmatpush1.bf16.msra.mxu0 %v12475_v28  ;;  %v15222_v28 = vcombine.low %v15024_v21, %v15024_v21  ;;  %v12572_v21 = vld [vmem:[%s18869_s1 + $0x6c] ss:$40 sps:$4 sm:$0xff]  }
  0xcc   :  { %4247 = vmatpush1.bf16.msra.mxu1 %v12478_v29  ;;  %4084 = vmatprep.subr.bf16.mxu0 %v12483_v31  ;;  %v12561_v29 = vld [vmem:[%s18869_s1 + $0x10] ss:$40 sps:$4 sm:$0xff]  }
  0xcd   :  { %4248 = vmatprep.subr.bf16.mxu1 %v12486_v32  ;;  %v12564_v31 = vld [vmem:[%s18869_s1 + $0x18] ss:$40 sps:$4 sm:$0xff]   ;;  %v12569_v32 = vld [vmem:[%s18869_s1 + $0x64] ss:$40 sps:$4 sm:$0xff]  }
  0xcf   :  { %4085 = vmatpush1.bf16.msra.mxu0 %v12481_v33  ;;  %v12567_v33 = vld [vmem:[%s18869_s1 + $0x60] ss:$40 sps:$4 sm:$0xff]  }
  0xd0   :  { %4249 = vmatpush1.bf16.msra.mxu1 %v12484_v34  ;;  %4086 = vmatprep.subr.bf16.mxu0 %v12489_v35  ;;  %v12570_v34 = vld [vmem:[%s18869_s1 + $0x68] ss:$40 sps:$4 sm:$0xff]   ;;  %v12575_v35 = vld [vmem:[%s18869_s1 + $0xb4] ss:$40 sps:$4 sm:$0xff]  }
  0xd1   :  { %4250 = vmatprep.subr.bf16.mxu1 %v12492_v36  ;;  %v12578_v36 = vld [vmem:[%s18869_s1 + $0xbc] ss:$40 sps:$4 sm:$0xff]  }
  0xd3   :  { %4087 = vmatpush1.bf16.msra.mxu0 %v12487_v37  ;;  %v12573_v37 = vld [vmem:[%s18869_s1 + $0xb0] ss:$40 sps:$4 sm:$0xff]  }
  0xd4   :  { %4251 = vmatpush1.bf16.msra.mxu1 %v12490_v38  ;;  %4088 = vmatprep.subr.bf16.mxu0 %v12495_v39  ;;  %v12576_v38 = vld [vmem:[%s18869_s1 + $0xb8] ss:$40 sps:$4 sm:$0xff]   ;;  %v12581_v39 = vld [vmem:[%s18869_s1 + $0x104] ss:$40 sps:$4 sm:$0xff]  }
  0xd5   :  { %4252 = vmatprep.subr.bf16.mxu1 %v12498_v40  ;;  %v12584_v40 = vld [vmem:[%s18869_s1 + $0x10c] ss:$40 sps:$4 sm:$0xff]  }
  0xd7   :  { %4089 = vmatpush1.bf16.msra.mxu0 %v12493_v41  ;;  %v12579_v41 = vld [vmem:[%s18869_s1 + $0x100] ss:$40 sps:$4 sm:$0xff]  }
  0xd8   :  { %4253 = vmatpush1.bf16.msra.mxu1 %v12496_v42  ;;  %4090 = vmatprep.subr.bf16.mxu0 %v12501_v43  ;;  %v12582_v42 = vld [vmem:[%s18869_s1 + $0x108] ss:$40 sps:$4 sm:$0xff]   ;;  %v12587_v43 = vld [vmem:[%s18869_s1 + $0x154] ss:$40 sps:$4 sm:$0xff]  }
  0xd9   :  { %4254 = vmatprep.subr.bf16.mxu1 %v12504_v44  ;;  %v12590_v44 = vld [vmem:[%s18869_s1 + $0x15c] ss:$40 sps:$4 sm:$0xff]  }
  0xdb   :  { %4091 = vmatpush1.bf16.msra.mxu0 %v12499_v45  ;;  %v12585_v45 = vld [vmem:[%s18869_s1 + $0x150] ss:$40 sps:$4 sm:$0xff]  }
  0xdc   :  { %4255 = vmatpush1.bf16.msra.mxu1 %v12502_v46  ;;  %4092 = vmatprep.subr.bf16.mxu0 %v12507_v47  ;;  %v12588_v46 = vld [vmem:[%s18869_s1 + $0x158] ss:$40 sps:$4 sm:$0xff]   ;;  %v12593_v47 = vld [vmem:[%s18869_s1 + $0x1a4] ss:$40 sps:$4 sm:$0xff]  }
  0xdd   :  { %4256 = vmatprep.subr.bf16.mxu1 %v12510_v49  ;;  %v12596_v49 = vld [vmem:[%s18869_s1 + $0x1ac] ss:$40 sps:$4 sm:$0xff]  }
  0xdf   :  { %4093 = vmatpush1.bf16.msra.mxu0 %v12505_v50  ;;  %v12591_v50 = vld [vmem:[%s18869_s1 + $0x1a0] ss:$40 sps:$4 sm:$0xff]  }
  0xe0   :  { %4257 = vmatpush1.bf16.msra.mxu1 %v12508_v51  ;;  %4094 = vmatprep.subr.bf16.mxu0 %v12513_v52  ;;  %v12594_v51 = vld [vmem:[%s18869_s1 + $0x1a8] ss:$40 sps:$4 sm:$0xff]   ;;  %v12599_v52 = vld [vmem:[%s18869_s1 + $0x1f4] ss:$40 sps:$4 sm:$0xff]  }
  0xe1   :  { %4258 = vmatprep.subr.bf16.mxu1 %v12516_v53  ;;  %v12602_v53 = vld [vmem:[%s18869_s1 + $0x1fc] ss:$40 sps:$4 sm:$0xff]  }
  0xe3   :  { %4095 = vmatpush1.bf16.msra.mxu0 %v12511_v54  ;;  %v12597_v54 = vld [vmem:[%s18869_s1 + $0x1f0] ss:$40 sps:$4 sm:$0xff]  }
  0xe4   :  { %4259 = vmatpush1.bf16.msra.mxu1 %v12514_v55  ;;  %4096 = vmatprep.subr.bf16.mxu0 %v12519_v56  ;;  %v12600_v55 = vld [vmem:[%s18869_s1 + $0x1f8] ss:$40 sps:$4 sm:$0xff]   ;;  %v12605_v56 = vld [vmem:[%s18869_s1 + $0x244] ss:$40 sps:$4 sm:$0xff]  }
  0xe5   :  { %4260 = vmatprep.subr.bf16.mxu1 %v12522_v57  ;;  %v12608_v57 = vld [vmem:[%s18869_s1 + $0x24c] ss:$40 sps:$4 sm:$0xff]  }
  0xe7   :  { %4097 = vmatpush1.bf16.msra.mxu0 %v12517_v58  ;;  %v12603_v58 = vld [vmem:[%s18869_s1 + $0x240] ss:$40 sps:$4 sm:$0xff]  }
  0xe8   :  { %4261 = vmatpush1.bf16.msra.mxu1 %v12520_v59  ;;  %4098 = vmatprep.subr.bf16.mxu0 %v12525_v60  ;;  %v12606_v59 = vld [vmem:[%s18869_s1 + $0x248] ss:$40 sps:$4 sm:$0xff]   ;;  %v12611_v60 = vld [vmem:[%s18869_s1 + $0x294] ss:$40 sps:$4 sm:$0xff]  }
  0xe9   :  { %4262 = vmatprep.subr.bf16.mxu1 %v12528_v61  ;;  %v12614_v61 = vld [vmem:[%s18869_s1 + $0x29c] ss:$40 sps:$4 sm:$0xff]  }
  0xeb   :  { %4099 = vmatpush1.bf16.msra.mxu0 %v12523_v62  ;;  %v12609_v62 = vld [vmem:[%s18869_s1 + $0x290] ss:$40 sps:$4 sm:$0xff]  }
  0xec   :  { %4263 = vmatpush1.bf16.msra.mxu1 %v12526_v63  ;;  %4100 = vmatprep.subr.bf16.mxu0 %v12531_v0  ;;  %v12612_v63 = vld [vmem:[%s18869_s1 + $0x298] ss:$40 sps:$4 sm:$0xff]   ;;  %v12617_v0 = vld [vmem:[%s18869_s1 + $0x2e4] ss:$40 sps:$4 sm:$0xff]  }
  0xed   :  { %4264 = vmatprep.subr.bf16.mxu1 %v12534_v1  ;;  %v12620_v1 = vld [vmem:[%s18869_s1 + $0x2ec] ss:$40 sps:$4 sm:$0xff]  }
  0xef   :  { %4101 = vmatpush1.bf16.msra.mxu0 %v12529_v2  ;;  %v12615_v2 = vld [vmem:[%s18869_s1 + $0x2e0] ss:$40 sps:$4 sm:$0xff]  }
  0xf0   :  { %4265 = vmatpush1.bf16.msra.mxu1 %v12532_v3  ;;  %4102 = vmatprep.subr.bf16.mxu0 %v12537_v4  ;;  %v12618_v3 = vld [vmem:[%s18869_s1 + $0x2e8] ss:$40 sps:$4 sm:$0xff]   ;;  %v12623_v4 = vld [vmem:[%s18869_s1 + $0x334] ss:$40 sps:$4 sm:$0xff]  }
  0xf1   :  { %4266 = vmatprep.subr.bf16.mxu1 %v12540_v6  ;;  %v12626_v6 = vld [vmem:[%s18869_s1 + $0x33c] ss:$40 sps:$4 sm:$0xff]  }
  0xf3   :  { %4103 = vmatpush1.bf16.msra.mxu0 %v12535_v7  ;;  %v12621_v7 = vld [vmem:[%s18869_s1 + $0x330] ss:$40 sps:$4 sm:$0xff]  }
  0xf4   :  { %4267 = vmatpush1.bf16.msra.mxu1 %v12538_v8  ;;  %4104 = vmatprep.subr.bf16.mxu0 %v12543_v9  ;;  %v12624_v8 = vld [vmem:[%s18869_s1 + $0x338] ss:$40 sps:$4 sm:$0xff]   ;;  %v12629_v9 = vld [vmem:[%s18869_s1 + $0x384] ss:$40 sps:$4 sm:$0xff]  }
  0xf5   :  { %4268 = vmatprep.subr.bf16.mxu1 %v12546_v11  ;;  %v12632_v11 = vld [vmem:[%s18869_s1 + $0x38c] ss:$40 sps:$4 sm:$0xff]  }
  0xf7   :  { %4105 = vmatpush1.bf16.msra.mxu0 %v12541_v12  ;;  %v12627_v12 = vld [vmem:[%s18869_s1 + $0x380] ss:$40 sps:$4 sm:$0xff]  }
  0xf8   :  { %4269 = vmatpush1.bf16.msra.mxu1 %v12544_v14  ;;  %4106 = vmatprep.subr.bf16.mxu0 %v12549_v16  ;;  %v12630_v14 = vld [vmem:[%s18869_s1 + $0x388] ss:$40 sps:$4 sm:$0xff]   ;;  %v12635_v16 = vld [vmem:[%s18869_s1 + $0x3d4] ss:$40 sps:$4 sm:$0xff]  }
  0xf9   :  { %4270 = vmatprep.subr.bf16.mxu1 %v12552_v17  ;;  %v12638_v17 = vld [vmem:[%s18869_s1 + $0x3dc] ss:$40 sps:$4 sm:$0xff]  }
  0xfb   :  { %4107 = vmatpush1.bf16.msra.mxu0 %v12547_v18  ;;  %v12633_v18 = vld [vmem:[%s18869_s1 + $0x3d0] ss:$40 sps:$4 sm:$0xff]  }
  0xfc   :  { %4271 = vmatpush1.bf16.msra.mxu1 %v12550_v19  ;;  %4108 = vmatprep.subr.bf16.mxu0 %v12555_v22  ;;  %v12636_v19 = vld [vmem:[%s18869_s1 + $0x3d8] ss:$40 sps:$4 sm:$0xff]   ;;  %v12641_v22 = vld [vmem:[%s18869_s1 + $0x424] ss:$40 sps:$4 sm:$0xff]  }
  0xfd   :  { %4272 = vmatprep.subr.bf16.mxu1 %v12558_v23  ;;  %v12644_v23 = vld [vmem:[%s18869_s1 + $0x42c] ss:$40 sps:$4 sm:$0xff]  }
  0xff   :  { %4109 = vmatpush1.bf16.msra.mxu0 %v12553_v24  ;;  %v12639_v24 = vld [vmem:[%s18869_s1 + $0x420] ss:$40 sps:$4 sm:$0xff]  }
 0x100   :  { %4273 = vmatpush1.bf16.msra.mxu1 %v12556_v25  ;;  %4283 = vmatprep.subr.bf16.mxu0 %v12563_v26  ;;  %v12642_v25 = vld [vmem:[%s18869_s1 + $0x428] ss:$40 sps:$4 sm:$0xff]   ;;  %v12647_v26 = vld [vmem:[%s18869_s1 + $0x474] ss:$40 sps:$4 sm:$0xff]  }
 0x101   :  { %4447 = vmatprep.subr.bf16.mxu1 %v12566_v27  ;;  %v12650_v27 = vld [vmem:[%s18869_s1 + $0x47c] ss:$40 sps:$4 sm:$0xff]  }
 0x102   :  { %4111 = vmatmul.mubr.bf16.vlgmr.msra.gmra.mrb[0].mxu0 %v15222_v28 }
 0x103   :  { %4275 = vmatmul.mubr.bf16.vlgmr.msra.gmra.mrb[0].mxu1 %v15222_v28  ;;  %4284 = vmatpush1.bf16.msra.mxu0 %v12561_v29  ;;  %v12645_v29 = vld [vmem:[%s18869_s1 + $0x470] ss:$40 sps:$4 sm:$0xff]  }
 0x104   :  { %4448 = vmatpush1.bf16.msra.mxu1 %v12564_v31  ;;  %4285 = vmatprep.subr.bf16.mxu0 %v12569_v32  ;;  %v12648_v31 = vld [vmem:[%s18869_s1 + $0x478] ss:$40 sps:$4 sm:$0xff]   ;;  %v12653_v32 = vld [vmem:[%s18869_s1 + $0x4c4] ss:$40 sps:$4 sm:$0xff]  }
 0x105   :  { %4449 = vmatprep.subr.bf16.mxu1 %v12572_v21  ;;  %4315 = vmatprep.mubr.bf16.mxu0 %v14534_v48  ;;  %v12656_v21 = vld [vmem:[%s18869_s1 + $0x4cc] ss:$40 sps:$4 sm:$0xff]  }
 0x106   :  { %4479 = vmatprep.mubr.bf16.mxu1 %v14534_v48 }
 0x107   :  { %4286 = vmatpush1.bf16.msra.mxu0 %v12567_v33  ;;  %v12651_v33 = vld [vmem:[%s18869_s1 + $0x4c0] ss:$40 sps:$4 sm:$0xff]  }
 0x108   :  { %4450 = vmatpush1.bf16.msra.mxu1 %v12570_v34  ;;  %4287 = vmatprep.subr.bf16.mxu0 %v12575_v35  ;;  %v12654_v34 = vld [vmem:[%s18869_s1 + $0x4c8] ss:$40 sps:$4 sm:$0xff]   ;;  %v12659_v35 = vld [vmem:[%s18869_s1 + $0x514] ss:$40 sps:$4 sm:$0xff]  }
 0x109   :  { %4451 = vmatprep.subr.bf16.mxu1 %v12578_v36  ;;  %v12662_v36 = vld [vmem:[%s18869_s1 + $0x51c] ss:$40 sps:$4 sm:$0xff]  }
 0x10b   :  { %4288 = vmatpush1.bf16.msra.mxu0 %v12573_v37  ;;  %v12657_v37 = vld [vmem:[%s18869_s1 + $0x510] ss:$40 sps:$4 sm:$0xff]  }
 0x10c   :  { %4452 = vmatpush1.bf16.msra.mxu1 %v12576_v38  ;;  %4289 = vmatprep.subr.bf16.mxu0 %v12581_v39  ;;  %v12660_v38 = vld [vmem:[%s18869_s1 + $0x518] ss:$40 sps:$4 sm:$0xff]   ;;  %v12665_v39 = vld [vmem:[%s18869_s1 + $0x564] ss:$40 sps:$4 sm:$0xff]  }
 0x10d   :  { %4453 = vmatprep.subr.bf16.mxu1 %v12584_v40  ;;  %v12668_v40 = vld [vmem:[%s18869_s1 + $0x56c] ss:$40 sps:$4 sm:$0xff]  }
 0x10f   :  { %4290 = vmatpush1.bf16.msra.mxu0 %v12579_v41  ;;  %v12663_v41 = vld [vmem:[%s18869_s1 + $0x560] ss:$40 sps:$4 sm:$0xff]  }
 0x110   :  { %4454 = vmatpush1.bf16.msra.mxu1 %v12582_v42  ;;  %4291 = vmatprep.subr.bf16.mxu0 %v12587_v43  ;;  %v12666_v42 = vld [vmem:[%s18869_s1 + $0x568] ss:$40 sps:$4 sm:$0xff]   ;;  %v12671_v43 = vld [vmem:[%s18869_s1 + $0x5b4] ss:$40 sps:$4 sm:$0xff]  }
 0x111   :  { %4455 = vmatprep.subr.bf16.mxu1 %v12590_v44  ;;  %v12674_v44 = vld [vmem:[%s18869_s1 + $0x5bc] ss:$40 sps:$4 sm:$0xff]  }
 0x113   :  { %4292 = vmatpush1.bf16.msra.mxu0 %v12585_v45  ;;  %v12669_v45 = vld [vmem:[%s18869_s1 + $0x5b0] ss:$40 sps:$4 sm:$0xff]  }
 0x114   :  { %4456 = vmatpush1.bf16.msra.mxu1 %v12588_v46  ;;  %4293 = vmatprep.subr.bf16.mxu0 %v12593_v47  ;;  %v12672_v46 = vld [vmem:[%s18869_s1 + $0x5b8] ss:$40 sps:$4 sm:$0xff]   ;;  %v12677_v47 = vld [vmem:[%s18869_s1 + $0x604] ss:$40 sps:$4 sm:$0xff]  }
 0x115   :  { %4457 = vmatprep.subr.bf16.mxu1 %v12596_v49  ;;  %v12680_v49 = vld [vmem:[%s18869_s1 + $0x60c] ss:$40 sps:$4 sm:$0xff]  }
 0x117   :  { %4294 = vmatpush1.bf16.msra.mxu0 %v12591_v50  ;;  %v12675_v50 = vld [vmem:[%s18869_s1 + $0x600] ss:$40 sps:$4 sm:$0xff]  }
 0x118   :  { %4458 = vmatpush1.bf16.msra.mxu1 %v12594_v51  ;;  %4295 = vmatprep.subr.bf16.mxu0 %v12599_v52  ;;  %v12678_v51 = vld [vmem:[%s18869_s1 + $0x608] ss:$40 sps:$4 sm:$0xff]   ;;  %v12683_v52 = vld [vmem:[%s18869_s1 + $0x654] ss:$40 sps:$4 sm:$0xff]  }
 0x119   :  { %4459 = vmatprep.subr.bf16.mxu1 %v12602_v53  ;;  %v12686_v53 = vld [vmem:[%s18869_s1 + $0x65c] ss:$40 sps:$4 sm:$0xff]  }
 0x11b   :  { %4296 = vmatpush1.bf16.msra.mxu0 %v12597_v54  ;;  %v12681_v54 = vld [vmem:[%s18869_s1 + $0x650] ss:$40 sps:$4 sm:$0xff]  }
 0x11c   :  { %4460 = vmatpush1.bf16.msra.mxu1 %v12600_v55  ;;  %4297 = vmatprep.subr.bf16.mxu0 %v12605_v56  ;;  %v12684_v55 = vld [vmem:[%s18869_s1 + $0x658] ss:$40 sps:$4 sm:$0xff]   ;;  %v12689_v56 = vld [vmem:[%s18869_s1 + $0x6a4] ss:$40 sps:$4 sm:$0xff]  }
 0x11d   :  { %4461 = vmatprep.subr.bf16.mxu1 %v12608_v57  ;;  %v12692_v57 = vld [vmem:[%s18869_s1 + $0x6ac] ss:$40 sps:$4 sm:$0xff]  }
 0x11f   :  { %4298 = vmatpush1.bf16.msra.mxu0 %v12603_v58  ;;  %v12687_v58 = vld [vmem:[%s18869_s1 + $0x6a0] ss:$40 sps:$4 sm:$0xff]  }
 0x120   :  { %4462 = vmatpush1.bf16.msra.mxu1 %v12606_v59  ;;  %4299 = vmatprep.subr.bf16.mxu0 %v12611_v60  ;;  %v12690_v59 = vld [vmem:[%s18869_s1 + $0x6a8] ss:$40 sps:$4 sm:$0xff]   ;;  %v12695_v60 = vld [vmem:[%s18869_s1 + $0x6f4] ss:$40 sps:$4 sm:$0xff]  }
 0x121   :  { %4463 = vmatprep.subr.bf16.mxu1 %v12614_v61  ;;  %v12698_v61 = vld [vmem:[%s18869_s1 + $0x6fc] ss:$40 sps:$4 sm:$0xff]  }
 0x123   :  { %4300 = vmatpush1.bf16.msra.mxu0 %v12609_v62  ;;  %v12693_v62 = vld [vmem:[%s18869_s1 + $0x6f0] ss:$40 sps:$4 sm:$0xff]  }
 0x124   :  { %4464 = vmatpush1.bf16.msra.mxu1 %v12612_v63  ;;  %4301 = vmatprep.subr.bf16.mxu0 %v12617_v0  ;;  %v12696_v63 = vld [vmem:[%s18869_s1 + $0x6f8] ss:$40 sps:$4 sm:$0xff]   ;;  %v12701_v0 = vld [vmem:[%s18869_s1 + $0x744] ss:$40 sps:$4 sm:$0xff]  }
 0x125   :  { %4465 = vmatprep.subr.bf16.mxu1 %v12620_v1  ;;  %v12704_v1 = vld [vmem:[%s18869_s1 + $0x74c] ss:$40 sps:$4 sm:$0xff]  }
 0x127   :  { %4302 = vmatpush1.bf16.msra.mxu0 %v12615_v2  ;;  %v12699_v2 = vld [vmem:[%s18869_s1 + $0x740] ss:$40 sps:$4 sm:$0xff]  }
 0x128   :  { %4466 = vmatpush1.bf16.msra.mxu1 %v12618_v3  ;;  %4303 = vmatprep.subr.bf16.mxu0 %v12623_v4  ;;  %v12702_v3 = vld [vmem:[%s18869_s1 + $0x748] ss:$40 sps:$4 sm:$0xff]   ;;  %v12707_v4 = vld [vmem:[%s18869_s1 + $0x794] ss:$40 sps:$4 sm:$0xff]  }
 0x129   :  { %4467 = vmatprep.subr.bf16.mxu1 %v12626_v6  ;;  %v12710_v6 = vld [vmem:[%s18869_s1 + $0x79c] ss:$40 sps:$4 sm:$0xff]  }
 0x12b   :  { %4304 = vmatpush1.bf16.msra.mxu0 %v12621_v7  ;;  %v12705_v7 = vld [vmem:[%s18869_s1 + $0x790] ss:$40 sps:$4 sm:$0xff]  }
 0x12c   :  { %4468 = vmatpush1.bf16.msra.mxu1 %v12624_v8  ;;  %4305 = vmatprep.subr.bf16.mxu0 %v12629_v9  ;;  %v12708_v8 = vld [vmem:[%s18869_s1 + $0x798] ss:$40 sps:$4 sm:$0xff]   ;;  %v12713_v9 = vld [vmem:[%s18869_s1 + $0x7e4] ss:$40 sps:$4 sm:$0xff]  }
 0x12d   :  { %4469 = vmatprep.subr.bf16.mxu1 %v12632_v11  ;;  %v12716_v11 = vld [vmem:[%s18869_s1 + $0x7ec] ss:$40 sps:$4 sm:$0xff]  }
 0x12f   :  { %4306 = vmatpush1.bf16.msra.mxu0 %v12627_v12  ;;  %v12711_v12 = vld [vmem:[%s18869_s1 + $0x7e0] ss:$40 sps:$4 sm:$0xff]  }
 0x130   :  { %4470 = vmatpush1.bf16.msra.mxu1 %v12630_v14  ;;  %4307 = vmatprep.subr.bf16.mxu0 %v12635_v16  ;;  %v12714_v14 = vld [vmem:[%s18869_s1 + $0x7e8] ss:$40 sps:$4 sm:$0xff]   ;;  %v12719_v16 = vld [vmem:[%s18869_s1 + $0x834] ss:$40 sps:$4 sm:$0xff]  }
 0x131   :  { %4471 = vmatprep.subr.bf16.mxu1 %v12638_v17  ;;  %v12722_v17 = vld [vmem:[%s18869_s1 + $0x83c] ss:$40 sps:$4 sm:$0xff]  }
 0x133   :  { %4308 = vmatpush1.bf16.msra.mxu0 %v12633_v18  ;;  %v12717_v18 = vld [vmem:[%s18869_s1 + $0x830] ss:$40 sps:$4 sm:$0xff]  }
 0x134   :  { %4472 = vmatpush1.bf16.msra.mxu1 %v12636_v19  ;;  %4309 = vmatprep.subr.bf16.mxu0 %v12641_v22  ;;  %v12720_v19 = vld [vmem:[%s18869_s1 + $0x838] ss:$40 sps:$4 sm:$0xff]   ;;  %v12725_v22 = vld [vmem:[%s18869_s1 + $0x884] ss:$40 sps:$4 sm:$0xff]  }
 0x135   :  { %4473 = vmatprep.subr.bf16.mxu1 %v12644_v23  ;;  %v12728_v23 = vld [vmem:[%s18869_s1 + $0x88c] ss:$40 sps:$4 sm:$0xff]  }
 0x137   :  { %4310 = vmatpush1.bf16.msra.mxu0 %v12639_v24  ;;  %v12723_v24 = vld [vmem:[%s18869_s1 + $0x880] ss:$40 sps:$4 sm:$0xff]  }
 0x138   :  { %4474 = vmatpush1.bf16.msra.mxu1 %v12642_v25  ;;  %4311 = vmatprep.subr.bf16.mxu0 %v12647_v26  ;;  %v12726_v25 = vld [vmem:[%s18869_s1 + $0x888] ss:$40 sps:$4 sm:$0xff]   ;;  %v12731_v26 = vld [vmem:[%s18869_s1 + $0x8d4] ss:$40 sps:$4 sm:$0xff]  }
 0x139   :  { %4475 = vmatprep.subr.bf16.mxu1 %v12650_v27  ;;  %v12734_v27 = vld [vmem:[%s18869_s1 + $0x8dc] ss:$40 sps:$4 sm:$0xff]  }
 0x13b   :  { %4312 = vmatpush1.bf16.msra.mxu0 %v12645_v29  ;;  %v12729_v29 = vld [vmem:[%s18869_s1 + $0x8d0] ss:$40 sps:$4 sm:$0xff]  }
 0x13c   :  { %4476 = vmatpush1.bf16.msra.mxu1 %v12648_v31  ;;  %4313 = vmatprep.subr.bf16.mxu0 %v12653_v32  ;;  %v12732_v31 = vld [vmem:[%s18869_s1 + $0x8d8] ss:$40 sps:$4 sm:$0xff]   ;;  %v12737_v32 = vld [vmem:[%s18869_s1 + $0x924] ss:$40 sps:$4 sm:$0xff]  }
 0x13d   :  { %4477 = vmatprep.subr.bf16.mxu1 %v12656_v21  ;;  %v12740_v21 = vld [vmem:[%s18869_s1 + $0x92c] ss:$40 sps:$4 sm:$0xff]  }
 0x13f   :  { %4314 = vmatpush1.bf16.msra.mxu0 %v12651_v33  ;;  %v12735_v33 = vld [vmem:[%s18869_s1 + $0x920] ss:$40 sps:$4 sm:$0xff]  }
 0x140   :  { %4478 = vmatpush1.bf16.msra.mxu1 %v12654_v34  ;;  %4324 = vmatprep.subr.bf16.mxu0 %v12659_v35  ;;  %v12738_v34 = vld [vmem:[%s18869_s1 + $0x928] ss:$40 sps:$4 sm:$0xff]   ;;  %v12743_v35 = vld [vmem:[%s18869_s1 + $0x974] ss:$40 sps:$4 sm:$0xff]  }
 0x141   :  { %4488 = vmatprep.subr.bf16.mxu1 %v12662_v36  ;;  %v12746_v36 = vld [vmem:[%s18869_s1 + $0x97c] ss:$40 sps:$4 sm:$0xff]  }
 0x142   :  { %4316 = vmatmul.mubr.bf16.vlgmr.msra.gmra.mrb[4].mxu0 %v14598_v5 }
 0x143   :  { %4480 = vmatmul.mubr.bf16.vlgmr.msra.gmra.mrb[4].mxu1 %v14598_v5  ;;  %4325 = vmatpush1.bf16.msra.mxu0 %v12657_v37  ;;  %v12741_v37 = vld [vmem:[%s18869_s1 + $0x970] ss:$40 sps:$4 sm:$0xff]  }
 0x144   :  { %4489 = vmatpush1.bf16.msra.mxu1 %v12660_v38  ;;  %4326 = vmatprep.subr.bf16.mxu0 %v12665_v39  ;;  %v12744_v38 = vld [vmem:[%s18869_s1 + $0x978] ss:$40 sps:$4 sm:$0xff]   ;;  %v12749_v39 = vld [vmem:[%s18869_s1 + $0x9c4] ss:$40 sps:$4 sm:$0xff]  }
 0x145   :  { %4490 = vmatprep.subr.bf16.mxu1 %v12668_v40  ;;  %4356 = vmatprep.mubr.bf16.mxu0 %v14678_v30  ;;  %v12752_v40 = vld [vmem:[%s18869_s1 + $0x9cc] ss:$40 sps:$4 sm:$0xff]  }
 0x146   :  { %4520 = vmatprep.mubr.bf16.mxu1 %v14678_v30 }
 0x147   :  { %4327 = vmatpush1.bf16.msra.mxu0 %v12663_v41  ;;  %v12747_v41 = vld [vmem:[%s18869_s1 + $0x9c0] ss:$40 sps:$4 sm:$0xff]  }
 0x148   :  { %4491 = vmatpush1.bf16.msra.mxu1 %v12666_v42  ;;  %4328 = vmatprep.subr.bf16.mxu0 %v12671_v43  ;;  %v12750_v42 = vld [vmem:[%s18869_s1 + $0x9c8] ss:$40 sps:$4 sm:$0xff]   ;;  %v12755_v43 = vld [vmem:[%s18869_s1 + $0xa14] ss:$40 sps:$4 sm:$0xff]  }
 0x149   :  { %4492 = vmatprep.subr.bf16.mxu1 %v12674_v44  ;;  %v12758_v44 = vld [vmem:[%s18869_s1 + $0xa1c] ss:$40 sps:$4 sm:$0xff]  }
 0x14b   :  { %4329 = vmatpush1.bf16.msra.mxu0 %v12669_v45  ;;  %v12753_v45 = vld [vmem:[%s18869_s1 + $0xa10] ss:$40 sps:$4 sm:$0xff]  }
 0x14c   :  { %4493 = vmatpush1.bf16.msra.mxu1 %v12672_v46  ;;  %4330 = vmatprep.subr.bf16.mxu0 %v12677_v47  ;;  %v12756_v46 = vld [vmem:[%s18869_s1 + $0xa18] ss:$40 sps:$4 sm:$0xff]   ;;  %v12761_v47 = vld [vmem:[%s18869_s1 + $0xa64] ss:$40 sps:$4 sm:$0xff]  }
 0x14d   :  { %4494 = vmatprep.subr.bf16.mxu1 %v12680_v49  ;;  %v12764_v49 = vld [vmem:[%s18869_s1 + $0xa6c] ss:$40 sps:$4 sm:$0xff]  }
 0x14f   :  { %4331 = vmatpush1.bf16.msra.mxu0 %v12675_v50  ;;  %v12759_v50 = vld [vmem:[%s18869_s1 + $0xa60] ss:$40 sps:$4 sm:$0xff]  }
 0x150   :  { %4495 = vmatpush1.bf16.msra.mxu1 %v12678_v51  ;;  %4332 = vmatprep.subr.bf16.mxu0 %v12683_v52  ;;  %v12762_v51 = vld [vmem:[%s18869_s1 + $0xa68] ss:$40 sps:$4 sm:$0xff]   ;;  %v12767_v52 = vld [vmem:[%s18869_s1 + $0xab4] ss:$40 sps:$4 sm:$0xff]  }
 0x151   :  { %4496 = vmatprep.subr.bf16.mxu1 %v12686_v53  ;;  %v12770_v53 = vld [vmem:[%s18869_s1 + $0xabc] ss:$40 sps:$4 sm:$0xff]  }
 0x153   :  { %4333 = vmatpush1.bf16.msra.mxu0 %v12681_v54  ;;  %v12765_v54 = vld [vmem:[%s18869_s1 + $0xab0] ss:$40 sps:$4 sm:$0xff]  }
 0x154   :  { %4497 = vmatpush1.bf16.msra.mxu1 %v12684_v55  ;;  %4334 = vmatprep.subr.bf16.mxu0 %v12689_v56  ;;  %v12768_v55 = vld [vmem:[%s18869_s1 + $0xab8] ss:$40 sps:$4 sm:$0xff]   ;;  %v12773_v56 = vld [vmem:[%s18869_s1 + $0xb04] ss:$40 sps:$4 sm:$0xff]  }
 0x155   :  { %4498 = vmatprep.subr.bf16.mxu1 %v12692_v57  ;;  %v12776_v57 = vld [vmem:[%s18869_s1 + $0xb0c] ss:$40 sps:$4 sm:$0xff]  }
 0x157   :  { %4335 = vmatpush1.bf16.msra.mxu0 %v12687_v58  ;;  %v12771_v58 = vld [vmem:[%s18869_s1 + $0xb00] ss:$40 sps:$4 sm:$0xff]  }
 0x158   :  { %4499 = vmatpush1.bf16.msra.mxu1 %v12690_v59  ;;  %4336 = vmatprep.subr.bf16.mxu0 %v12695_v60  ;;  %v12774_v59 = vld [vmem:[%s18869_s1 + $0xb08] ss:$40 sps:$4 sm:$0xff]   ;;  %v12779_v60 = vld [vmem:[%s18869_s1 + $0xb54] ss:$40 sps:$4 sm:$0xff]  }
 0x159   :  { %4500 = vmatprep.subr.bf16.mxu1 %v12698_v61  ;;  %v12782_v61 = vld [vmem:[%s18869_s1 + $0xb5c] ss:$40 sps:$4 sm:$0xff]  }
 0x15b   :  { %4337 = vmatpush1.bf16.msra.mxu0 %v12693_v62  ;;  %v12777_v62 = vld [vmem:[%s18869_s1 + $0xb50] ss:$40 sps:$4 sm:$0xff]  }
 0x15c   :  { %4501 = vmatpush1.bf16.msra.mxu1 %v12696_v63  ;;  %4338 = vmatprep.subr.bf16.mxu0 %v12701_v0  ;;  %v12780_v63 = vld [vmem:[%s18869_s1 + $0xb58] ss:$40 sps:$4 sm:$0xff]   ;;  %v12785_v0 = vld [vmem:[%s18869_s1 + $0xba4] ss:$40 sps:$4 sm:$0xff]  }
 0x15d   :  { %4502 = vmatprep.subr.bf16.mxu1 %v12704_v1  ;;  %v12788_v1 = vld [vmem:[%s18869_s1 + $0xbac] ss:$40 sps:$4 sm:$0xff]  }
 0x15f   :  { %4339 = vmatpush1.bf16.msra.mxu0 %v12699_v2  ;;  %v12783_v2 = vld [vmem:[%s18869_s1 + $0xba0] ss:$40 sps:$4 sm:$0xff]  }
 0x160   :  { %4503 = vmatpush1.bf16.msra.mxu1 %v12702_v3  ;;  %4340 = vmatprep.subr.bf16.mxu0 %v12707_v4  ;;  %v12786_v3 = vld [vmem:[%s18869_s1 + $0xba8] ss:$40 sps:$4 sm:$0xff]   ;;  %v12791_v4 = vld [vmem:[%s18869_s1 + $0xbf4] ss:$40 sps:$4 sm:$0xff]  }
 0x161   :  { %4504 = vmatprep.subr.bf16.mxu1 %v12710_v6  ;;  %v12794_v6 = vld [vmem:[%s18869_s1 + $0xbfc] ss:$40 sps:$4 sm:$0xff]  }
 0x163   :  { %4341 = vmatpush1.bf16.msra.mxu0 %v12705_v7  ;;  %v12789_v7 = vld [vmem:[%s18869_s1 + $0xbf0] ss:$40 sps:$4 sm:$0xff]  }
 0x164   :  { %4505 = vmatpush1.bf16.msra.mxu1 %v12708_v8  ;;  %4342 = vmatprep.subr.bf16.mxu0 %v12713_v9  ;;  %v12792_v8 = vld [vmem:[%s18869_s1 + $0xbf8] ss:$40 sps:$4 sm:$0xff]   ;;  %v12797_v9 = vld [vmem:[%s18869_s1 + $0xc44] ss:$40 sps:$4 sm:$0xff]  }
 0x165   :  { %4506 = vmatprep.subr.bf16.mxu1 %v12716_v11  ;;  %v12800_v11 = vld [vmem:[%s18869_s1 + $0xc4c] ss:$40 sps:$4 sm:$0xff]  }
 0x167   :  { %4343 = vmatpush1.bf16.msra.mxu0 %v12711_v12  ;;  %v12795_v12 = vld [vmem:[%s18869_s1 + $0xc40] ss:$40 sps:$4 sm:$0xff]  }
 0x168   :  { %4507 = vmatpush1.bf16.msra.mxu1 %v12714_v14  ;;  %4344 = vmatprep.subr.bf16.mxu0 %v12719_v16  ;;  %v12798_v14 = vld [vmem:[%s18869_s1 + $0xc48] ss:$40 sps:$4 sm:$0xff]   ;;  %v12803_v16 = vld [vmem:[%s18869_s1 + $0xc94] ss:$40 sps:$4 sm:$0xff]  }
 0x169   :  { %4508 = vmatprep.subr.bf16.mxu1 %v12722_v17  ;;  %v12806_v17 = vld [vmem:[%s18869_s1 + $0xc9c] ss:$40 sps:$4 sm:$0xff]  }
 0x16b   :  { %4345 = vmatpush1.bf16.msra.mxu0 %v12717_v18  ;;  %v12801_v18 = vld [vmem:[%s18869_s1 + $0xc90] ss:$40 sps:$4 sm:$0xff]  }
 0x16c   :  { %4509 = vmatpush1.bf16.msra.mxu1 %v12720_v19  ;;  %4346 = vmatprep.subr.bf16.mxu0 %v12725_v22  ;;  %v12804_v19 = vld [vmem:[%s18869_s1 + $0xc98] ss:$40 sps:$4 sm:$0xff]   ;;  %v12809_v22 = vld [vmem:[%s18869_s1 + $0xce4] ss:$40 sps:$4 sm:$0xff]  }
 0x16d   :  { %4510 = vmatprep.subr.bf16.mxu1 %v12728_v23  ;;  %v12812_v23 = vld [vmem:[%s18869_s1 + $0xcec] ss:$40 sps:$4 sm:$0xff]  }
 0x16f   :  { %4347 = vmatpush1.bf16.msra.mxu0 %v12723_v24  ;;  %v12807_v24 = vld [vmem:[%s18869_s1 + $0xce0] ss:$40 sps:$4 sm:$0xff]  }
 0x170   :  { %4511 = vmatpush1.bf16.msra.mxu1 %v12726_v25  ;;  %4348 = vmatprep.subr.bf16.mxu0 %v12731_v26  ;;  %v12810_v25 = vld [vmem:[%s18869_s1 + $0xce8] ss:$40 sps:$4 sm:$0xff]   ;;  %v12815_v26 = vld [vmem:[%s18869_s1 + $0xd34] ss:$40 sps:$4 sm:$0xff]  }
 0x171   :  { %4512 = vmatprep.subr.bf16.mxu1 %v12734_v27  ;;  %v12818_v27 = vld [vmem:[%s18869_s1 + $0xd3c] ss:$40 sps:$4 sm:$0xff]  }
 0x173   :  { %4349 = vmatpush1.bf16.msra.mxu0 %v12729_v29  ;;  %v12813_v29 = vld [vmem:[%s18869_s1 + $0xd30] ss:$40 sps:$4 sm:$0xff]  }
 0x174   :  { %4513 = vmatpush1.bf16.msra.mxu1 %v12732_v31  ;;  %4350 = vmatprep.subr.bf16.mxu0 %v12737_v32  ;;  %v12816_v31 = vld [vmem:[%s18869_s1 + $0xd38] ss:$40 sps:$4 sm:$0xff]   ;;  %v12821_v32 = vld [vmem:[%s18869_s1 + $0xd84] ss:$40 sps:$4 sm:$0xff]  }
 0x175   :  { %4514 = vmatprep.subr.bf16.mxu1 %v12740_v21  ;;  %v12824_v21 = vld [vmem:[%s18869_s1 + $0xd8c] ss:$40 sps:$4 sm:$0xff]  }
 0x177   :  { %4351 = vmatpush1.bf16.msra.mxu0 %v12735_v33  ;;  %v12819_v33 = vld [vmem:[%s18869_s1 + $0xd80] ss:$40 sps:$4 sm:$0xff]  }
 0x178   :  { %4515 = vmatpush1.bf16.msra.mxu1 %v12738_v34  ;;  %4352 = vmatprep.subr.bf16.mxu0 %v12743_v35  ;;  %v12822_v34 = vld [vmem:[%s18869_s1 + $0xd88] ss:$40 sps:$4 sm:$0xff]   ;;  %v12827_v35 = vld [vmem:[%s18869_s1 + $0xdd4] ss:$40 sps:$4 sm:$0xff]  }
 0x179   :  { %4516 = vmatprep.subr.bf16.mxu1 %v12746_v36  ;;  %v12830_v36 = vld [vmem:[%s18869_s1 + $0xddc] ss:$40 sps:$4 sm:$0xff]  }
 0x17b   :  { %4353 = vmatpush1.bf16.msra.mxu0 %v12741_v37  ;;  %v12825_v37 = vld [vmem:[%s18869_s1 + $0xdd0] ss:$40 sps:$4 sm:$0xff]  }
 0x17c   :  { %4517 = vmatpush1.bf16.msra.mxu1 %v12744_v38  ;;  %4354 = vmatprep.subr.bf16.mxu0 %v12749_v39  ;;  %v12828_v38 = vld [vmem:[%s18869_s1 + $0xdd8] ss:$40 sps:$4 sm:$0xff]   ;;  %v12833_v39 = vld [vmem:[%s18869_s1 + $0xe24] ss:$40 sps:$4 sm:$0xff]  }
 0x17d   :  { %4518 = vmatprep.subr.bf16.mxu1 %v12752_v40  ;;  %v12836_v40 = vld [vmem:[%s18869_s1 + $0xe2c] ss:$40 sps:$4 sm:$0xff]  }
 0x17f   :  { %4355 = vmatpush1.bf16.msra.mxu0 %v12747_v41  ;;  %v12831_v41 = vld [vmem:[%s18869_s1 + $0xe20] ss:$40 sps:$4 sm:$0xff]  }
 0x180   :  { %4519 = vmatpush1.bf16.msra.mxu1 %v12750_v42  ;;  %4365 = vmatprep.subr.bf16.mxu0 %v12755_v43  ;;  %v12834_v42 = vld [vmem:[%s18869_s1 + $0xe28] ss:$40 sps:$4 sm:$0xff]   ;;  %v12839_v43 = vld [vmem:[%s18869_s1 + $0xe74] ss:$40 sps:$4 sm:$0xff]  }
 0x181   :  { %4529 = vmatprep.subr.bf16.mxu1 %v12758_v44  ;;  %v12842_v44 = vld [vmem:[%s18869_s1 + $0xe7c] ss:$40 sps:$4 sm:$0xff]  }
 0x182   :  { %4357 = vmatmul.mubr.bf16.vlgmr.msra.gmra.mrb[4].mxu0 %v14807_v10 }
 0x183   :  { %4521 = vmatmul.mubr.bf16.vlgmr.msra.gmra.mrb[4].mxu1 %v14807_v10  ;;  %4366 = vmatpush1.bf16.msra.mxu0 %v12753_v45  ;;  %v12837_v45 = vld [vmem:[%s18869_s1 + $0xe70] ss:$40 sps:$4 sm:$0xff]  }
 0x184   :  { %4530 = vmatpush1.bf16.msra.mxu1 %v12756_v46  ;;  %4367 = vmatprep.subr.bf16.mxu0 %v12761_v47  ;;  %v12840_v46 = vld [vmem:[%s18869_s1 + $0xe78] ss:$40 sps:$4 sm:$0xff]   ;;  %v12845_v47 = vld [vmem:[%s18869_s1 + $0xec4] ss:$40 sps:$4 sm:$0xff]  }
 0x185   :  { %4531 = vmatprep.subr.bf16.mxu1 %v12764_v49  ;;  %4397 = vmatprep.mubr.bf16.mxu0 %v14825_v15  ;;  %v12848_v49 = vld [vmem:[%s18869_s1 + $0xecc] ss:$40 sps:$4 sm:$0xff]  }
 0x186   :  { %4561 = vmatprep.mubr.bf16.mxu1 %v14825_v15 }
 0x187   :  { %4368 = vmatpush1.bf16.msra.mxu0 %v12759_v50  ;;  %v12843_v50 = vld [vmem:[%s18869_s1 + $0xec0] ss:$40 sps:$4 sm:$0xff]  }
 0x188   :  { %4532 = vmatpush1.bf16.msra.mxu1 %v12762_v51  ;;  %4369 = vmatprep.subr.bf16.mxu0 %v12767_v52  ;;  %v12846_v51 = vld [vmem:[%s18869_s1 + $0xec8] ss:$40 sps:$4 sm:$0xff]   ;;  %v12851_v52 = vld [vmem:[%s18869_s1 + $0xf14] ss:$40 sps:$4 sm:$0xff]  }
 0x189   :  { %4533 = vmatprep.subr.bf16.mxu1 %v12770_v53  ;;  %v12854_v53 = vld [vmem:[%s18869_s1 + $0xf1c] ss:$40 sps:$4 sm:$0xff]  }
 0x18b   :  { %4370 = vmatpush1.bf16.msra.mxu0 %v12765_v54  ;;  %v12849_v54 = vld [vmem:[%s18869_s1 + $0xf10] ss:$40 sps:$4 sm:$0xff]  }
 0x18c   :  { %4534 = vmatpush1.bf16.msra.mxu1 %v12768_v55  ;;  %4371 = vmatprep.subr.bf16.mxu0 %v12773_v56  ;;  %v12852_v55 = vld [vmem:[%s18869_s1 + $0xf18] ss:$40 sps:$4 sm:$0xff]   ;;  %v12857_v56 = vld [vmem:[%s18869_s1 + $0xf64] ss:$40 sps:$4 sm:$0xff]  }
 0x18d   :  { %4535 = vmatprep.subr.bf16.mxu1 %v12776_v57  ;;  %v12860_v57 = vld [vmem:[%s18869_s1 + $0xf6c] ss:$40 sps:$4 sm:$0xff]  }
 0x18f   :  { %4372 = vmatpush1.bf16.msra.mxu0 %v12771_v58  ;;  %v12855_v58 = vld [vmem:[%s18869_s1 + $0xf60] ss:$40 sps:$4 sm:$0xff]  }
 0x190   :  { %4536 = vmatpush1.bf16.msra.mxu1 %v12774_v59  ;;  %4373 = vmatprep.subr.bf16.mxu0 %v12779_v60  ;;  %v12858_v59 = vld [vmem:[%s18869_s1 + $0xf68] ss:$40 sps:$4 sm:$0xff]   ;;  %v12863_v60 = vld [vmem:[%s18869_s1 + $0xfb4] ss:$40 sps:$4 sm:$0xff]  }
 0x191   :  { %4537 = vmatprep.subr.bf16.mxu1 %v12782_v61  ;;  %v12866_v61 = vld [vmem:[%s18869_s1 + $0xfbc] ss:$40 sps:$4 sm:$0xff]  }
 0x193   :  { %4374 = vmatpush1.bf16.msra.mxu0 %v12777_v62  ;;  %v12861_v62 = vld [vmem:[%s18869_s1 + $0xfb0] ss:$40 sps:$4 sm:$0xff]  }
 0x194   :  { %4538 = vmatpush1.bf16.msra.mxu1 %v12780_v63  ;;  %4375 = vmatprep.subr.bf16.mxu0 %v12785_v0  ;;  %v12864_v63 = vld [vmem:[%s18869_s1 + $0xfb8] ss:$40 sps:$4 sm:$0xff]   ;;  %v12869_v0 = vld [vmem:[%s18869_s1 + $0x1004] ss:$40 sps:$4 sm:$0xff]  }
 0x195   :  { %4539 = vmatprep.subr.bf16.mxu1 %v12788_v1  ;;  %v12872_v1 = vld [vmem:[%s18869_s1 + $0x100c] ss:$40 sps:$4 sm:$0xff]  }
 0x197   :  { %4376 = vmatpush1.bf16.msra.mxu0 %v12783_v2  ;;  %v12867_v2 = vld [vmem:[%s18869_s1 + $0x1000] ss:$40 sps:$4 sm:$0xff]  }
 0x198   :  { %4540 = vmatpush1.bf16.msra.mxu1 %v12786_v3  ;;  %4377 = vmatprep.subr.bf16.mxu0 %v12791_v4  ;;  %v12870_v3 = vld [vmem:[%s18869_s1 + $0x1008] ss:$40 sps:$4 sm:$0xff]   ;;  %v12875_v4 = vld [vmem:[%s18869_s1 + $0x1054] ss:$40 sps:$4 sm:$0xff]  }
 0x199   :  { %4541 = vmatprep.subr.bf16.mxu1 %v12794_v6  ;;  %v12878_v6 = vld [vmem:[%s18869_s1 + $0x105c] ss:$40 sps:$4 sm:$0xff]  }
 0x19b   :  { %4378 = vmatpush1.bf16.msra.mxu0 %v12789_v7  ;;  %v677_v7 = vlaneseq }
 0x19c   :  { %4542 = vmatpush1.bf16.msra.mxu1 %v12792_v8  ;;  %4379 = vmatprep.subr.bf16.mxu0 %v12797_v9  ;;  %v12873_v8 = vld [vmem:[%s18869_s1 + $0x1050] ss:$40 sps:$4 sm:$0xff]  }
 0x19d   :  { %4543 = vmatprep.subr.bf16.mxu1 %v12800_v11  ;;  %v12876_v9 = vld [vmem:[%s18869_s1 + $0x1058] ss:$40 sps:$4 sm:$0xff]   ;;  %v15870_v11 = vshrl.u32 %v677_v7, 7  ;;  %v12938_v7 = vld [vmem:[%s18869_s1 + $0x137c] ss:$40 sps:$4 sm:$0xff]  }
 0x19f   :  { %4380 = vmatpush1.bf16.msra.mxu0 %v12795_v12  ;;  %v12881_v12 = vld [vmem:[%s18869_s1 + $0x10a4] ss:$40 sps:$4 sm:$0xff]  }
 0x1a0   :  { %4544 = vmatpush1.bf16.msra.mxu1 %v12798_v14  ;;  %4381 = vmatprep.subr.bf16.mxu0 %v12803_v16  ;;  %v12884_v14 = vld [vmem:[%s18869_s1 + $0x10ac] ss:$40 sps:$4 sm:$0xff]   ;;  %v15881_v16 = vld [vmem:[%s18872_s2] sm:$0xff] }
 0x1a1   :  { %4545 = vmatprep.subr.bf16.mxu1 %v12806_v17  ;;  %v12879_v17 = vld [vmem:[%s18869_s1 + $0x10a0] ss:$40 sps:$4 sm:$0xff]  }
 0x1a3   :  { %4382 = vmatpush1.bf16.msra.mxu0 %v12801_v18  ;;  %v12882_v18 = vld [vmem:[%s18869_s1 + $0x10a8] ss:$40 sps:$4 sm:$0xff]  }
 0x1a4   :  { %4546 = vmatpush1.bf16.msra.mxu1 %v12804_v19  ;;  %4383 = vmatprep.subr.bf16.mxu0 %v12809_v22  ;;  %v15890_v19 = vsub.s32 1, %v15870_v11  ;;  %v12887_v22 = vld [vmem:[%s18869_s1 + $0x10f4] ss:$40 sps:$4 sm:$0xff]  }
 0x1a5   :  { %4547 = vmatprep.subr.bf16.mxu1 %v12812_v23  ;;  %v12890_v23 = vld [vmem:[%s18869_s1 + $0x10fc] ss:$40 sps:$4 sm:$0xff]  }
 0x1a7   :  { %4384 = vmatpush1.bf16.msra.mxu0 %v12807_v24 }
 0x1a8   :  { %4548 = vmatpush1.bf16.msra.mxu1 %v12810_v25  ;;  %4385 = vmatprep.subr.bf16.mxu0 %v12815_v26 }
 0x1a9   :  { %4549 = vmatprep.subr.bf16.mxu1 %v12818_v27 }
 0x1ab   :  { %4386 = vmatpush1.bf16.msra.mxu0 %v12813_v29 }
 0x1ac   :  { %4550 = vmatpush1.bf16.msra.mxu1 %v12816_v31  ;;  %4387 = vmatprep.subr.bf16.mxu0 %v12821_v32  ;;  %v12885_v31 = vld [vmem:[%s18869_s1 + $0x10f0] ss:$40 sps:$4 sm:$0xff]  }
 0x1ad   :  { %4551 = vmatprep.subr.bf16.mxu1 %v12824_v21  ;;  %v12888_v32 = vld [vmem:[%s18869_s1 + $0x10f8] ss:$40 sps:$4 sm:$0xff]  }
 0x1af   :  { %4388 = vmatpush1.bf16.msra.mxu0 %v12819_v33  ;;  %v684_v33 = vrot.slane %v15881_v16, %v15890_v19 }
 0x1b0   :  { %4552 = vmatpush1.bf16.msra.mxu1 %v12822_v34  ;;  %4389 = vmatprep.subr.bf16.mxu0 %v12827_v35 }
 0x1b1   :  { %4553 = vmatprep.subr.bf16.mxu1 %v12830_v36  ;;  %v12893_v36 = vld [vmem:[%s18869_s1 + $0x1144] ss:$40 sps:$4 sm:$0xff]  }
 0x1b3   :  { %4390 = vmatpush1.bf16.msra.mxu0 %v12825_v37  ;;  %v12896_v37 = vld [vmem:[%s18869_s1 + $0x114c] ss:$40 sps:$4 sm:$0xff]  }
 0x1b4   :  { %4554 = vmatpush1.bf16.msra.mxu1 %v12828_v38  ;;  %4391 = vmatprep.subr.bf16.mxu0 %v12833_v39  ;;  %v12891_v38 = vld [vmem:[%s18869_s1 + $0x1140] ss:$40 sps:$4 sm:$0xff]  }
 0x1b5   :  { %4555 = vmatprep.subr.bf16.mxu1 %v12836_v40  ;;  %v12894_v39 = vld [vmem:[%s18869_s1 + $0x1148] ss:$40 sps:$4 sm:$0xff]  }
 0x1b7   :  { %4392 = vmatpush1.bf16.msra.mxu0 %v12831_v41  ;;  %v12899_v41 = vld [vmem:[%s18869_s1 + $0x1194] ss:$40 sps:$4 sm:$0xff]  }
 0x1b8   :  { %4556 = vmatpush1.bf16.msra.mxu1 %v12834_v42  ;;  %4393 = vmatprep.subr.bf16.mxu0 %v12839_v43  ;;  %v12902_v42 = vld [vmem:[%s18869_s1 + $0x119c] ss:$40 sps:$4 sm:$0xff]   ;;  %v12897_v43 = vld [vmem:[%s18869_s1 + $0x1190] ss:$40 sps:$4 sm:$0xff]  }
 0x1b9   :  { %4557 = vmatprep.subr.bf16.mxu1 %v12842_v44  ;;  %v12900_v44 = vld [vmem:[%s18869_s1 + $0x1198] ss:$40 sps:$4 sm:$0xff]  }
 0x1bb   :  { %4394 = vmatpush1.bf16.msra.mxu0 %v12837_v45  ;;  %v12905_v45 = vld [vmem:[%s18869_s1 + $0x11e4] ss:$40 sps:$4 sm:$0xff]  }
 0x1bc   :  { %4558 = vmatpush1.bf16.msra.mxu1 %v12840_v46  ;;  %4395 = vmatprep.subr.bf16.mxu0 %v12845_v47  ;;  %v12908_v47 = vld [vmem:[%s18869_s1 + $0x11ec] ss:$40 sps:$4 sm:$0xff]  }
 0x1bd   :  { %4559 = vmatprep.subr.bf16.mxu1 %v12848_v49  ;;  %v12903_v49 = vld [vmem:[%s18869_s1 + $0x11e0] ss:$40 sps:$4 sm:$0xff]  }
 0x1bf   :  { %4396 = vmatpush1.bf16.msra.mxu0 %v12843_v50  ;;  %v12906_v50 = vld [vmem:[%s18869_s1 + $0x11e8] ss:$40 sps:$4 sm:$0xff]  }
 0x1c0   :  { %4560 = vmatpush1.bf16.msra.mxu1 %v12846_v51  ;;  %4406 = vmatprep.subr.bf16.mxu0 %v12851_v52  ;;  %v12911_v51 = vld [vmem:[%s18869_s1 + $0x1234] ss:$40 sps:$4 sm:$0xff]  }
 0x1c1   :  { %4570 = vmatprep.subr.bf16.mxu1 %v12854_v53  ;;  %v12914_v52 = vld [vmem:[%s18869_s1 + $0x123c] ss:$40 sps:$4 sm:$0xff]   ;;  %v12909_v53 = vld [vmem:[%s18869_s1 + $0x1230] ss:$40 sps:$4 sm:$0xff]  }
 0x1c2   :  { %4398 = vmatmul.mubr.bf16.vlgmr.msra.gmra.mrb[4].mxu0 %v15019_v20 }
 0x1c3   :  { %4562 = vmatmul.mubr.bf16.vlgmr.msra.gmra.mrb[4].mxu1 %v15019_v20  ;;  %4407 = vmatpush1.bf16.msra.mxu0 %v12849_v54  ;;  %v12912_v54 = vld [vmem:[%s18869_s1 + $0x1238] ss:$40 sps:$4 sm:$0xff]  }
 0x1c4   :  { %4571 = vmatpush1.bf16.msra.mxu1 %v12852_v55  ;;  %4408 = vmatprep.subr.bf16.mxu0 %v12857_v56  ;;  %v12917_v55 = vld [vmem:[%s18869_s1 + $0x1284] ss:$40 sps:$4 sm:$0xff]  }
 0x1c5   :  { %4572 = vmatprep.subr.bf16.mxu1 %v12860_v57  ;;  %4438 = vmatprep.mubr.bf16.mxu0 %v15034_v13  ;;  %v12920_v56 = vld [vmem:[%s18869_s1 + $0x128c] ss:$40 sps:$4 sm:$0xff]   ;;  %v12915_v57 = vld [vmem:[%s18869_s1 + $0x1280] ss:$40 sps:$4 sm:$0xff]  }
 0x1c6   :  { %4602 = vmatprep.mubr.bf16.mxu1 %v15034_v13 }
 0x1c7   :  { %4409 = vmatpush1.bf16.msra.mxu0 %v12855_v58  ;;  %v12918_v58 = vld [vmem:[%s18869_s1 + $0x1288] ss:$40 sps:$4 sm:$0xff]  }
 0x1c8   :  { %4573 = vmatpush1.bf16.msra.mxu1 %v12858_v59  ;;  %4410 = vmatprep.subr.bf16.mxu0 %v12863_v60  ;;  %v12923_v59 = vld [vmem:[%s18869_s1 + $0x12d4] ss:$40 sps:$4 sm:$0xff]  }
 0x1c9   :  { %4574 = vmatprep.subr.bf16.mxu1 %v12866_v61  ;;  %v12926_v60 = vld [vmem:[%s18869_s1 + $0x12dc] ss:$40 sps:$4 sm:$0xff]  }
 0x1cb   :  { %4411 = vmatpush1.bf16.msra.mxu0 %v12861_v62  ;;  %v12921_v62 = vld [vmem:[%s18869_s1 + $0x12d0] ss:$40 sps:$4 sm:$0xff]  }
 0x1cc   :  { %4575 = vmatpush1.bf16.msra.mxu1 %v12864_v63  ;;  %4412 = vmatprep.subr.bf16.mxu0 %v12869_v0  ;;  %v12924_v63 = vld [vmem:[%s18869_s1 + $0x12d8] ss:$40 sps:$4 sm:$0xff]   ;;  %v12929_v0 = vld [vmem:[%s18869_s1 + $0x1324] ss:$40 sps:$4 sm:$0xff]  }
 0x1cd   :  { %4576 = vmatprep.subr.bf16.mxu1 %v12872_v1  ;;  %v12932_v1 = vld [vmem:[%s18869_s1 + $0x132c] ss:$40 sps:$4 sm:$0xff]  }
 0x1cf   :  { %4413 = vmatpush1.bf16.msra.mxu0 %v12867_v2 }
 0x1d0   :  { %4577 = vmatpush1.bf16.msra.mxu1 %v12870_v3  ;;  %4414 = vmatprep.subr.bf16.mxu0 %v12875_v4  ;;  %v12927_v3 = vld [vmem:[%s18869_s1 + $0x1320] ss:$40 sps:$4 sm:$0xff]  }
 0x1d1   :  { %4578 = vmatprep.subr.bf16.mxu1 %v12878_v6  ;;  %v12930_v4 = vld [vmem:[%s18869_s1 + $0x1328] ss:$40 sps:$4 sm:$0xff]   ;;  %v12935_v6 = vld [vmem:[%s18869_s1 + $0x1374] ss:$40 sps:$4 sm:$0xff]  }
 0x1d3   :  { %4415 = vmatpush1.bf16.msra.mxu0 %v12873_v8  ;;  %v12933_v8 = vld [vmem:[%s18869_s1 + $0x1370] ss:$40 sps:$4 sm:$0xff]  }
 0x1d4   :  { %4579 = vmatpush1.bf16.msra.mxu1 %v12876_v9  ;;  %4416 = vmatprep.subr.bf16.mxu0 %v12881_v12  ;;  %v12936_v9 = vld [vmem:[%s18869_s1 + $0x1378] ss:$40 sps:$4 sm:$0xff]   ;;  %v12941_v12 = vld [vmem:[%s18869_s1 + $0x13c4] ss:$40 sps:$4 sm:$0xff]  }
 0x1d5   :  { %4580 = vmatprep.subr.bf16.mxu1 %v12884_v14  ;;  %v15898_v24 = vpop.f32.mrb[0].mxu0  ;;  %v12944_v14 = vld [vmem:[%s18869_s1 + $0x13cc] ss:$40 sps:$4 sm:$0xff]  }
 0x1d6   :  { %v15900_v25 = vpop.f32.mrb[0].mxu1  ;;  %v4114_v26 = vpop.f32.mrb[1].mxu0 }
 0x1d7   :  { %v15902_v27 = vpop.f32.mrb[1].mxu1  ;;  %v4116_v29 = vpop.f32.mrb[2].mxu0  ;;  %4417 = vmatpush1.bf16.msra.mxu0 %v12879_v17  ;;  %v12010_v40 = vadd.f32 %v4114_v26, %v684_v33  ;;  %v12939_v17 = vld [vmem:[%s18869_s1 + $0x13c0] ss:$40 sps:$4 sm:$0xff]   ;;  %v12951_v33 = vld [vmem:[%s18869_s1 + $0x70] ss:$40 sps:$4 sm:$0xff]  }
 0x1d8   :  { %4581 = vmatpush1.bf16.msra.mxu1 %v12882_v18  ;;  %v4280_v21 = vpop.f32.mrb[2].mxu1  ;;  %v4117_v34 = vpop.f32.mrb[3].mxu0  ;;  %4418 = vmatprep.subr.bf16.mxu0 %v12887_v22  ;;  %v12942_v18 = vld [vmem:[%s18869_s1 + $0x13c8] ss:$40 sps:$4 sm:$0xff]   ;;  %v12947_v22 = vld [vmem:[%s18869_s1 + $0x24] ss:$40 sps:$4 sm:$0xff]  }
 0x1d9   :  { %4582 = vmatprep.subr.bf16.mxu1 %v12890_v23  ;;  %v4281_v35 = vpop.f32.mrb[3].mxu1  ;;  %v11233_v46 = vmul.f32 -1.442695, %v12010_v40  ;;  %v12950_v23 = vld [vmem:[%s18871_s3 + $0x4] ss:$40 sps:$4 sm:$0xff]  }
 0x1da   :  { %v12945_v26 = vld [vmem:[%s18869_s1 + $0x20] ss:$40 sps:$4 sm:$0xff]   ;;  %v12956_v21 = vld [vmem:[%s18871_s3 + $0x54] ss:$40 sps:$4 sm:$0xff]   ;;  %v12954_v34 = vld [vmem:[%s18871_s3 + $0x50] ss:$40 sps:$4 sm:$0xff]  }
 0x1db   :  { %4419 = vmatpush1.bf16.msra.mxu0 %v12885_v31  ;;  %14262 = vpow2.f32 %v11233_v46  ;;  %v12948_v29 = vld [vmem:[%s18871_s3] ss:$40 sps:$4 sm:$0xff]   ;;  %v12965_v40 = vld [vmem:[%s18869_s1 + $0x114] ss:$40 sps:$4 sm:$0xff]  }
 0x1dc   :  { %4583 = vmatpush1.bf16.msra.mxu1 %v12888_v32  ;;  %4420 = vmatprep.subr.bf16.mxu0 %v12893_v36  ;;  %v12953_v32 = vld [vmem:[%s18869_s1 + $0x74] ss:$40 sps:$4 sm:$0xff]   ;;  %v12959_v36 = vld [vmem:[%s18869_s1 + $0xc4] ss:$40 sps:$4 sm:$0xff]   ;;  %v12972_v46 = vld [vmem:[%s18871_s3 + $0x140] ss:$40 sps:$4 sm:$0xff]  }
 0x1dd   :  { %4584 = vmatprep.subr.bf16.mxu1 %v12896_v37  ;;  %v12962_v37 = vld [vmem:[%s18871_s3 + $0xa4] ss:$40 sps:$4 sm:$0xff]  }
 0x1df   :  { %4421 = vmatpush1.bf16.msra.mxu0 %v12891_v38  ;;  %v12957_v38 = vld [vmem:[%s18869_s1 + $0xc0] ss:$40 sps:$4 sm:$0xff]  }
 0x1e0   :  { %4585 = vmatpush1.bf16.msra.mxu1 %v12894_v39  ;;  %4422 = vmatprep.subr.bf16.mxu0 %v12899_v41  ;;  %v12960_v39 = vld [vmem:[%s18871_s3 + $0xa0] ss:$40 sps:$4 sm:$0xff]   ;;  %v12968_v41 = vld [vmem:[%s18871_s3 + $0xf4] ss:$40 sps:$4 sm:$0xff]  }
 0x1e1   :  { %4586 = vmatprep.subr.bf16.mxu1 %v12902_v42  ;;  %v12963_v42 = vld [vmem:[%s18869_s1 + $0x110] ss:$40 sps:$4 sm:$0xff]  }
 0x1e3   :  { %4423 = vmatpush1.bf16.msra.mxu0 %v12897_v43  ;;  %v12971_v43 = vld [vmem:[%s18869_s1 + $0x164] ss:$40 sps:$4 sm:$0xff]  }
 0x1e4   :  { %4587 = vmatpush1.bf16.msra.mxu1 %v12900_v44  ;;  %4424 = vmatprep.subr.bf16.mxu0 %v12905_v45  ;;  %v12974_v44 = vld [vmem:[%s18871_s3 + $0x144] ss:$40 sps:$4 sm:$0xff]   ;;  %v12969_v45 = vld [vmem:[%s18869_s1 + $0x160] ss:$40 sps:$4 sm:$0xff]  }
 0x1e5   :  { %4588 = vmatprep.subr.bf16.mxu1 %v12908_v47  ;;  %v14263_v61 = vpop.eup %14262  ;;  %v12977_v47 = vld [vmem:[%s18869_s1 + $0x1b4] ss:$40 sps:$4 sm:$0xff]  }
 0x1e6   :  { %v4806_v2 = vadd.f32 1.0, %v14263_v61 }
 0x1e7   :  { %4425 = vmatpush1.bf16.msra.mxu0 %v12903_v49  ;;  %v12980_v49 = vld [vmem:[%s18871_s3 + $0x194] ss:$40 sps:$4 sm:$0xff]  }
 0x1e8   :  { %4589 = vmatpush1.bf16.msra.mxu1 %v12906_v50  ;;  %4426 = vmatprep.subr.bf16.mxu0 %v12911_v51  ;;  %14264 = vrcp.f32 %v4806_v2  ;;  %v12975_v50 = vld [vmem:[%s18869_s1 + $0x1b0] ss:$40 sps:$4 sm:$0xff]  }
 0x1e9   :  { %4590 = vmatprep.subr.bf16.mxu1 %v12914_v52  ;;  %v12978_v51 = vld [vmem:[%s18871_s3 + $0x190] ss:$40 sps:$4 sm:$0xff]   ;;  %v16099_v52 = vsub.s32 0, %v15870_v11 }
 0x1eb   :  { %4427 = vmatpush1.bf16.msra.mxu0 %v12909_v53  ;;  %v12983_v53 = vld [vmem:[%s18869_s1 + $0x204] ss:$40 sps:$4 sm:$0xff]  }
 0x1ec   :  { %4591 = vmatpush1.bf16.msra.mxu1 %v12912_v54  ;;  %4428 = vmatprep.subr.bf16.mxu0 %v12917_v55  ;;  %v12986_v54 = vld [vmem:[%s18871_s3 + $0x1e4] ss:$40 sps:$4 sm:$0xff]   ;;  %v16108_v55 = vsub.s32 3, %v15870_v11 }
 0x1ed   :  { %4592 = vmatprep.subr.bf16.mxu1 %v12920_v56  ;;  %v12981_v56 = vld [vmem:[%s18869_s1 + $0x200] ss:$40 sps:$4 sm:$0xff]  }
 0x1ee   :  { %v692_v61 = vrot.slane %v15881_v16, %v16108_v55 }
 0x1ef   :  { %4429 = vmatpush1.bf16.msra.mxu0 %v12915_v57  ;;  %v12984_v57 = vld [vmem:[%s18871_s3 + $0x1e0] ss:$40 sps:$4 sm:$0xff]  }
 0x1f0   :  { %4593 = vmatpush1.bf16.msra.mxu1 %v12918_v58  ;;  %4430 = vmatprep.subr.bf16.mxu0 %v12923_v59  ;;  %v680_v58 = vrot.slane %v15881_v16, %v16099_v52  ;;  %v12989_v59 = vld [vmem:[%s18869_s1 + $0x254] ss:$40 sps:$4 sm:$0xff]   ;;  %v12998_v16 = vld [vmem:[%s18871_s3 + $0x284] ss:$40 sps:$4 sm:$0xff]   ;;  %v12012_v2 = vadd.f32 %v15902_v27, %v692_v61 }
 0x1f1   :  { %4594 = vmatprep.subr.bf16.mxu1 %v12926_v60  ;;  %v12992_v60 = vld [vmem:[%s18871_s3 + $0x234] ss:$40 sps:$4 sm:$0xff]  }
 0x1f2   :  { %v14265_v31 = vpop.eup %14264  ;;  %v13004_v27 = vld [vmem:[%s18871_s3 + $0x2d4] ss:$40 sps:$4 sm:$0xff]  }
 0x1f3   :  { %4431 = vmatpush1.bf16.msra.mxu0 %v12921_v62  ;;  %v16044_v35 = vpack.c.bf16 %v14265_v31, %v14265_v31  ;;  %v12987_v62 = vld [vmem:[%s18869_s1 + $0x250] ss:$40 sps:$4 sm:$0xff]   ;;  %v13019_v31 = vld [vmem:[%s18869_s1 + $0x3e4] ss:$40 sps:$4 sm:$0xff]   ;;  %v13052_v61 = vld [vmem:[%s18871_s3 + $0x554] ss:$40 sps:$4 sm:$0xff]  }
 0x1f4   :  { %4595 = vmatpush1.bf16.msra.mxu1 %v12924_v63  ;;  %4432 = vmatprep.subr.bf16.mxu0 %v12929_v0  ;;  %v12990_v63 = vld [vmem:[%s18871_s3 + $0x230] ss:$40 sps:$4 sm:$0xff]   ;;  %v12009_v0 = vadd.f32 %v15898_v24, %v680_v58  ;;  %v12996_v24 = vld [vmem:[%s18871_s3 + $0x280] ss:$40 sps:$4 sm:$0xff]  }
 0x1f5   :  { %4596 = vmatprep.subr.bf16.mxu1 %v12932_v1  ;;  %v12995_v1 = vld [vmem:[%s18869_s1 + $0x2a4] ss:$40 sps:$4 sm:$0xff]   ;;  %v13044_v58 = vld [vmem:[%s18871_s3 + $0x500] ss:$40 sps:$4 sm:$0xff]  }
 0x1f7   :  { %4433 = vmatpush1.bf16.msra.mxu0 %v12927_v3  ;;  %v12993_v3 = vld [vmem:[%s18869_s1 + $0x2a0] ss:$40 sps:$4 sm:$0xff]  }
 0x1f8   :  { %4597 = vmatpush1.bf16.msra.mxu1 %v12930_v4  ;;  %4434 = vmatprep.subr.bf16.mxu0 %v12935_v6  ;;  %v11232_v4 = vmul.f32 -1.442695, %v12009_v0  ;;  %v13001_v6 = vld [vmem:[%s18869_s1 + $0x2f4] ss:$40 sps:$4 sm:$0xff]   ;;  %v13050_v0 = vld [vmem:[%s18871_s3 + $0x550] ss:$40 sps:$4 sm:$0xff]  }
 0x1f9   :  { %4598 = vmatprep.subr.bf16.mxu1 %v12938_v7  ;;  %v11235_v7 = vmul.f32 -1.442695, %v12012_v2  ;;  %v13056_v2 = vld [vmem:[%s18871_s3 + $0x5a0] ss:$40 sps:$4 sm:$0xff]  }
 0x1fa   :  { %14266 = vpow2.f32 %v11232_v4  ;;  %v13062_v4 = vld [vmem:[%s18871_s3 + $0x5f0] ss:$40 sps:$4 sm:$0xff]  }
 0x1fb   :  { %4435 = vmatpush1.bf16.msra.mxu0 %v12933_v8  ;;  %v12999_v8 = vld [vmem:[%s18869_s1 + $0x2f0] ss:$40 sps:$4 sm:$0xff]   ;;  %14268 = vpow2.f32 %v11235_v7  ;;  %v13065_v7 = vld [vmem:[%s18869_s1 + $0x660] ss:$40 sps:$4 sm:$0xff]  }
 0x1fc   :  { %4599 = vmatpush1.bf16.msra.mxu1 %v12936_v9  ;;  %4436 = vmatprep.subr.bf16.mxu0 %v12941_v12  ;;  %v13002_v9 = vld [vmem:[%s18871_s3 + $0x2d0] ss:$40 sps:$4 sm:$0xff]   ;;  %v13007_v12 = vld [vmem:[%s18869_s1 + $0x344] ss:$40 sps:$4 sm:$0xff]  }
 0x1fd   :  { %4600 = vmatprep.subr.bf16.mxu1 %v12944_v14  ;;  %v13010_v14 = vld [vmem:[%s18871_s3 + $0x324] ss:$40 sps:$4 sm:$0xff]  }
 0x1ff   :  { %4437 = vmatpush1.bf16.msra.mxu0 %v12939_v17  ;;  %v13005_v17 = vld [vmem:[%s18869_s1 + $0x340] ss:$40 sps:$4 sm:$0xff]  }
 0x200   :  { %4601 = vmatpush1.bf16.msra.mxu1 %v12942_v18  ;;  %4611 = vmatprep.subr.bf16.mxu0 %v12947_v22  ;;  %v13008_v18 = vld [vmem:[%s18871_s3 + $0x320] ss:$40 sps:$4 sm:$0xff]   ;;  %v13013_v22 = vld [vmem:[%s18869_s1 + $0x394] ss:$40 sps:$4 sm:$0xff]  }
 0x201   :  { %9403 = vmatprep.subr.bf16.mxu1 %v12950_v23  ;;  %v13016_v23 = vld [vmem:[%s18871_s3 + $0x374] ss:$40 sps:$4 sm:$0xff]  }
 0x202   :  { %4439 = vmatmul.mubr.bf16.vlgmr.msra.gmra.mrb[4].mxu0 %v15222_v28 }
 0x203   :  { %4603 = vmatmul.mubr.bf16.vlgmr.msra.gmra.mrb[4].mxu1 %v15222_v28  ;;  %4612 = vmatpush1.bf16.msra.mxu0 %v12945_v26  ;;  %v13011_v26 = vld [vmem:[%s18869_s1 + $0x390] ss:$40 sps:$4 sm:$0xff]  }
 0x204   :  { %9404 = vmatpush1.bf16.msra.mxu1 %v12948_v29  ;;  %9435 = vmatprep.mubr.bf16.mxu1 %v16044_v35  ;;  %v13014_v29 = vld [vmem:[%s18871_s3 + $0x370] ss:$40 sps:$4 sm:$0xff]  }
 0x205   :  { %4613 = vmatprep.subr.bf16.mxu0 %v12953_v32  ;;  %9405 = vmatprep.subr.bf16.mxu1 %v12956_v21  ;;  %v13022_v32 = vld [vmem:[%s18871_s3 + $0x3c4] ss:$40 sps:$4 sm:$0xff]   ;;  %v14267_v21 = vpop.eup %14266 }
 0x206   :  { %4643 = vmatprep.mubr.bf16.mxu0 %v14534_v48  ;;  %v12966_v48 = vld [vmem:[%s18871_s3 + $0xf0] ss:$40 sps:$4 sm:$0xff]  }
 0x207   :  { %4614 = vmatpush1.bf16.msra.mxu0 %v12951_v33  ;;  %v13017_v33 = vld [vmem:[%s18869_s1 + $0x3e0] ss:$40 sps:$4 sm:$0xff]  }
 0x208   :  { %9406 = vmatpush1.bf16.msra.mxu1 %v12954_v34  ;;  %4615 = vmatprep.subr.bf16.mxu0 %v12959_v36  ;;  %v13020_v34 = vld [vmem:[%s18871_s3 + $0x3c0] ss:$40 sps:$4 sm:$0xff]   ;;  %v14269_v36 = vpop.eup %14268 }
 0x209   :  { %9407 = vmatprep.subr.bf16.mxu1 %v12962_v37  ;;  %v4805_v37 = vadd.f32 1.0, %v14267_v21  ;;  %v13085_v21 = vld [vmem:[%s18869_s1 + $0x754] ss:$40 sps:$4 sm:$0xff]  }
 0x20b   :  { %4616 = vmatpush1.bf16.msra.mxu0 %v12957_v38  ;;  %v13025_v38 = vld [vmem:[%s18869_s1 + $0x434] ss:$40 sps:$4 sm:$0xff]   ;;  %14270 = vrcp.f32 %v4805_v37 }
 0x20c   :  { %9408 = vmatpush1.bf16.msra.mxu1 %v12960_v39  ;;  %4617 = vmatprep.subr.bf16.mxu0 %v12965_v40  ;;  %v13028_v39 = vld [vmem:[%s18871_s3 + $0x414] ss:$40 sps:$4 sm:$0xff]   ;;  %v4808_v40 = vadd.f32 1.0, %v14269_v36  ;;  %v13086_v36 = vld [vmem:[%s18871_s3 + $0x730] ss:$40 sps:$4 sm:$0xff]  }
 0x20d   :  { %9409 = vmatprep.subr.bf16.mxu1 %v12968_v41  ;;  %v13023_v41 = vld [vmem:[%s18869_s1 + $0x430] ss:$40 sps:$4 sm:$0xff]  }
 0x20e   :  { %14272 = vrcp.f32 %v4808_v40  ;;  %v13089_v40 = vld [vmem:[%s18869_s1 + $0x7a0] ss:$40 sps:$4 sm:$0xff]  }
 0x20f   :  { %4618 = vmatpush1.bf16.msra.mxu0 %v12963_v42  ;;  %v13026_v42 = vld [vmem:[%s18871_s3 + $0x410] ss:$40 sps:$4 sm:$0xff]  }
 0x210   :  { %9410 = vmatpush1.bf16.msra.mxu1 %v12966_v48  ;;  %4619 = vmatprep.subr.bf16.mxu0 %v12971_v43  ;;  %v13031_v48 = vld [vmem:[%s18869_s1 + $0x484] ss:$40 sps:$4 sm:$0xff]  }
 0x211   :  { %9411 = vmatprep.subr.bf16.mxu1 %v12974_v44  ;;  %v13034_v43 = vld [vmem:[%s18871_s3 + $0x464] ss:$40 sps:$4 sm:$0xff]   ;;  %v13029_v44 = vld [vmem:[%s18869_s1 + $0x480] ss:$40 sps:$4 sm:$0xff]  }
 0x213   :  { %4620 = vmatpush1.bf16.msra.mxu0 %v12969_v45  ;;  %v13032_v45 = vld [vmem:[%s18871_s3 + $0x460] ss:$40 sps:$4 sm:$0xff]  }
 0x214   :  { %9412 = vmatpush1.bf16.msra.mxu1 %v12972_v46  ;;  %4621 = vmatprep.subr.bf16.mxu0 %v12977_v47  ;;  %v13037_v46 = vld [vmem:[%s18869_s1 + $0x4d4] ss:$40 sps:$4 sm:$0xff]  }
 0x215   :  { %9413 = vmatprep.subr.bf16.mxu1 %v12980_v49  ;;  %v13040_v47 = vld [vmem:[%s18871_s3 + $0x4b4] ss:$40 sps:$4 sm:$0xff]   ;;  %v13035_v49 = vld [vmem:[%s18869_s1 + $0x4d0] ss:$40 sps:$4 sm:$0xff]  }
 0x217   :  { %4622 = vmatpush1.bf16.msra.mxu0 %v12975_v50  ;;  %v13038_v50 = vld [vmem:[%s18871_s3 + $0x4b0] ss:$40 sps:$4 sm:$0xff]  }
 0x218   :  { %9414 = vmatpush1.bf16.msra.mxu1 %v12978_v51  ;;  %4623 = vmatprep.subr.bf16.mxu0 %v12983_v53  ;;  %v13043_v51 = vld [vmem:[%s18869_s1 + $0x524] ss:$40 sps:$4 sm:$0xff]  }
 0x219   :  { %9415 = vmatprep.subr.bf16.mxu1 %v12986_v54  ;;  %v13046_v53 = vld [vmem:[%s18871_s3 + $0x504] ss:$40 sps:$4 sm:$0xff]   ;;  %v14271_v54 = vpop.eup %14270 }
 0x21b   :  { %4624 = vmatpush1.bf16.msra.mxu0 %v12981_v56  ;;  %v14273_v56 = vpop.eup %14272 }
 0x21c   :  { %9416 = vmatpush1.bf16.msra.mxu1 %v12984_v57  ;;  %4625 = vmatprep.subr.bf16.mxu0 %v12989_v59  ;;  %v13041_v57 = vld [vmem:[%s18869_s1 + $0x520] ss:$40 sps:$4 sm:$0xff]   ;;  %v13049_v59 = vld [vmem:[%s18869_s1 + $0x574] ss:$40 sps:$4 sm:$0xff]  }
 0x21d   :  { %9417 = vmatprep.subr.bf16.mxu1 %v12992_v60  ;;  %v16245_v60 = vpack.c.bf16 %v14271_v54, %v14271_v54  ;;  %v13110_v54 = vld [vmem:[%s18871_s3 + $0x870] ss:$40 sps:$4 sm:$0xff]  }
 0x21f   :  { %4626 = vmatpush1.bf16.msra.mxu0 %v12987_v62  ;;  %v16250_v62 = vpack.c.bf16 %v14273_v56, %v14273_v56  ;;  %v13115_v56 = vld [vmem:[%s18869_s1 + $0x8e4] ss:$40 sps:$4 sm:$0xff]  }
 0x220   :  { %9418 = vmatpush1.bf16.msra.mxu1 %v12990_v63  ;;  %4627 = vmatprep.subr.bf16.mxu0 %v12995_v1  ;;  %v13047_v63 = vld [vmem:[%s18869_s1 + $0x570] ss:$40 sps:$4 sm:$0xff]   ;;  %v13055_v1 = vld [vmem:[%s18869_s1 + $0x5c4] ss:$40 sps:$4 sm:$0xff]  }
 0x221   :  { %9419 = vmatprep.subr.bf16.mxu1 %v12998_v16  ;;  %v13053_v16 = vld [vmem:[%s18869_s1 + $0x5c0] ss:$40 sps:$4 sm:$0xff]  }
 0x223   :  { %4628 = vmatpush1.bf16.msra.mxu0 %v12993_v3  ;;  %v13061_v3 = vld [vmem:[%s18869_s1 + $0x614] ss:$40 sps:$4 sm:$0xff]  }
 0x224   :  { %9420 = vmatpush1.bf16.msra.mxu1 %v12996_v24  ;;  %4629 = vmatprep.subr.bf16.mxu0 %v13001_v6  ;;  %v13059_v24 = vld [vmem:[%s18869_s1 + $0x610] ss:$40 sps:$4 sm:$0xff]   ;;  %v13067_v6 = vld [vmem:[%s18869_s1 + $0x664] ss:$40 sps:$4 sm:$0xff]  }
 0x225   :  { %9421 = vmatprep.subr.bf16.mxu1 %v13004_v27  ;;  %v13070_v27 = vld [vmem:[%s18871_s3 + $0x644] ss:$40 sps:$4 sm:$0xff]  }
 0x227   :  { %4630 = vmatpush1.bf16.msra.mxu0 %v12999_v8  ;;  %v13068_v8 = vld [vmem:[%s18871_s3 + $0x640] ss:$40 sps:$4 sm:$0xff]  }
 0x228   :  { %9422 = vmatpush1.bf16.msra.mxu1 %v13002_v9  ;;  %4631 = vmatprep.subr.bf16.mxu0 %v13007_v12  ;;  %v13073_v9 = vld [vmem:[%s18869_s1 + $0x6b4] ss:$40 sps:$4 sm:$0xff]  }
 0x229   :  { %9423 = vmatprep.subr.bf16.mxu1 %v13010_v14  ;;  %v13076_v12 = vld [vmem:[%s18871_s3 + $0x694] ss:$40 sps:$4 sm:$0xff]   ;;  %v13071_v14 = vld [vmem:[%s18869_s1 + $0x6b0] ss:$40 sps:$4 sm:$0xff]  }
 0x22b   :  { %4632 = vmatpush1.bf16.msra.mxu0 %v13005_v17  ;;  %v13074_v17 = vld [vmem:[%s18871_s3 + $0x690] ss:$40 sps:$4 sm:$0xff]  }
 0x22c   :  { %9424 = vmatpush1.bf16.msra.mxu1 %v13008_v18  ;;  %4633 = vmatprep.subr.bf16.mxu0 %v13013_v22  ;;  %v16311_v18 = vsub.s32 2, %v15870_v11  ;;  %v13079_v22 = vld [vmem:[%s18869_s1 + $0x704] ss:$40 sps:$4 sm:$0xff]  }
 0x22d   :  { %9425 = vmatprep.subr.bf16.mxu1 %v13016_v23  ;;  %v13082_v23 = vld [vmem:[%s18871_s3 + $0x6e4] ss:$40 sps:$4 sm:$0xff]  }
 0x22f   :  { %4634 = vmatpush1.bf16.msra.mxu0 %v13011_v26  ;;  %v13077_v26 = vld [vmem:[%s18869_s1 + $0x700] ss:$40 sps:$4 sm:$0xff]  }
 0x230   :  { %9426 = vmatpush1.bf16.msra.mxu1 %v13014_v29  ;;  %4635 = vmatprep.subr.bf16.mxu0 %v13019_v31  ;;  %v13080_v29 = vld [vmem:[%s18871_s3 + $0x6e0] ss:$40 sps:$4 sm:$0xff]  }
 0x231   :  { %9427 = vmatprep.subr.bf16.mxu1 %v13022_v32  ;;  %v16328_v31 = vld [vmem:[%s18872_s2] sm:$0xff] }
 0x232   :  { %v688_v32 = vrot.slane %v16328_v31, %v16311_v18 }
 0x233   :  { %4636 = vmatpush1.bf16.msra.mxu0 %v13017_v33  ;;  %v13088_v33 = vld [vmem:[%s18871_s3 + $0x734] ss:$40 sps:$4 sm:$0xff]  }
 0x234   :  { %9428 = vmatpush1.bf16.msra.mxu1 %v13020_v34  ;;  %4637 = vmatprep.subr.bf16.mxu0 %v13025_v38  ;;  %v13083_v34 = vld [vmem:[%s18869_s1 + $0x750] ss:$40 sps:$4 sm:$0xff]   ;;  %v12011_v37 = vadd.f32 %v15900_v25, %v688_v32  ;;  %v13091_v38 = vld [vmem:[%s18869_s1 + $0x7a4] ss:$40 sps:$4 sm:$0xff]   ;;  %v13092_v25 = vld [vmem:[%s18871_s3 + $0x780] ss:$40 sps:$4 sm:$0xff]  }
 0x235   :  { %9429 = vmatprep.subr.bf16.mxu1 %v13028_v39  ;;  %v13094_v39 = vld [vmem:[%s18871_s3 + $0x784] ss:$40 sps:$4 sm:$0xff]   ;;  %v13182_v32 = vld [vmem:[%s18871_s3 + $0xa50] ss:$40 sps:$4 sm:$0xff]  }
 0x237   :  { %4638 = vmatpush1.bf16.msra.mxu0 %v13023_v41  ;;  %v11234_v41 = vmul.f32 -1.442695, %v12011_v37  ;;  %v13196_v37 = vld [vmem:[%s18871_s3 + $0xaf4] ss:$40 sps:$4 sm:$0xff]  }
 0x238   :  { %9430 = vmatpush1.bf16.msra.mxu1 %v13026_v42  ;;  %4639 = vmatprep.subr.bf16.mxu0 %v13031_v48  ;;  %v13097_v42 = vld [vmem:[%s18869_s1 + $0x7f4] ss:$40 sps:$4 sm:$0xff]  }
 0x239   :  { %9431 = vmatprep.subr.bf16.mxu1 %v13034_v43  ;;  %v13100_v48 = vld [vmem:[%s18871_s3 + $0x7d4] ss:$40 sps:$4 sm:$0xff]   ;;  %v13095_v43 = vld [vmem:[%s18869_s1 + $0x7f0] ss:$40 sps:$4 sm:$0xff]   ;;  %14274 = vpow2.f32 %v11234_v41 }
 0x23a   :  { %v13154_v41 = vld [vmem:[%s18869_s1 + $0xbb4] ss:$40 sps:$4 sm:$0xff]  }
 0x23b   :  { %4640 = vmatpush1.bf16.msra.mxu0 %v13029_v44  ;;  %v13098_v44 = vld [vmem:[%s18871_s3 + $0x7d0] ss:$40 sps:$4 sm:$0xff]  }
 0x23c   :  { %9432 = vmatpush1.bf16.msra.mxu1 %v13032_v45  ;;  %4641 = vmatprep.subr.bf16.mxu0 %v13037_v46  ;;  %v13103_v45 = vld [vmem:[%s18869_s1 + $0x844] ss:$40 sps:$4 sm:$0xff]  }
 0x23d   :  { %9433 = vmatprep.subr.bf16.mxu1 %v13040_v47  ;;  %v13106_v46 = vld [vmem:[%s18871_s3 + $0x824] ss:$40 sps:$4 sm:$0xff]   ;;  %v13101_v47 = vld [vmem:[%s18869_s1 + $0x840] ss:$40 sps:$4 sm:$0xff]  }
 0x23f   :  { %4642 = vmatpush1.bf16.msra.mxu0 %v13035_v49  ;;  %v13104_v49 = vld [vmem:[%s18871_s3 + $0x820] ss:$40 sps:$4 sm:$0xff]  }
 0x240   :  { %9434 = vmatpush1.bf16.msra.mxu1 %v13038_v50  ;;  %4652 = vmatprep.subr.bf16.mxu0 %v13043_v51  ;;  %v13109_v50 = vld [vmem:[%s18869_s1 + $0x894] ss:$40 sps:$4 sm:$0xff]  }
 0x241   :  { %9444 = vmatprep.subr.bf16.mxu1 %v13046_v53  ;;  %v13112_v51 = vld [vmem:[%s18871_s3 + $0x874] ss:$40 sps:$4 sm:$0xff]   ;;  %v13107_v53 = vld [vmem:[%s18869_s1 + $0x890] ss:$40 sps:$4 sm:$0xff]  }
 0x242   :  { %4644 = vmatmul.mubr.bf16.vlgmr.msra.gmra.mrb[8].mxu0 %v14598_v5  ;;  %v13058_v5 = vld [vmem:[%s18871_s3 + $0x5a4] ss:$40 sps:$4 sm:$0xff]  }
 0x243   :  { %9436 = vmatmul.mubr.bf16.vlgmr.msra.gmra.mrb[8].mxu1 %v16245_v60  ;;  %4653 = vmatpush1.bf16.msra.mxu0 %v13041_v57  ;;  %v14275_v57 = vpop.eup %14274 }
 0x244   :  { %9445 = vmatpush1.bf16.msra.mxu1 %v13044_v58  ;;  %9476 = vmatprep.mubr.bf16.mxu1 %v16250_v62  ;;  %v13118_v58 = vld [vmem:[%s18871_s3 + $0x8c4] ss:$40 sps:$4 sm:$0xff]  }
 0x245   :  { %4654 = vmatprep.subr.bf16.mxu0 %v13049_v59  ;;  %9446 = vmatprep.subr.bf16.mxu1 %v13052_v61  ;;  %v13113_v59 = vld [vmem:[%s18869_s1 + $0x8e0] ss:$40 sps:$4 sm:$0xff]  }
 0x246   :  { %4684 = vmatprep.mubr.bf16.mxu0 %v14678_v30  ;;  %v13064_v30 = vld [vmem:[%s18871_s3 + $0x5f4] ss:$40 sps:$4 sm:$0xff]   ;;  %v13116_v61 = vld [vmem:[%s18871_s3 + $0x8c0] ss:$40 sps:$4 sm:$0xff]  }
 0x247   :  { %4655 = vmatpush1.bf16.msra.mxu0 %v13047_v63  ;;  %v13121_v63 = vld [vmem:[%s18869_s1 + $0x934] ss:$40 sps:$4 sm:$0xff]  }
 0x248   :  { %9447 = vmatpush1.bf16.msra.mxu1 %v13050_v0  ;;  %4656 = vmatprep.subr.bf16.mxu0 %v13055_v1  ;;  %v4807_v0 = vadd.f32 1.0, %v14275_v57  ;;  %v13124_v1 = vld [vmem:[%s18871_s3 + $0x914] ss:$40 sps:$4 sm:$0xff]   ;;  %v13226_v57 = vld [vmem:[%s18871_s3 + $0xc84] ss:$40 sps:$4 sm:$0xff]  }
 0x249   :  { %9448 = vmatprep.subr.bf16.mxu1 %v13058_v5  ;;  %v13119_v5 = vld [vmem:[%s18869_s1 + $0x930] ss:$40 sps:$4 sm:$0xff]  }
 0x24a   :  { %14276 = vrcp.f32 %v4807_v0  ;;  %v13164_v0 = vld [vmem:[%s18869_s1 + $0xcf0] ss:$40 sps:$4 sm:$0xff]  }
 0x24b   :  { %4657 = vmatpush1.bf16.msra.mxu0 %v13053_v16  ;;  %v13122_v16 = vld [vmem:[%s18871_s3 + $0x910] ss:$40 sps:$4 sm:$0xff]  }
 0x24c   :  { %9449 = vmatpush1.bf16.msra.mxu1 %v13056_v2  ;;  %4658 = vmatprep.subr.bf16.mxu0 %v13061_v3  ;;  %v13127_v2 = vld [vmem:[%s18869_s1 + $0x984] ss:$40 sps:$4 sm:$0xff]  }
 0x24d   :  { %9450 = vmatprep.subr.bf16.mxu1 %v13064_v30  ;;  %v13130_v3 = vld [vmem:[%s18871_s3 + $0x964] ss:$40 sps:$4 sm:$0xff]   ;;  %v13125_v30 = vld [vmem:[%s18869_s1 + $0x980] ss:$40 sps:$4 sm:$0xff]  }
 0x24f   :  { %4659 = vmatpush1.bf16.msra.mxu0 %v13059_v24  ;;  %v13128_v24 = vld [vmem:[%s18871_s3 + $0x960] ss:$40 sps:$4 sm:$0xff]  }
 0x250   :  { %9451 = vmatpush1.bf16.msra.mxu1 %v13062_v4  ;;  %4660 = vmatprep.subr.bf16.mxu0 %v13067_v6  ;;  %v13133_v4 = vld [vmem:[%s18869_s1 + $0x9d4] ss:$40 sps:$4 sm:$0xff]  }
 0x251   :  { %9452 = vmatprep.subr.bf16.mxu1 %v13070_v27  ;;  %v13136_v6 = vld [vmem:[%s18871_s3 + $0x9b4] ss:$40 sps:$4 sm:$0xff]   ;;  %v13131_v27 = vld [vmem:[%s18869_s1 + $0x9d0] ss:$40 sps:$4 sm:$0xff]  }
 0x253   :  { %4661 = vmatpush1.bf16.msra.mxu0 %v13065_v7  ;;  %v13134_v7 = vld [vmem:[%s18871_s3 + $0x9b0] ss:$40 sps:$4 sm:$0xff]  }
 0x254   :  { %9453 = vmatpush1.bf16.msra.mxu1 %v13068_v8  ;;  %4662 = vmatprep.subr.bf16.mxu0 %v13073_v9  ;;  %v13139_v8 = vld [vmem:[%s18869_s1 + $0xa24] ss:$40 sps:$4 sm:$0xff]  }
 0x255   :  { %9454 = vmatprep.subr.bf16.mxu1 %v13076_v12  ;;  %v13178_v9 = vld [vmem:[%s18871_s3 + $0xa04] ss:$40 sps:$4 sm:$0xff]   ;;  %v14277_v12 = vpop.eup %14276 }
 0x257   :  { %4663 = vmatpush1.bf16.msra.mxu0 %v13071_v14  ;;  %v13137_v14 = vld [vmem:[%s18869_s1 + $0xa20] ss:$40 sps:$4 sm:$0xff]  }
 0x258   :  { %9455 = vmatpush1.bf16.msra.mxu1 %v13074_v17  ;;  %4664 = vmatprep.subr.bf16.mxu0 %v13079_v22  ;;  %v13142_v17 = vld [vmem:[%s18869_s1 + $0xa74] ss:$40 sps:$4 sm:$0xff]   ;;  %v13176_v22 = vld [vmem:[%s18871_s3 + $0xa00] ss:$40 sps:$4 sm:$0xff]  }
 0x259   :  { %9456 = vmatprep.subr.bf16.mxu1 %v13082_v23  ;;  %v13184_v23 = vld [vmem:[%s18871_s3 + $0xa54] ss:$40 sps:$4 sm:$0xff]  }
 0x25b   :  { %4665 = vmatpush1.bf16.msra.mxu0 %v13077_v26  ;;  %v16459_v26 = vpack.c.bf16 %v14277_v12, %v14277_v12  ;;  %v13248_v12 = vld [vmem:[%s18871_s3 + $0xdc0] ss:$40 sps:$4 sm:$0xff]  }
 0x25c   :  { %9457 = vmatpush1.bf16.msra.mxu1 %v13080_v29  ;;  %4666 = vmatprep.subr.bf16.mxu0 %v13085_v21  ;;  %v13140_v29 = vld [vmem:[%s18869_s1 + $0xa70] ss:$40 sps:$4 sm:$0xff]   ;;  %v13145_v21 = vld [vmem:[%s18869_s1 + $0xac4] ss:$40 sps:$4 sm:$0xff]  }
 0x25d   :  { %9458 = vmatprep.subr.bf16.mxu1 %v13088_v33  ;;  %v13190_v33 = vld [vmem:[%s18871_s3 + $0xaa4] ss:$40 sps:$4 sm:$0xff]  }
 0x25f   :  { %4667 = vmatpush1.bf16.msra.mxu0 %v13083_v34  ;;  %v13148_v34 = vld [vmem:[%s18869_s1 + $0xb14] ss:$40 sps:$4 sm:$0xff]  }
 0x260   :  { %9459 = vmatpush1.bf16.msra.mxu1 %v13086_v36  ;;  %4668 = vmatprep.subr.bf16.mxu0 %v13091_v38  ;;  %v13188_v36 = vld [vmem:[%s18871_s3 + $0xaa0] ss:$40 sps:$4 sm:$0xff]   ;;  %v13151_v38 = vld [vmem:[%s18869_s1 + $0xb64] ss:$40 sps:$4 sm:$0xff]  }
 0x261   :  { %9460 = vmatprep.subr.bf16.mxu1 %v13094_v39  ;;  %v13194_v39 = vld [vmem:[%s18871_s3 + $0xaf0] ss:$40 sps:$4 sm:$0xff]  }
 0x263   :  { %4669 = vmatpush1.bf16.msra.mxu0 %v13089_v40  ;;  %v13202_v40 = vld [vmem:[%s18871_s3 + $0xb44] ss:$40 sps:$4 sm:$0xff]  }
 0x264   :  { %9461 = vmatpush1.bf16.msra.mxu1 %v13092_v25  ;;  %4670 = vmatprep.subr.bf16.mxu0 %v13097_v42  ;;  %v13149_v25 = vld [vmem:[%s18869_s1 + $0xb60] ss:$40 sps:$4 sm:$0xff]  }
 0x265   :  { %9462 = vmatprep.subr.bf16.mxu1 %v13100_v48  ;;  %v13200_v42 = vld [vmem:[%s18871_s3 + $0xb40] ss:$40 sps:$4 sm:$0xff]   ;;  %v13208_v48 = vld [vmem:[%s18871_s3 + $0xb94] ss:$40 sps:$4 sm:$0xff]  }
 0x267   :  { %4671 = vmatpush1.bf16.msra.mxu0 %v13095_v43  ;;  %v13152_v43 = vld [vmem:[%s18869_s1 + $0xbb0] ss:$40 sps:$4 sm:$0xff]  }
 0x268   :  { %9463 = vmatpush1.bf16.msra.mxu1 %v13098_v44  ;;  %4672 = vmatprep.subr.bf16.mxu0 %v13103_v45  ;;  %v13157_v44 = vld [vmem:[%s18869_s1 + $0xc04] ss:$40 sps:$4 sm:$0xff]   ;;  %v13206_v45 = vld [vmem:[%s18871_s3 + $0xb90] ss:$40 sps:$4 sm:$0xff]  }
 0x269   :  { %9464 = vmatprep.subr.bf16.mxu1 %v13106_v46  ;;  %v13214_v46 = vld [vmem:[%s18871_s3 + $0xbe4] ss:$40 sps:$4 sm:$0xff]  }
 0x26b   :  { %4673 = vmatpush1.bf16.msra.mxu0 %v13101_v47  ;;  %v13155_v47 = vld [vmem:[%s18869_s1 + $0xc00] ss:$40 sps:$4 sm:$0xff]  }
 0x26c   :  { %9465 = vmatpush1.bf16.msra.mxu1 %v13104_v49  ;;  %4674 = vmatprep.subr.bf16.mxu0 %v13109_v50  ;;  %v13160_v49 = vld [vmem:[%s18869_s1 + $0xc54] ss:$40 sps:$4 sm:$0xff]   ;;  %v13212_v50 = vld [vmem:[%s18871_s3 + $0xbe0] ss:$40 sps:$4 sm:$0xff]  }
 0x26d   :  { %9466 = vmatprep.subr.bf16.mxu1 %v13112_v51  ;;  %v13220_v51 = vld [vmem:[%s18871_s3 + $0xc34] ss:$40 sps:$4 sm:$0xff]  }
 0x26f   :  { %4675 = vmatpush1.bf16.msra.mxu0 %v13107_v53  ;;  %v13158_v53 = vld [vmem:[%s18869_s1 + $0xc50] ss:$40 sps:$4 sm:$0xff]  }
 0x270   :  { %9467 = vmatpush1.bf16.msra.mxu1 %v13110_v54  ;;  %4676 = vmatprep.subr.bf16.mxu0 %v13115_v56  ;;  %v13163_v54 = vld [vmem:[%s18869_s1 + $0xca4] ss:$40 sps:$4 sm:$0xff]   ;;  %v13218_v56 = vld [vmem:[%s18871_s3 + $0xc30] ss:$40 sps:$4 sm:$0xff]  }
 0x271   :  { %9468 = vmatprep.subr.bf16.mxu1 %v13118_v58  ;;  %v13161_v58 = vld [vmem:[%s18869_s1 + $0xca0] ss:$40 sps:$4 sm:$0xff]  }
 0x273   :  { %4677 = vmatpush1.bf16.msra.mxu0 %v13113_v59  ;;  %v13166_v59 = vld [vmem:[%s18869_s1 + $0xcf4] ss:$40 sps:$4 sm:$0xff]  }
 0x274   :  { %9469 = vmatpush1.bf16.msra.mxu1 %v13116_v61  ;;  %4678 = vmatprep.subr.bf16.mxu0 %v13121_v63  ;;  %v13224_v61 = vld [vmem:[%s18871_s3 + $0xc80] ss:$40 sps:$4 sm:$0xff]   ;;  %v13232_v63 = vld [vmem:[%s18871_s3 + $0xcd4] ss:$40 sps:$4 sm:$0xff]  }
 0x275   :  { %9470 = vmatprep.subr.bf16.mxu1 %v13124_v1  ;;  %v13169_v1 = vld [vmem:[%s18869_s1 + $0xd44] ss:$40 sps:$4 sm:$0xff]  }
 0x277   :  { %4679 = vmatpush1.bf16.msra.mxu0 %v13119_v5  ;;  %v13230_v5 = vld [vmem:[%s18871_s3 + $0xcd0] ss:$40 sps:$4 sm:$0xff]  }
 0x278   :  { %9471 = vmatpush1.bf16.msra.mxu1 %v13122_v16  ;;  %4680 = vmatprep.subr.bf16.mxu0 %v13127_v2  ;;  %v13238_v16 = vld [vmem:[%s18871_s3 + $0xd24] ss:$40 sps:$4 sm:$0xff]   ;;  %v13167_v2 = vld [vmem:[%s18869_s1 + $0xd40] ss:$40 sps:$4 sm:$0xff]  }
 0x279   :  { %9472 = vmatprep.subr.bf16.mxu1 %v13130_v3  ;;  %v13172_v3 = vld [vmem:[%s18869_s1 + $0xd94] ss:$40 sps:$4 sm:$0xff]  }
 0x27b   :  { %4681 = vmatpush1.bf16.msra.mxu0 %v13125_v30  ;;  %v13236_v30 = vld [vmem:[%s18871_s3 + $0xd20] ss:$40 sps:$4 sm:$0xff]  }
 0x27c   :  { %9473 = vmatpush1.bf16.msra.mxu1 %v13128_v24  ;;  %4682 = vmatprep.subr.bf16.mxu0 %v13133_v4  ;;  %v13244_v24 = vld [vmem:[%s18871_s3 + $0xd74] ss:$40 sps:$4 sm:$0xff]   ;;  %v13170_v4 = vld [vmem:[%s18869_s1 + $0xd90] ss:$40 sps:$4 sm:$0xff]  }
 0x27d   :  { %9474 = vmatprep.subr.bf16.mxu1 %v13136_v6  ;;  %v13175_v6 = vld [vmem:[%s18869_s1 + $0xde4] ss:$40 sps:$4 sm:$0xff]  }
 0x27f   :  { %4683 = vmatpush1.bf16.msra.mxu0 %v13131_v27  ;;  %v13242_v27 = vld [vmem:[%s18871_s3 + $0xd70] ss:$40 sps:$4 sm:$0xff]  }
 0x280   :  { %9475 = vmatpush1.bf16.msra.mxu1 %v13134_v7  ;;  %4693 = vmatprep.subr.bf16.mxu0 %v13139_v8  ;;  %v13250_v7 = vld [vmem:[%s18871_s3 + $0xdc4] ss:$40 sps:$4 sm:$0xff]   ;;  %v13173_v8 = vld [vmem:[%s18869_s1 + $0xde0] ss:$40 sps:$4 sm:$0xff]  }
 0x281   :  { %9485 = vmatprep.subr.bf16.mxu1 %v13178_v9  ;;  %v13181_v9 = vld [vmem:[%s18869_s1 + $0xe34] ss:$40 sps:$4 sm:$0xff]  }
 0x282   :  { %4685 = vmatmul.mubr.bf16.vlgmr.msra.gmra.mrb[8].mxu0 %v14807_v10  ;;  %v13143_v10 = vld [vmem:[%s18869_s1 + $0xac0] ss:$40 sps:$4 sm:$0xff]  }
 0x283   :  { %9477 = vmatmul.mubr.bf16.vlgmr.msra.gmra.mrb[8].mxu1 %v16459_v26  ;;  %4694 = vmatpush1.bf16.msra.mxu0 %v13137_v14  ;;  %v13256_v14 = vld [vmem:[%s18871_s3 + $0xe14] ss:$40 sps:$4 sm:$0xff]  }
 0x284   :  { %9486 = vmatpush1.bf16.msra.mxu1 %v13176_v22  ;;  %4695 = vmatprep.subr.bf16.mxu0 %v13142_v17  ;;  %v13179_v17 = vld [vmem:[%s18869_s1 + $0xe30] ss:$40 sps:$4 sm:$0xff]  }
 0x285   :  { %9487 = vmatprep.subr.bf16.mxu1 %v13184_v23  ;;  %4725 = vmatprep.mubr.bf16.mxu0 %v14825_v15  ;;  %v13146_v15 = vld [vmem:[%s18869_s1 + $0xb10] ss:$40 sps:$4 sm:$0xff]   ;;  %v13187_v23 = vld [vmem:[%s18869_s1 + $0xe84] ss:$40 sps:$4 sm:$0xff]  }
 0x286   :  { %v13254_v22 = vld [vmem:[%s18871_s3 + $0xe10] ss:$40 sps:$4 sm:$0xff]  }
 0x287   :  { %4696 = vmatpush1.bf16.msra.mxu0 %v13140_v29  ;;  %v13262_v29 = vld [vmem:[%s18871_s3 + $0xe64] ss:$40 sps:$4 sm:$0xff]  }
 0x288   :  { %9488 = vmatpush1.bf16.msra.mxu1 %v13182_v32  ;;  %4697 = vmatprep.subr.bf16.mxu0 %v13145_v21  ;;  %v13185_v32 = vld [vmem:[%s18869_s1 + $0xe80] ss:$40 sps:$4 sm:$0xff]   ;;  %v13193_v21 = vld [vmem:[%s18869_s1 + $0xed4] ss:$40 sps:$4 sm:$0xff]  }
 0x289   :  { %9489 = vmatprep.subr.bf16.mxu1 %v13190_v33  ;;  %v13260_v33 = vld [vmem:[%s18871_s3 + $0xe60] ss:$40 sps:$4 sm:$0xff]  }
 0x28b   :  { %4698 = vmatpush1.bf16.msra.mxu0 %v13143_v10  ;;  %v13268_v10 = vld [vmem:[%s18871_s3 + $0xeb4] ss:$40 sps:$4 sm:$0xff]  }
 0x28c   :  { %9490 = vmatpush1.bf16.msra.mxu1 %v13188_v36  ;;  %4699 = vmatprep.subr.bf16.mxu0 %v13148_v34  ;;  %v13191_v34 = vld [vmem:[%s18869_s1 + $0xed0] ss:$40 sps:$4 sm:$0xff]   ;;  %v13199_v36 = vld [vmem:[%s18869_s1 + $0xf24] ss:$40 sps:$4 sm:$0xff]  }
 0x28d   :  { %9491 = vmatprep.subr.bf16.mxu1 %v13196_v37  ;;  %v13266_v37 = vld [vmem:[%s18871_s3 + $0xeb0] ss:$40 sps:$4 sm:$0xff]  }
 0x28f   :  { %4700 = vmatpush1.bf16.msra.mxu0 %v13146_v15  ;;  %v13274_v15 = vld [vmem:[%s18871_s3 + $0xf04] ss:$40 sps:$4 sm:$0xff]  }
 0x290   :  { %9492 = vmatpush1.bf16.msra.mxu1 %v13194_v39  ;;  %4701 = vmatprep.subr.bf16.mxu0 %v13151_v38  ;;  %v13197_v38 = vld [vmem:[%s18869_s1 + $0xf20] ss:$40 sps:$4 sm:$0xff]   ;;  %v13205_v39 = vld [vmem:[%s18869_s1 + $0xf74] ss:$40 sps:$4 sm:$0xff]  }
 0x291   :  { %9493 = vmatprep.subr.bf16.mxu1 %v13202_v40  ;;  %v13203_v40 = vld [vmem:[%s18869_s1 + $0xf70] ss:$40 sps:$4 sm:$0xff]  }
 0x293   :  { %4702 = vmatpush1.bf16.msra.mxu0 %v13149_v25  ;;  %v13211_v25 = vld [vmem:[%s18869_s1 + $0xfc4] ss:$40 sps:$4 sm:$0xff]  }
 0x294   :  { %9494 = vmatpush1.bf16.msra.mxu1 %v13200_v42  ;;  %4703 = vmatprep.subr.bf16.mxu0 %v13154_v41  ;;  %v13209_v41 = vld [vmem:[%s18869_s1 + $0xfc0] ss:$40 sps:$4 sm:$0xff]   ;;  %v13215_v42 = vld [vmem:[%s18869_s1 + $0x1010] ss:$40 sps:$4 sm:$0xff]  }
 0x295   :  { %9495 = vmatprep.subr.bf16.mxu1 %v13208_v48  ;;  %v13221_v48 = vld [vmem:[%s18869_s1 + $0x1060] ss:$40 sps:$4 sm:$0xff]  }
 0x297   :  { %4704 = vmatpush1.bf16.msra.mxu0 %v13152_v43  ;;  %v16674_v43 = vsub.s32 4, %v15870_v11 }
 0x298   :  { %9496 = vmatpush1.bf16.msra.mxu1 %v13206_v45  ;;  %4705 = vmatprep.subr.bf16.mxu0 %v13157_v44  ;;  %v16677_v44 = vsub.s32 5, %v15870_v11  ;;  %v13229_v45 = vld [vmem:[%s18869_s1 + $0x10b4] ss:$40 sps:$4 sm:$0xff]  }
 0x299   :  { %9497 = vmatprep.subr.bf16.mxu1 %v13214_v46  ;;  %v16683_v46 = vsub.s32 7, %v15870_v11 }
 0x29b   :  { %4706 = vmatpush1.bf16.msra.mxu0 %v13155_v47  ;;  %v696_v47 = vrot.slane %v16328_v31, %v16674_v43 }
 0x29c   :  { %9498 = vmatpush1.bf16.msra.mxu1 %v13212_v50  ;;  %4707 = vmatprep.subr.bf16.mxu0 %v13160_v49  ;;  %v16690_v49 = vld [vmem:[%s18872_s2] sm:$0xff] }
 0x29d   :  { %9499 = vmatprep.subr.bf16.mxu1 %v13220_v51  ;;  %v700_v50 = vrot.slane %v16690_v49, %v16677_v44  ;;  %v13227_v51 = vld [vmem:[%s18869_s1 + $0x10b0] ss:$40 sps:$4 sm:$0xff]   ;;  %v708_v31 = vrot.slane %v16690_v49, %v16683_v46 }
 0x29f   :  { %4708 = vmatpush1.bf16.msra.mxu0 %v13158_v53  ;;  %v13235_v53 = vld [vmem:[%s18869_s1 + $0x1104] ss:$40 sps:$4 sm:$0xff]  }
 0x2a0   :  { %9500 = vmatpush1.bf16.msra.mxu1 %v13218_v56  ;;  %4709 = vmatprep.subr.bf16.mxu0 %v13163_v54 }
 0x2a1   :  { %9501 = vmatprep.subr.bf16.mxu1 %v13226_v57 }
 0x2a3   :  { %4710 = vmatpush1.bf16.msra.mxu0 %v13161_v58 }
 0x2a4   :  { %9502 = vmatpush1.bf16.msra.mxu1 %v13224_v61  ;;  %4711 = vmatprep.subr.bf16.mxu0 %v13166_v59 }
 0x2a5   :  { %9503 = vmatprep.subr.bf16.mxu1 %v13232_v63 }
 0x2a7   :  { %4712 = vmatpush1.bf16.msra.mxu0 %v13164_v0  ;;  %v13233_v0 = vld [vmem:[%s18869_s1 + $0x1100] ss:$40 sps:$4 sm:$0xff]  }
 0x2a8   :  { %9504 = vmatpush1.bf16.msra.mxu1 %v13230_v5  ;;  %4713 = vmatprep.subr.bf16.mxu0 %v13169_v1 }
 0x2a9   :  { %9505 = vmatprep.subr.bf16.mxu1 %v13238_v16 }
 0x2ab   :  { %4714 = vmatpush1.bf16.msra.mxu0 %v13167_v2 }
 0x2ac   :  { %9506 = vmatpush1.bf16.msra.mxu1 %v13236_v30  ;;  %4715 = vmatprep.subr.bf16.mxu0 %v13172_v3  ;;  %v13241_v30 = vld [vmem:[%s18869_s1 + $0x1154] ss:$40 sps:$4 sm:$0xff]  }
 0x2ad   :  { %9507 = vmatprep.subr.bf16.mxu1 %v13244_v24 }
 0x2af   :  { %4716 = vmatpush1.bf16.msra.mxu0 %v13170_v4 }
 0x2b0   :  { %9508 = vmatpush1.bf16.msra.mxu1 %v13242_v27  ;;  %4717 = vmatprep.subr.bf16.mxu0 %v13175_v6  ;;  %v13239_v6 = vld [vmem:[%s18869_s1 + $0x1150] ss:$40 sps:$4 sm:$0xff]   ;;  %v13247_v27 = vld [vmem:[%s18869_s1 + $0x11a4] ss:$40 sps:$4 sm:$0xff]  }
 0x2b1   :  { %9509 = vmatprep.subr.bf16.mxu1 %v13250_v7  ;;  %v13245_v7 = vld [vmem:[%s18869_s1 + $0x11a0] ss:$40 sps:$4 sm:$0xff]  }
 0x2b3   :  { %4718 = vmatpush1.bf16.msra.mxu0 %v13173_v8  ;;  %v13253_v8 = vld [vmem:[%s18869_s1 + $0x11f4] ss:$40 sps:$4 sm:$0xff]  }
 0x2b4   :  { %9510 = vmatpush1.bf16.msra.mxu1 %v13248_v12  ;;  %4719 = vmatprep.subr.bf16.mxu0 %v13181_v9  ;;  %v13251_v9 = vld [vmem:[%s18869_s1 + $0x11f0] ss:$40 sps:$4 sm:$0xff]   ;;  %v13259_v12 = vld [vmem:[%s18869_s1 + $0x1244] ss:$40 sps:$4 sm:$0xff]  }
 0x2b5   :  { %9511 = vmatprep.subr.bf16.mxu1 %v13256_v14 }
 0x2b7   :  { %4720 = vmatpush1.bf16.msra.mxu0 %v13179_v17 }
 0x2b8   :  { %9512 = vmatpush1.bf16.msra.mxu1 %v13254_v22  ;;  %4721 = vmatprep.subr.bf16.mxu0 %v13187_v23 }
 0x2b9   :  { %9513 = vmatprep.subr.bf16.mxu1 %v13262_v29 }
 0x2bb   :  { %4722 = vmatpush1.bf16.msra.mxu0 %v13185_v32  ;;  %v13257_v32 = vld [vmem:[%s18869_s1 + $0x1240] ss:$40 sps:$4 sm:$0xff]  }
 0x2bc   :  { %9514 = vmatpush1.bf16.msra.mxu1 %v13260_v33  ;;  %4723 = vmatprep.subr.bf16.mxu0 %v13193_v21  ;;  %v13265_v33 = vld [vmem:[%s18869_s1 + $0x1294] ss:$40 sps:$4 sm:$0xff]  }
 0x2bd   :  { %9515 = vmatprep.subr.bf16.mxu1 %v13268_v10  ;;  %v13263_v10 = vld [vmem:[%s18869_s1 + $0x1290] ss:$40 sps:$4 sm:$0xff]  }
 0x2bf   :  { %4724 = vmatpush1.bf16.msra.mxu0 %v13191_v34  ;;  %v13271_v34 = vld [vmem:[%s18869_s1 + $0x12e4] ss:$40 sps:$4 sm:$0xff]  }
 0x2c0   :  { %9516 = vmatpush1.bf16.msra.mxu1 %v13266_v37  ;;  %4734 = vmatprep.subr.bf16.mxu0 %v13199_v36  ;;  %v13269_v36 = vld [vmem:[%s18869_s1 + $0x12e0] ss:$40 sps:$4 sm:$0xff]   ;;  %v13277_v37 = vld [vmem:[%s18869_s1 + $0x1334] ss:$40 sps:$4 sm:$0xff]  }
 0x2c1   :  { %9526 = vmatprep.subr.bf16.mxu1 %v13274_v15 }
 0x2c2   :  { %4726 = vmatmul.mubr.bf16.vlgmr.msra.gmra.mrb[8].mxu0 %v15019_v20  ;;  %v13217_v20 = vld [vmem:[%s18869_s1 + $0x1014] ss:$40 sps:$4 sm:$0xff]  }
 0x2c3   :  { %4735 = vmatpush1.bf16.msra.mxu0 %v13197_v38  ;;  %4766 = vmatprep.mubr.bf16.mxu0 %v15034_v13  ;;  %v13223_v13 = vld [vmem:[%s18869_s1 + $0x1064] ss:$40 sps:$4 sm:$0xff]  }
 0x2c4   :  { %4736 = vmatprep.subr.bf16.mxu0 %v13205_v39 }
 0x2c7   :  { %4737 = vmatpush1.bf16.msra.mxu0 %v13203_v40  ;;  %v13272_v40 = vld [vmem:[%s18871_s3 + $0xf00] ss:$40 sps:$4 sm:$0xff]  }
 0x2c8   :  { %4738 = vmatprep.subr.bf16.mxu0 %v13211_v25  ;;  %v13275_v25 = vld [vmem:[%s18869_s1 + $0x1330] ss:$40 sps:$4 sm:$0xff]  }
 0x2cb   :  { %4739 = vmatpush1.bf16.msra.mxu0 %v13209_v41 }
 0x2cc   :  { %4740 = vmatprep.subr.bf16.mxu0 %v13217_v20 }
 0x2cf   :  { %4741 = vmatpush1.bf16.msra.mxu0 %v13215_v42  ;;  %v13280_v42 = vld [vmem:[%s18871_s3 + $0xf54] ss:$40 sps:$4 sm:$0xff]  }
 0x2d0   :  { %4742 = vmatprep.subr.bf16.mxu0 %v13223_v13  ;;  %v13283_v13 = vld [vmem:[%s18869_s1 + $0x1384] ss:$40 sps:$4 sm:$0xff]  }
 0x2d3   :  { %4743 = vmatpush1.bf16.msra.mxu0 %v13221_v48 }
 0x2d4   :  { %4744 = vmatprep.subr.bf16.mxu0 %v13229_v45  ;;  %v13278_v45 = vld [vmem:[%s18871_s3 + $0xf50] ss:$40 sps:$4 sm:$0xff]  }
 0x2d5   :  { %v4440_v54 = vpop.f32.mrb[4].mxu0 }
 0x2d6   :  { %v16702_v56 = vpop.f32.mrb[4].mxu1  ;;  %v12013_v57 = vadd.f32 %v4440_v54, %v696_v47  ;;  %v4442_v58 = vpop.f32.mrb[5].mxu0  ;;  %v13281_v47 = vld [vmem:[%s18869_s1 + $0x1380] ss:$40 sps:$4 sm:$0xff]   ;;  %v13292_v54 = vld [vmem:[%s18871_s3 + $0xff4] ss:$40 sps:$4 sm:$0xff]  }
 0x2d7   :  { %v4606_v59 = vpop.f32.mrb[5].mxu1  ;;  %v12014_v61 = vadd.f32 %v4442_v58, %v700_v50  ;;  %v4444_v63 = vpop.f32.mrb[6].mxu0  ;;  %4745 = vmatpush1.bf16.msra.mxu0 %v13227_v51  ;;  %v13286_v50 = vld [vmem:[%s18871_s3 + $0xfa4] ss:$40 sps:$4 sm:$0xff]   ;;  %v13289_v51 = vld [vmem:[%s18869_s1 + $0x13d4] ss:$40 sps:$4 sm:$0xff]  }
 0x2d8   :  { %v12016_v1 = vadd.f32 %v4606_v59, %v708_v31  ;;  %v4608_v5 = vpop.f32.mrb[6].mxu1  ;;  %v11236_v16 = vmul.f32 -1.442695, %v12013_v57  ;;  %v4445_v2 = vpop.f32.mrb[7].mxu0  ;;  %4746 = vmatprep.subr.bf16.mxu0 %v13235_v53  ;;  %v13284_v53 = vld [vmem:[%s18871_s3 + $0xfa0] ss:$40 sps:$4 sm:$0xff]  }
 0x2d9   :  { %v4609_v3 = vpop.f32.mrb[7].mxu1  ;;  %v11237_v24 = vmul.f32 -1.442695, %v12014_v61  ;;  %v13287_v31 = vld [vmem:[%s18869_s1 + $0x13d0] ss:$40 sps:$4 sm:$0xff]  }
 0x2da   :  { %v11239_v4 = vmul.f32 -1.442695, %v12016_v1  ;;  %14278 = vpow2.f32 %v11236_v16  ;;  %v13295_v57 = vld [vmem:[%s18871_s3 + $0xc] ss:$40 sps:$4 sm:$0xff]   ;;  %v13290_v58 = vld [vmem:[%s18871_s3 + $0xff0] ss:$40 sps:$4 sm:$0xff]  }
 0x2db   :  { %14280 = vpow2.f32 %v11237_v24  ;;  %4747 = vmatpush1.bf16.msra.mxu0 %v13233_v0  ;;  %v13293_v59 = vld [vmem:[%s18871_s3 + $0x8] ss:$40 sps:$4 sm:$0xff]   ;;  %v13298_v61 = vld [vmem:[%s18871_s3 + $0x1044] ss:$40 sps:$4 sm:$0xff]   ;;  %v13299_v1 = vld [vmem:[%s18871_s3 + $0x58] ss:$40 sps:$4 sm:$0xff]  }
 0x2dc   :  { %4748 = vmatprep.subr.bf16.mxu0 %v13241_v30  ;;  %14282 = vpow2.f32 %v11239_v4  ;;  %v13301_v63 = vld [vmem:[%s18871_s3 + $0x5c] ss:$40 sps:$4 sm:$0xff]   ;;  %v13296_v0 = vld [vmem:[%s18871_s3 + $0x1040] ss:$40 sps:$4 sm:$0xff]   ;;  %v16818_v16 = vsub.s32 6, %v15870_v11 }
 0x2dd   :  { %v13304_v5 = vld [vmem:[%s18871_s3 + $0x1094] ss:$40 sps:$4 sm:$0xff]   ;;  %v13302_v2 = vld [vmem:[%s18871_s3 + $0x1090] ss:$40 sps:$4 sm:$0xff]   ;;  %v13310_v30 = vld [vmem:[%s18871_s3 + $0x10e4] ss:$40 sps:$4 sm:$0xff]  }
 0x2de   :  { %v13305_v3 = vld [vmem:[%s18871_s3 + $0xa8] ss:$40 sps:$4 sm:$0xff]   ;;  %v13313_v11 = vld [vmem:[%s18871_s3 + $0xfc] ss:$40 sps:$4 sm:$0xff]   ;;  %v704_v24 = vrot.slane %v16690_v49, %v16818_v16  ;;  %v13319_v49 = vld [vmem:[%s18871_s3 + $0x14c] ss:$40 sps:$4 sm:$0xff]  }
 0x2df   :  { %4749 = vmatpush1.bf16.msra.mxu0 %v13239_v6  ;;  %v13308_v4 = vld [vmem:[%s18871_s3 + $0x10e0] ss:$40 sps:$4 sm:$0xff]  }
 0x2e0   :  { %4750 = vmatprep.subr.bf16.mxu0 %v13247_v27  ;;  %v13311_v6 = vld [vmem:[%s18871_s3 + $0xf8] ss:$40 sps:$4 sm:$0xff]   ;;  %v13316_v27 = vld [vmem:[%s18871_s3 + $0x1134] ss:$40 sps:$4 sm:$0xff]  }
 0x2e3   :  { %4751 = vmatpush1.bf16.msra.mxu0 %v13245_v7  ;;  %v12015_v7 = vadd.f32 %v16702_v56, %v704_v24  ;;  %v13325_v56 = vld [vmem:[%s18871_s3 + $0x19c] ss:$40 sps:$4 sm:$0xff]  }
 0x2e4   :  { %v14279_v14 = vpop.eup %14278  ;;  %4752 = vmatprep.subr.bf16.mxu0 %v13253_v8  ;;  %v13314_v8 = vld [vmem:[%s18871_s3 + $0x1130] ss:$40 sps:$4 sm:$0xff]   ;;  %v13376_v24 = vld [vmem:[%s18871_s3 + $0x4bc] ss:$40 sps:$4 sm:$0xff]  }
 0x2e5   :  { %v14281_v17 = vpop.eup %14280  ;;  %v4809_v22 = vadd.f32 1.0, %v14279_v14  ;;  %v11238_v14 = vmul.f32 -1.442695, %v12015_v7  ;;  %v13380_v7 = vld [vmem:[%s18871_s3 + $0x558] ss:$40 sps:$4 sm:$0xff]  }
 0x2e6   :  { %v4810_v23 = vadd.f32 1.0, %v14281_v17  ;;  %v14283_v29 = vpop.eup %14282  ;;  %v13320_v17 = vld [vmem:[%s18871_s3 + $0x1180] ss:$40 sps:$4 sm:$0xff]  }
 0x2e7   :  { %14284 = vrcp.f32 %v4809_v22  ;;  %4753 = vmatpush1.bf16.msra.mxu0 %v13251_v9  ;;  %v4812_v21 = vadd.f32 1.0, %v14283_v29  ;;  %v13317_v9 = vld [vmem:[%s18871_s3 + $0x148] ss:$40 sps:$4 sm:$0xff]   ;;  %v13323_v22 = vld [vmem:[%s18871_s3 + $0x198] ss:$40 sps:$4 sm:$0xff]  }
 0x2e8   :  { %14286 = vrcp.f32 %v4810_v23  ;;  %4754 = vmatprep.subr.bf16.mxu0 %v13259_v12  ;;  %v13322_v12 = vld [vmem:[%s18871_s3 + $0x1184] ss:$40 sps:$4 sm:$0xff]   ;;  %v13328_v23 = vld [vmem:[%s18871_s3 + $0x11d4] ss:$40 sps:$4 sm:$0xff]  }
 0x2e9   :  { %14288 = vrcp.f32 %v4812_v21  ;;  %v13331_v29 = vld [vmem:[%s18871_s3 + $0x1ec] ss:$40 sps:$4 sm:$0xff]   ;;  %v13329_v21 = vld [vmem:[%s18871_s3 + $0x1e8] ss:$40 sps:$4 sm:$0xff]  }
 0x2ea   :  { %14290 = vpow2.f32 %v11238_v14  ;;  %v13388_v14 = vld [vmem:[%s18871_s3 + $0x5fc] ss:$40 sps:$4 sm:$0xff]  }
 0x2eb   :  { %4755 = vmatpush1.bf16.msra.mxu0 %v13257_v32  ;;  %v13326_v32 = vld [vmem:[%s18871_s3 + $0x11d0] ss:$40 sps:$4 sm:$0xff]  }
 0x2ec   :  { %4756 = vmatprep.subr.bf16.mxu0 %v13265_v33  ;;  %v13334_v33 = vld [vmem:[%s18871_s3 + $0x1224] ss:$40 sps:$4 sm:$0xff]  }
 0x2ef   :  { %4757 = vmatpush1.bf16.msra.mxu0 %v13263_v10  ;;  %v13337_v10 = vld [vmem:[%s18871_s3 + $0x23c] ss:$40 sps:$4 sm:$0xff]  }
 0x2f0   :  { %4758 = vmatprep.subr.bf16.mxu0 %v13271_v34  ;;  %v13332_v34 = vld [vmem:[%s18871_s3 + $0x1220] ss:$40 sps:$4 sm:$0xff]  }
 0x2f1   :  { %v14285_v15 = vpop.eup %14284 }
 0x2f2   :  { %v14287_v38 = vpop.eup %14286  ;;  %v16754_v20 = vpack.c.bf16 %v14285_v15, %v14285_v15  ;;  %v13343_v15 = vld [vmem:[%s18871_s3 + $0x28c] ss:$40 sps:$4 sm:$0xff]  }
 0x2f3   :  { %v16746_v39 = vpack.c.bf16 %v14287_v38, %v14287_v38  ;;  %4759 = vmatpush1.bf16.msra.mxu0 %v13269_v36  ;;  %v14289_v41 = vpop.eup %14288  ;;  %v13335_v36 = vld [vmem:[%s18871_s3 + $0x238] ss:$40 sps:$4 sm:$0xff]  }
 0x2f4   :  { %4760 = vmatprep.subr.bf16.mxu0 %v13277_v37  ;;  %v16762_v48 = vpack.c.bf16 %v14289_v41, %v14289_v41  ;;  %v13340_v37 = vld [vmem:[%s18871_s3 + $0x1274] ss:$40 sps:$4 sm:$0xff]   ;;  %v13338_v38 = vld [vmem:[%s18871_s3 + $0x1270] ss:$40 sps:$4 sm:$0xff]   ;;  %v13346_v41 = vld [vmem:[%s18871_s3 + $0x12c4] ss:$40 sps:$4 sm:$0xff]  }
 0x2f5   :  { %9517 = vmatprep.mubr.bf16.mxu1 %v16746_v39 }
 0x2f6   :  { %9518 = vmatmul.mubr.bf16.vlgmr.msra.gmra.mrb[8].mxu1 %v16754_v20 }
 0x2f7   :  { %9527 = vmatpush1.bf16.msra.mxu1 %v13272_v40  ;;  %4761 = vmatpush1.bf16.msra.mxu0 %v13275_v25  ;;  %v13341_v40 = vld [vmem:[%s18871_s3 + $0x288] ss:$40 sps:$4 sm:$0xff]   ;;  %v14291_v25 = vpop.eup %14290 }
 0x2f8   :  { %9528 = vmatprep.subr.bf16.mxu1 %v13280_v42  ;;  %4762 = vmatprep.subr.bf16.mxu0 %v13283_v13  ;;  %v13349_v42 = vld [vmem:[%s18871_s3 + $0x2dc] ss:$40 sps:$4 sm:$0xff]   ;;  %v4811_v13 = vadd.f32 1.0, %v14291_v25 }
 0x2f9   :  { %9558 = vmatprep.mubr.bf16.mxu1 %v16762_v48  ;;  %v13505_v25 = vld [vmem:[%s18871_s3 + $0x1544] ss:$40 sps:$4 sm:$0xff]  }
 0x2fa   :  { %14292 = vrcp.f32 %v4811_v13  ;;  %v13403_v13 = vld [vmem:[%s18871_s3 + $0x78c] ss:$40 sps:$4 sm:$0xff]  }
 0x2fb   :  { %9529 = vmatpush1.bf16.msra.mxu1 %v13278_v45  ;;  %4763 = vmatpush1.bf16.msra.mxu0 %v13281_v47  ;;  %v13344_v45 = vld [vmem:[%s18871_s3 + $0x12c0] ss:$40 sps:$4 sm:$0xff]  }
 0x2fc   :  { %9530 = vmatprep.subr.bf16.mxu1 %v13286_v50  ;;  %4764 = vmatprep.subr.bf16.mxu0 %v13289_v51  ;;  %v13347_v47 = vld [vmem:[%s18871_s3 + $0x2d8] ss:$40 sps:$4 sm:$0xff]   ;;  %v13352_v50 = vld [vmem:[%s18871_s3 + $0x1314] ss:$40 sps:$4 sm:$0xff]  }
 0x2fd   :  { %v13355_v51 = vld [vmem:[%s18871_s3 + $0x32c] ss:$40 sps:$4 sm:$0xff]  }
 0x2ff   :  { %9531 = vmatpush1.bf16.msra.mxu1 %v13284_v53  ;;  %4765 = vmatpush1.bf16.msra.mxu0 %v13287_v31  ;;  %v13350_v53 = vld [vmem:[%s18871_s3 + $0x1310] ss:$40 sps:$4 sm:$0xff]  }
 0x300   :  { %9532 = vmatprep.subr.bf16.mxu1 %v13292_v54  ;;  %9608 = vmatprep.subr.bf16.mxu0 %v13295_v57  ;;  %v13353_v31 = vld [vmem:[%s18871_s3 + $0x328] ss:$40 sps:$4 sm:$0xff]   ;;  %v13358_v54 = vld [vmem:[%s18871_s3 + $0x1364] ss:$40 sps:$4 sm:$0xff]  }
 0x301   :  { %v13361_v57 = vld [vmem:[%s18871_s3 + $0x37c] ss:$40 sps:$4 sm:$0xff]  }
 0x302   :  { %4767 = vmatmul.mubr.bf16.vlgmr.msra.gmra.mrb[8].mxu0 %v15222_v28  ;;  %v13307_v28 = vld [vmem:[%s18871_s3 + $0xac] ss:$40 sps:$4 sm:$0xff]  }
 0x303   :  { %9533 = vmatpush1.bf16.msra.mxu1 %v13290_v58  ;;  %9609 = vmatpush1.bf16.msra.mxu0 %v13293_v59  ;;  %v13356_v58 = vld [vmem:[%s18871_s3 + $0x1360] ss:$40 sps:$4 sm:$0xff]  }
 0x304   :  { %9640 = vmatprep.mubr.bf16.mxu0 %v16044_v35  ;;  %9534 = vmatprep.subr.bf16.mxu1 %v13298_v61  ;;  %v13359_v59 = vld [vmem:[%s18871_s3 + $0x378] ss:$40 sps:$4 sm:$0xff]   ;;  %v13364_v61 = vld [vmem:[%s18871_s3 + $0x13b4] ss:$40 sps:$4 sm:$0xff]  }
 0x305   :  { %9610 = vmatprep.subr.bf16.mxu0 %v13301_v63  ;;  %v13367_v63 = vld [vmem:[%s18871_s3 + $0x3cc] ss:$40 sps:$4 sm:$0xff]  }
 0x307   :  { %9535 = vmatpush1.bf16.msra.mxu1 %v13296_v0  ;;  %9611 = vmatpush1.bf16.msra.mxu0 %v13299_v1  ;;  %v13362_v0 = vld [vmem:[%s18871_s3 + $0x13b0] ss:$40 sps:$4 sm:$0xff]  }
 0x308   :  { %9536 = vmatprep.subr.bf16.mxu1 %v13304_v5  ;;  %9612 = vmatprep.subr.bf16.mxu0 %v13307_v28  ;;  %v13365_v1 = vld [vmem:[%s18871_s3 + $0x3c8] ss:$40 sps:$4 sm:$0xff]   ;;  %v13370_v5 = vld [vmem:[%s18871_s3 + $0x41c] ss:$40 sps:$4 sm:$0xff]   ;;  %v14293_v28 = vpop.eup %14292 }
 0x30b   :  { %9537 = vmatpush1.bf16.msra.mxu1 %v13302_v2  ;;  %9613 = vmatpush1.bf16.msra.mxu0 %v13305_v3  ;;  %v13368_v2 = vld [vmem:[%s18871_s3 + $0x418] ss:$40 sps:$4 sm:$0xff]   ;;  %v16955_v3 = vpack.c.bf16 %v14293_v28, %v14293_v28  ;;  %v13415_v28 = vld [vmem:[%s18871_s3 + $0x8cc] ss:$40 sps:$4 sm:$0xff]  }
 0x30c   :  { %9538 = vmatprep.subr.bf16.mxu1 %v13310_v30  ;;  %9614 = vmatprep.subr.bf16.mxu0 %v13313_v11  ;;  %v13373_v30 = vld [vmem:[%s18871_s3 + $0x46c] ss:$40 sps:$4 sm:$0xff]   ;;  %v13371_v11 = vld [vmem:[%s18871_s3 + $0x468] ss:$40 sps:$4 sm:$0xff]  }
 0x30f   :  { %9539 = vmatpush1.bf16.msra.mxu1 %v13308_v4  ;;  %9615 = vmatpush1.bf16.msra.mxu0 %v13311_v6  ;;  %v13374_v4 = vld [vmem:[%s18871_s3 + $0x4b8] ss:$40 sps:$4 sm:$0xff]   ;;  %v13379_v6 = vld [vmem:[%s18871_s3 + $0x50c] ss:$40 sps:$4 sm:$0xff]  }
 0x310   :  { %9540 = vmatprep.subr.bf16.mxu1 %v13316_v27  ;;  %9616 = vmatprep.subr.bf16.mxu0 %v13319_v49  ;;  %v13377_v27 = vld [vmem:[%s18871_s3 + $0x508] ss:$40 sps:$4 sm:$0xff]   ;;  %v13382_v49 = vld [vmem:[%s18871_s3 + $0x55c] ss:$40 sps:$4 sm:$0xff]  }
 0x313   :  { %9541 = vmatpush1.bf16.msra.mxu1 %v13314_v8  ;;  %9617 = vmatpush1.bf16.msra.mxu0 %v13317_v9  ;;  %v13385_v8 = vld [vmem:[%s18871_s3 + $0x5ac] ss:$40 sps:$4 sm:$0xff]   ;;  %v13383_v9 = vld [vmem:[%s18871_s3 + $0x5a8] ss:$40 sps:$4 sm:$0xff]  }
 0x314   :  { %9542 = vmatprep.subr.bf16.mxu1 %v13322_v12  ;;  %9618 = vmatprep.subr.bf16.mxu0 %v13325_v56  ;;  %v13479_v12 = vld [vmem:[%s18871_s3 + $0x1400] ss:$40 sps:$4 sm:$0xff]   ;;  %v13481_v56 = vld [vmem:[%s18871_s3 + $0x1404] ss:$40 sps:$4 sm:$0xff]  }
 0x317   :  { %9543 = vmatpush1.bf16.msra.mxu1 %v13320_v17  ;;  %9619 = vmatpush1.bf16.msra.mxu0 %v13323_v22  ;;  %v13386_v17 = vld [vmem:[%s18871_s3 + $0x5f8] ss:$40 sps:$4 sm:$0xff]  }
 0x318   :  { %9544 = vmatprep.subr.bf16.mxu1 %v13328_v23  ;;  %9620 = vmatprep.subr.bf16.mxu0 %v13331_v29  ;;  %v13485_v22 = vld [vmem:[%s18871_s3 + $0x1450] ss:$40 sps:$4 sm:$0xff]   ;;  %v13487_v23 = vld [vmem:[%s18871_s3 + $0x1454] ss:$40 sps:$4 sm:$0xff]  }
 0x319   :  { %v13391_v29 = vld [vmem:[%s18871_s3 + $0x64c] ss:$40 sps:$4 sm:$0xff]  }
 0x31b   :  { %9545 = vmatpush1.bf16.msra.mxu1 %v13326_v32  ;;  %9621 = vmatpush1.bf16.msra.mxu0 %v13329_v21  ;;  %v13389_v32 = vld [vmem:[%s18871_s3 + $0x648] ss:$40 sps:$4 sm:$0xff]  }
 0x31c   :  { %9546 = vmatprep.subr.bf16.mxu1 %v13334_v33  ;;  %9622 = vmatprep.subr.bf16.mxu0 %v13337_v10  ;;  %v13491_v21 = vld [vmem:[%s18871_s3 + $0x14a0] ss:$40 sps:$4 sm:$0xff]   ;;  %v13493_v33 = vld [vmem:[%s18871_s3 + $0x14a4] ss:$40 sps:$4 sm:$0xff]  }
 0x31d   :  { %v13394_v10 = vld [vmem:[%s18871_s3 + $0x69c] ss:$40 sps:$4 sm:$0xff]  }
 0x31f   :  { %9547 = vmatpush1.bf16.msra.mxu1 %v13332_v34  ;;  %9623 = vmatpush1.bf16.msra.mxu0 %v13335_v36  ;;  %v13392_v34 = vld [vmem:[%s18871_s3 + $0x698] ss:$40 sps:$4 sm:$0xff]   ;;  %v13397_v36 = vld [vmem:[%s18871_s3 + $0x6ec] ss:$40 sps:$4 sm:$0xff]  }
 0x320   :  { %9548 = vmatprep.subr.bf16.mxu1 %v13340_v37  ;;  %9624 = vmatprep.subr.bf16.mxu0 %v13343_v15  ;;  %v13499_v37 = vld [vmem:[%s18871_s3 + $0x14f4] ss:$40 sps:$4 sm:$0xff]   ;;  %v13497_v15 = vld [vmem:[%s18871_s3 + $0x14f0] ss:$40 sps:$4 sm:$0xff]  }
 0x323   :  { %9549 = vmatpush1.bf16.msra.mxu1 %v13338_v38  ;;  %9625 = vmatpush1.bf16.msra.mxu0 %v13341_v40  ;;  %v13395_v38 = vld [vmem:[%s18871_s3 + $0x6e8] ss:$40 sps:$4 sm:$0xff]   ;;  %v13400_v40 = vld [vmem:[%s18871_s3 + $0x73c] ss:$40 sps:$4 sm:$0xff]  }
 0x324   :  { %9550 = vmatprep.subr.bf16.mxu1 %v13346_v41  ;;  %9626 = vmatprep.subr.bf16.mxu0 %v13349_v42  ;;  %v13503_v41 = vld [vmem:[%s18871_s3 + $0x1540] ss:$40 sps:$4 sm:$0xff]  }
 0x325   :  { %v13398_v42 = vld [vmem:[%s18871_s3 + $0x738] ss:$40 sps:$4 sm:$0xff]  }
 0x327   :  { %9551 = vmatpush1.bf16.msra.mxu1 %v13344_v45  ;;  %9627 = vmatpush1.bf16.msra.mxu0 %v13347_v47  ;;  %v13511_v45 = vld [vmem:[%s18871_s3 + $0x1594] ss:$40 sps:$4 sm:$0xff]   ;;  %v13509_v47 = vld [vmem:[%s18871_s3 + $0x1590] ss:$40 sps:$4 sm:$0xff]  }
 0x328   :  { %9552 = vmatprep.subr.bf16.mxu1 %v13352_v50  ;;  %9628 = vmatprep.subr.bf16.mxu0 %v13355_v51  ;;  %v13401_v50 = vld [vmem:[%s18871_s3 + $0x788] ss:$40 sps:$4 sm:$0xff]   ;;  %v13406_v51 = vld [vmem:[%s18871_s3 + $0x7dc] ss:$40 sps:$4 sm:$0xff]  }
 0x32b   :  { %9553 = vmatpush1.bf16.msra.mxu1 %v13350_v53  ;;  %9629 = vmatpush1.bf16.msra.mxu0 %v13353_v31  ;;  %v13517_v53 = vld [vmem:[%s18871_s3 + $0x15e4] ss:$40 sps:$4 sm:$0xff]   ;;  %v13515_v31 = vld [vmem:[%s18871_s3 + $0x15e0] ss:$40 sps:$4 sm:$0xff]  }
 0x32c   :  { %9554 = vmatprep.subr.bf16.mxu1 %v13358_v54  ;;  %9630 = vmatprep.subr.bf16.mxu0 %v13361_v57  ;;  %v13404_v54 = vld [vmem:[%s18871_s3 + $0x7d8] ss:$40 sps:$4 sm:$0xff]   ;;  %v13409_v57 = vld [vmem:[%s18871_s3 + $0x82c] ss:$40 sps:$4 sm:$0xff]  }
 0x32f   :  { %9555 = vmatpush1.bf16.msra.mxu1 %v13356_v58  ;;  %9631 = vmatpush1.bf16.msra.mxu0 %v13359_v59  ;;  %v13523_v58 = vld [vmem:[%s18871_s3 + $0x1634] ss:$40 sps:$4 sm:$0xff]   ;;  %v13521_v59 = vld [vmem:[%s18871_s3 + $0x1630] ss:$40 sps:$4 sm:$0xff]  }
 0x330   :  { %9556 = vmatprep.subr.bf16.mxu1 %v13364_v61  ;;  %9632 = vmatprep.subr.bf16.mxu0 %v13367_v63  ;;  %v13407_v61 = vld [vmem:[%s18871_s3 + $0x828] ss:$40 sps:$4 sm:$0xff]   ;;  %v13412_v63 = vld [vmem:[%s18871_s3 + $0x87c] ss:$40 sps:$4 sm:$0xff]  }
 0x333   :  { %9557 = vmatpush1.bf16.msra.mxu1 %v13362_v0  ;;  %9633 = vmatpush1.bf16.msra.mxu0 %v13365_v1  ;;  %v13529_v0 = vld [vmem:[%s18871_s3 + $0x1684] ss:$40 sps:$4 sm:$0xff]   ;;  %v13527_v1 = vld [vmem:[%s18871_s3 + $0x1680] ss:$40 sps:$4 sm:$0xff]  }
 0x334   :  { %9634 = vmatprep.subr.bf16.mxu0 %v13370_v5  ;;  %9567 = vmatprep.subr.bf16.mxu1 %v13481_v56  ;;  %v13410_v5 = vld [vmem:[%s18871_s3 + $0x878] ss:$40 sps:$4 sm:$0xff]   ;;  %v13427_v56 = vld [vmem:[%s18871_s3 + $0xa0c] ss:$40 sps:$4 sm:$0xff]  }
 0x336   :  { %9559 = vmatmul.mubr.bf16.vlgmr.msra.gmra.mrb[8].mxu1 %v16955_v3 }
 0x337   :  { %9635 = vmatpush1.bf16.msra.mxu0 %v13368_v2  ;;  %9568 = vmatpush1.bf16.msra.mxu1 %v13479_v12  ;;  %v13535_v2 = vld [vmem:[%s18871_s3 + $0x16d4] ss:$40 sps:$4 sm:$0xff]   ;;  %v13422_v12 = vld [vmem:[%s18871_s3 + $0x9b8] ss:$40 sps:$4 sm:$0xff]  }
 0x338   :  { %9636 = vmatprep.subr.bf16.mxu0 %v13373_v30  ;;  %9569 = vmatprep.subr.bf16.mxu1 %v13487_v23  ;;  %v13533_v30 = vld [vmem:[%s18871_s3 + $0x16d0] ss:$40 sps:$4 sm:$0xff]   ;;  %v13433_v23 = vld [vmem:[%s18871_s3 + $0xaac] ss:$40 sps:$4 sm:$0xff]  }
 0x33b   :  { %9637 = vmatpush1.bf16.msra.mxu0 %v13371_v11  ;;  %9570 = vmatpush1.bf16.msra.mxu1 %v13485_v22  ;;  %v13413_v11 = vld [vmem:[%s18871_s3 + $0x8c8] ss:$40 sps:$4 sm:$0xff]   ;;  %v13428_v22 = vld [vmem:[%s18871_s3 + $0xa58] ss:$40 sps:$4 sm:$0xff]  }
 0x33c   :  { %9638 = vmatprep.subr.bf16.mxu0 %v13376_v24  ;;  %9571 = vmatprep.subr.bf16.mxu1 %v13493_v33  ;;  %v13418_v24 = vld [vmem:[%s18871_s3 + $0x91c] ss:$40 sps:$4 sm:$0xff]   ;;  %v13439_v33 = vld [vmem:[%s18871_s3 + $0xb4c] ss:$40 sps:$4 sm:$0xff]  }
 0x33f   :  { %9639 = vmatpush1.bf16.msra.mxu0 %v13374_v4  ;;  %9572 = vmatpush1.bf16.msra.mxu1 %v13491_v21  ;;  %v13541_v4 = vld [vmem:[%s18871_s3 + $0x1724] ss:$40 sps:$4 sm:$0xff]   ;;  %v13434_v21 = vld [vmem:[%s18871_s3 + $0xaf8] ss:$40 sps:$4 sm:$0xff]  }
 0x340   :  { %9649 = vmatprep.subr.bf16.mxu0 %v13379_v6  ;;  %9573 = vmatprep.subr.bf16.mxu1 %v13499_v37  ;;  %v13539_v6 = vld [vmem:[%s18871_s3 + $0x1720] ss:$40 sps:$4 sm:$0xff]   ;;  %v13445_v37 = vld [vmem:[%s18871_s3 + $0xbec] ss:$40 sps:$4 sm:$0xff]  }
 0x342   :  { %9641 = vmatmul.mubr.bf16.vlgmr.msra.gmra.mrb[12].mxu0 %v16245_v60 }
 0x343   :  { %9650 = vmatpush1.bf16.msra.mxu0 %v13377_v27  ;;  %9681 = vmatprep.mubr.bf16.mxu0 %v16250_v62  ;;  %v13416_v27 = vld [vmem:[%s18871_s3 + $0x918] ss:$40 sps:$4 sm:$0xff]  }
 0x344   :  { %9651 = vmatprep.subr.bf16.mxu0 %v13382_v49  ;;  %9574 = vmatpush1.bf16.msra.mxu1 %v13497_v15  ;;  %v13421_v49 = vld [vmem:[%s18871_s3 + $0x96c] ss:$40 sps:$4 sm:$0xff]   ;;  %v13443_v15 = vld [vmem:[%s18871_s3 + $0xbe8] ss:$40 sps:$4 sm:$0xff]  }
 0x345   :  { %9575 = vmatprep.subr.bf16.mxu1 %v13505_v25  ;;  %v13451_v25 = vld [vmem:[%s18871_s3 + $0xc8c] ss:$40 sps:$4 sm:$0xff]  }
 0x347   :  { %9652 = vmatpush1.bf16.msra.mxu0 %v13380_v7  ;;  %v13547_v7 = vld [vmem:[%s18871_s3 + $0x14] ss:$40 sps:$4 sm:$0xff]  }
 0x348   :  { %9653 = vmatprep.subr.bf16.mxu0 %v13385_v8  ;;  %9576 = vmatpush1.bf16.msra.mxu1 %v13503_v41  ;;  %v13419_v8 = vld [vmem:[%s18871_s3 + $0x968] ss:$40 sps:$4 sm:$0xff]  }
 0x349   :  { %9577 = vmatprep.subr.bf16.mxu1 %v13511_v45  ;;  %v13449_v41 = vld [vmem:[%s18871_s3 + $0xc88] ss:$40 sps:$4 sm:$0xff]   ;;  %v13457_v45 = vld [vmem:[%s18871_s3 + $0xd2c] ss:$40 sps:$4 sm:$0xff]  }
 0x34b   :  { %9654 = vmatpush1.bf16.msra.mxu0 %v13383_v9  ;;  %v13424_v9 = vld [vmem:[%s18871_s3 + $0x9bc] ss:$40 sps:$4 sm:$0xff]  }
 0x34c   :  { %9655 = vmatprep.subr.bf16.mxu0 %v13388_v14  ;;  %9578 = vmatpush1.bf16.msra.mxu1 %v13509_v47  ;;  %v13425_v14 = vld [vmem:[%s18871_s3 + $0xa08] ss:$40 sps:$4 sm:$0xff]  }
 0x34d   :  { %9579 = vmatprep.subr.bf16.mxu1 %v13517_v53  ;;  %v13455_v47 = vld [vmem:[%s18871_s3 + $0xd28] ss:$40 sps:$4 sm:$0xff]   ;;  %v13463_v53 = vld [vmem:[%s18871_s3 + $0xdcc] ss:$40 sps:$4 sm:$0xff]  }
 0x34f   :  { %9656 = vmatpush1.bf16.msra.mxu0 %v13386_v17  ;;  %v13430_v17 = vld [vmem:[%s18871_s3 + $0xa5c] ss:$40 sps:$4 sm:$0xff]  }
 0x350   :  { %9657 = vmatprep.subr.bf16.mxu0 %v13391_v29  ;;  %9580 = vmatpush1.bf16.msra.mxu1 %v13515_v31  ;;  %v13431_v29 = vld [vmem:[%s18871_s3 + $0xaa8] ss:$40 sps:$4 sm:$0xff]  }
 0x351   :  { %9581 = vmatprep.subr.bf16.mxu1 %v13523_v58  ;;  %v13461_v31 = vld [vmem:[%s18871_s3 + $0xdc8] ss:$40 sps:$4 sm:$0xff]   ;;  %v13469_v58 = vld [vmem:[%s18871_s3 + $0xe6c] ss:$40 sps:$4 sm:$0xff]  }
 0x353   :  { %9658 = vmatpush1.bf16.msra.mxu0 %v13389_v32  ;;  %v13436_v32 = vld [vmem:[%s18871_s3 + $0xafc] ss:$40 sps:$4 sm:$0xff]  }
 0x354   :  { %9659 = vmatprep.subr.bf16.mxu0 %v13394_v10  ;;  %9582 = vmatpush1.bf16.msra.mxu1 %v13521_v59  ;;  %v13437_v10 = vld [vmem:[%s18871_s3 + $0xb48] ss:$40 sps:$4 sm:$0xff]  }
 0x355   :  { %9583 = vmatprep.subr.bf16.mxu1 %v13529_v0  ;;  %v13467_v59 = vld [vmem:[%s18871_s3 + $0xe68] ss:$40 sps:$4 sm:$0xff]   ;;  %v13475_v0 = vld [vmem:[%s18871_s3 + $0xf0c] ss:$40 sps:$4 sm:$0xff]  }
 0x357   :  { %9660 = vmatpush1.bf16.msra.mxu0 %v13392_v34  ;;  %v13442_v34 = vld [vmem:[%s18871_s3 + $0xb9c] ss:$40 sps:$4 sm:$0xff]  }
 0x358   :  { %9661 = vmatprep.subr.bf16.mxu0 %v13397_v36  ;;  %9584 = vmatpush1.bf16.msra.mxu1 %v13527_v1  ;;  %v13440_v36 = vld [vmem:[%s18871_s3 + $0xb98] ss:$40 sps:$4 sm:$0xff]   ;;  %v13473_v1 = vld [vmem:[%s18871_s3 + $0xf08] ss:$40 sps:$4 sm:$0xff]  }
 0x359   :  { %9585 = vmatprep.subr.bf16.mxu1 %v13535_v2  ;;  %v13484_v2 = vld [vmem:[%s18871_s3 + $0xfac] ss:$40 sps:$4 sm:$0xff]  }
 0x35b   :  { %9662 = vmatpush1.bf16.msra.mxu0 %v13395_v38  ;;  %v13448_v38 = vld [vmem:[%s18871_s3 + $0xc3c] ss:$40 sps:$4 sm:$0xff]  }
 0x35c   :  { %9663 = vmatprep.subr.bf16.mxu0 %v13400_v40  ;;  %9586 = vmatpush1.bf16.msra.mxu1 %v13533_v30  ;;  %v13446_v40 = vld [vmem:[%s18871_s3 + $0xc38] ss:$40 sps:$4 sm:$0xff]   ;;  %v13482_v30 = vld [vmem:[%s18871_s3 + $0xfa8] ss:$40 sps:$4 sm:$0xff]  }
 0x35d   :  { %9587 = vmatprep.subr.bf16.mxu1 %v13541_v4  ;;  %v13496_v4 = vld [vmem:[%s18871_s3 + $0x104c] ss:$40 sps:$4 sm:$0xff]  }
 0x35f   :  { %9664 = vmatpush1.bf16.msra.mxu0 %v13398_v42  ;;  %v13454_v42 = vld [vmem:[%s18871_s3 + $0xcdc] ss:$40 sps:$4 sm:$0xff]  }
 0x360   :  { %9665 = vmatprep.subr.bf16.mxu0 %v13403_v13  ;;  %9588 = vmatpush1.bf16.msra.mxu1 %v13539_v6  ;;  %v13452_v13 = vld [vmem:[%s18871_s3 + $0xcd8] ss:$40 sps:$4 sm:$0xff]   ;;  %v13494_v6 = vld [vmem:[%s18871_s3 + $0x1048] ss:$40 sps:$4 sm:$0xff]  }
 0x361   :  { %9813 = vmatprep.subr.bf16.mxu1 %v13547_v7 }
 0x363   :  { %9666 = vmatpush1.bf16.msra.mxu0 %v13401_v50  ;;  %v13460_v50 = vld [vmem:[%s18871_s3 + $0xd7c] ss:$40 sps:$4 sm:$0xff]  }
 0x364   :  { %9667 = vmatprep.subr.bf16.mxu0 %v13406_v51  ;;  %v13458_v51 = vld [vmem:[%s18871_s3 + $0xd78] ss:$40 sps:$4 sm:$0xff]  }
 0x367   :  { %9668 = vmatpush1.bf16.msra.mxu0 %v13404_v54  ;;  %v13466_v54 = vld [vmem:[%s18871_s3 + $0xe1c] ss:$40 sps:$4 sm:$0xff]  }
 0x368   :  { %9669 = vmatprep.subr.bf16.mxu0 %v13409_v57  ;;  %v13464_v57 = vld [vmem:[%s18871_s3 + $0xe18] ss:$40 sps:$4 sm:$0xff]  }
 0x36b   :  { %9670 = vmatpush1.bf16.msra.mxu0 %v13407_v61  ;;  %v13472_v61 = vld [vmem:[%s18871_s3 + $0xebc] ss:$40 sps:$4 sm:$0xff]  }
 0x36c   :  { %9671 = vmatprep.subr.bf16.mxu0 %v13412_v63  ;;  %v13470_v63 = vld [vmem:[%s18871_s3 + $0xeb8] ss:$40 sps:$4 sm:$0xff]  }
 0x36f   :  { %9672 = vmatpush1.bf16.msra.mxu0 %v13410_v5  ;;  %v13478_v5 = vld [vmem:[%s18871_s3 + $0xf5c] ss:$40 sps:$4 sm:$0xff]  }
 0x370   :  { %9673 = vmatprep.subr.bf16.mxu0 %v13415_v28  ;;  %v13476_v28 = vld [vmem:[%s18871_s3 + $0xf58] ss:$40 sps:$4 sm:$0xff]  }
 0x373   :  { %9674 = vmatpush1.bf16.msra.mxu0 %v13413_v11  ;;  %v13490_v11 = vld [vmem:[%s18871_s3 + $0xffc] ss:$40 sps:$4 sm:$0xff]  }
 0x374   :  { %9675 = vmatprep.subr.bf16.mxu0 %v13418_v24  ;;  %v13488_v24 = vld [vmem:[%s18871_s3 + $0xff8] ss:$40 sps:$4 sm:$0xff]  }
 0x377   :  { %9676 = vmatpush1.bf16.msra.mxu0 %v13416_v27  ;;  %v674_v27 = vld [vmem:[%s18872_s2 + $0x8] sm:$0x3] }
 0x378   :  { %9677 = vmatprep.subr.bf16.mxu0 %v13421_v49  ;;  %v13502_v49 = vld [vmem:[%s18871_s3 + $0x109c] ss:$40 sps:$4 sm:$0xff]   ;;  %v712_v7 = vrot.slane %v674_v27, %v16099_v52 }
 0x37b   :  { %9678 = vmatpush1.bf16.msra.mxu0 %v13419_v8  ;;  %v716_v8 = vrot.slane %v674_v27, %v15890_v19  ;;  %v13563_v27 = vld [vmem:[%s18871_s3 + $0x100] ss:$40 sps:$4 sm:$0xff]  }
 0x37c   :  { %9679 = vmatprep.subr.bf16.mxu0 %v13424_v9  ;;  %v13500_v9 = vld [vmem:[%s18871_s3 + $0x1098] ss:$40 sps:$4 sm:$0xff]  }
 0x37f   :  { %9680 = vmatpush1.bf16.msra.mxu0 %v13422_v12  ;;  %v13508_v12 = vld [vmem:[%s18871_s3 + $0x10ec] ss:$40 sps:$4 sm:$0xff]  }
 0x380   :  { %9690 = vmatprep.subr.bf16.mxu0 %v13427_v56 }
 0x382   :  { %9682 = vmatmul.mubr.bf16.vlgmr.msra.gmra.mrb[12].mxu0 %v16459_v26 }
 0x383   :  { %9691 = vmatpush1.bf16.msra.mxu0 %v13425_v14  ;;  %9722 = vmatprep.mubr.bf16.mxu0 %v16746_v39 }
 0x384   :  { %9692 = vmatprep.subr.bf16.mxu0 %v13430_v17 }
 0x387   :  { %9693 = vmatpush1.bf16.msra.mxu0 %v13428_v22 }
 0x388   :  { %9694 = vmatprep.subr.bf16.mxu0 %v13433_v23 }
 0x38b   :  { %9695 = vmatpush1.bf16.msra.mxu0 %v13431_v29  ;;  %v13506_v29 = vld [vmem:[%s18871_s3 + $0x10e8] ss:$40 sps:$4 sm:$0xff]  }
 0x38c   :  { %9696 = vmatprep.subr.bf16.mxu0 %v13436_v32 }
 0x38f   :  { %9697 = vmatpush1.bf16.msra.mxu0 %v13434_v21 }
 0x390   :  { %9698 = vmatprep.subr.bf16.mxu0 %v13439_v33  ;;  %v13514_v33 = vld [vmem:[%s18871_s3 + $0x113c] ss:$40 sps:$4 sm:$0xff]  }
 0x393   :  { %9699 = vmatpush1.bf16.msra.mxu0 %v13437_v10 }
 0x394   :  { %9700 = vmatprep.subr.bf16.mxu0 %v13442_v34  ;;  %v13512_v34 = vld [vmem:[%s18871_s3 + $0x1138] ss:$40 sps:$4 sm:$0xff]  }
 0x397   :  { %9701 = vmatpush1.bf16.msra.mxu0 %v13440_v36  ;;  %v13520_v36 = vld [vmem:[%s18871_s3 + $0x118c] ss:$40 sps:$4 sm:$0xff]  }
 0x398   :  { %9702 = vmatprep.subr.bf16.mxu0 %v13445_v37  ;;  %v13518_v37 = vld [vmem:[%s18871_s3 + $0x1188] ss:$40 sps:$4 sm:$0xff]  }
 0x39b   :  { %9703 = vmatpush1.bf16.msra.mxu0 %v13443_v15  ;;  %v13526_v15 = vld [vmem:[%s18871_s3 + $0x11dc] ss:$40 sps:$4 sm:$0xff]  }
 0x39c   :  { %9704 = vmatprep.subr.bf16.mxu0 %v13448_v38  ;;  %v13524_v38 = vld [vmem:[%s18871_s3 + $0x11d8] ss:$40 sps:$4 sm:$0xff]  }
 0x39f   :  { %9705 = vmatpush1.bf16.msra.mxu0 %v13446_v40 }
 0x3a0   :  { %9706 = vmatprep.subr.bf16.mxu0 %v13451_v25  ;;  %v13532_v25 = vld [vmem:[%s18871_s3 + $0x122c] ss:$40 sps:$4 sm:$0xff]  }
 0x3a3   :  { %9707 = vmatpush1.bf16.msra.mxu0 %v13449_v41 }
 0x3a4   :  { %9708 = vmatprep.subr.bf16.mxu0 %v13454_v42 }
 0x3a7   :  { %9709 = vmatpush1.bf16.msra.mxu0 %v13452_v13 }
 0x3a8   :  { %9710 = vmatprep.subr.bf16.mxu0 %v13457_v45  ;;  %v13530_v45 = vld [vmem:[%s18871_s3 + $0x1228] ss:$40 sps:$4 sm:$0xff]  }
 0x3ab   :  { %9711 = vmatpush1.bf16.msra.mxu0 %v13455_v47  ;;  %v13538_v47 = vld [vmem:[%s18871_s3 + $0x127c] ss:$40 sps:$4 sm:$0xff]  }
 0x3ac   :  { %9712 = vmatprep.subr.bf16.mxu0 %v13460_v50  ;;  %v13536_v50 = vld [vmem:[%s18871_s3 + $0x1278] ss:$40 sps:$4 sm:$0xff]  }
 0x3af   :  { %9713 = vmatpush1.bf16.msra.mxu0 %v13458_v51  ;;  %v13544_v51 = vld [vmem:[%s18871_s3 + $0x12cc] ss:$40 sps:$4 sm:$0xff]  }
 0x3b0   :  { %9714 = vmatprep.subr.bf16.mxu0 %v13463_v53  ;;  %v13542_v53 = vld [vmem:[%s18871_s3 + $0x12c8] ss:$40 sps:$4 sm:$0xff]  }
 0x3b3   :  { %9715 = vmatpush1.bf16.msra.mxu0 %v13461_v31  ;;  %v13550_v31 = vld [vmem:[%s18871_s3 + $0x131c] ss:$40 sps:$4 sm:$0xff]  }
 0x3b4   :  { %9716 = vmatprep.subr.bf16.mxu0 %v13466_v54 }
 0x3b7   :  { %9717 = vmatpush1.bf16.msra.mxu0 %v13464_v57 }
 0x3b8   :  { %9718 = vmatprep.subr.bf16.mxu0 %v13469_v58 }
 0x3bb   :  { %9719 = vmatpush1.bf16.msra.mxu0 %v13467_v59  ;;  %v13545_v59 = vld [vmem:[%s18871_s3 + $0x10] ss:$40 sps:$4 sm:$0xff]  }
 0x3bc   :  { %9720 = vmatprep.subr.bf16.mxu0 %v13472_v61  ;;  %v13548_v61 = vld [vmem:[%s18871_s3 + $0x1318] ss:$40 sps:$4 sm:$0xff]  }
 0x3bf   :  { %9721 = vmatpush1.bf16.msra.mxu0 %v13470_v63 }
 0x3c0   :  { %9731 = vmatprep.subr.bf16.mxu0 %v13475_v0  ;;  %v13553_v0 = vld [vmem:[%s18871_s3 + $0x64] ss:$40 sps:$4 sm:$0xff]  }
 0x3c2   :  { %9723 = vmatmul.mubr.bf16.vlgmr.msra.gmra.mrb[12].mxu0 %v16754_v20 }
 0x3c3   :  { %9732 = vmatpush1.bf16.msra.mxu0 %v13473_v1  ;;  %9763 = vmatprep.mubr.bf16.mxu0 %v16762_v48  ;;  %v13556_v1 = vld [vmem:[%s18871_s3 + $0x136c] ss:$40 sps:$4 sm:$0xff]  }
 0x3c4   :  { %9733 = vmatprep.subr.bf16.mxu0 %v13478_v5  ;;  %v13551_v5 = vld [vmem:[%s18871_s3 + $0x60] ss:$40 sps:$4 sm:$0xff]  }
 0x3c7   :  { %9734 = vmatpush1.bf16.msra.mxu0 %v13476_v28  ;;  %v13554_v28 = vld [vmem:[%s18871_s3 + $0x1368] ss:$40 sps:$4 sm:$0xff]  }
 0x3c8   :  { %9735 = vmatprep.subr.bf16.mxu0 %v13484_v2  ;;  %v13559_v2 = vld [vmem:[%s18871_s3 + $0xb4] ss:$40 sps:$4 sm:$0xff]  }
 0x3cb   :  { %9736 = vmatpush1.bf16.msra.mxu0 %v13482_v30  ;;  %v13562_v30 = vld [vmem:[%s18871_s3 + $0x13bc] ss:$40 sps:$4 sm:$0xff]  }
 0x3cc   :  { %9737 = vmatprep.subr.bf16.mxu0 %v13490_v11  ;;  %v13557_v11 = vld [vmem:[%s18871_s3 + $0xb0] ss:$40 sps:$4 sm:$0xff]  }
 0x3cf   :  { %9738 = vmatpush1.bf16.msra.mxu0 %v13488_v24  ;;  %v13560_v24 = vld [vmem:[%s18871_s3 + $0x13b8] ss:$40 sps:$4 sm:$0xff]  }
 0x3d0   :  { %9739 = vmatprep.subr.bf16.mxu0 %v13496_v4  ;;  %v13565_v4 = vld [vmem:[%s18871_s3 + $0x104] ss:$40 sps:$4 sm:$0xff]  }
 0x3d3   :  { %9740 = vmatpush1.bf16.msra.mxu0 %v13494_v6  ;;  %v13568_v6 = vld [vmem:[%s18871_s3 + $0x140c] ss:$40 sps:$4 sm:$0xff]  }
 0x3d4   :  { %9741 = vmatprep.subr.bf16.mxu0 %v13502_v49  ;;  %v13566_v49 = vld [vmem:[%s18871_s3 + $0x1408] ss:$40 sps:$4 sm:$0xff]  }
 0x3d5   :  { %v4768_v56 = vpop.f32.mrb[8].mxu0 }
 0x3d6   :  { %v12017_v14 = vadd.f32 %v4768_v56, %v712_v7  ;;  %v4770_v17 = vpop.f32.mrb[9].mxu0  ;;  %v13571_v7 = vld [vmem:[%s18871_s3 + $0x154] ss:$40 sps:$4 sm:$0xff]   ;;  %v13577_v56 = vld [vmem:[%s18871_s3 + $0x1a4] ss:$40 sps:$4 sm:$0xff]  }
 0x3d7   :  { %v12018_v22 = vadd.f32 %v4770_v17, %v716_v8  ;;  %v4772_v23 = vpop.f32.mrb[10].mxu0  ;;  %9742 = vmatpush1.bf16.msra.mxu0 %v13500_v9  ;;  %v13574_v8 = vld [vmem:[%s18871_s3 + $0x145c] ss:$40 sps:$4 sm:$0xff]   ;;  %v13569_v9 = vld [vmem:[%s18871_s3 + $0x150] ss:$40 sps:$4 sm:$0xff]  }
 0x3d8   :  { %v11240_v32 = vmul.f32 -1.442695, %v12017_v14  ;;  %v4773_v21 = vpop.f32.mrb[11].mxu0  ;;  %9743 = vmatprep.subr.bf16.mxu0 %v13508_v12  ;;  %v13572_v12 = vld [vmem:[%s18871_s3 + $0x1458] ss:$40 sps:$4 sm:$0xff]  }
 0x3d9   :  { %v11241_v10 = vmul.f32 -1.442695, %v12018_v22  ;;  %v13580_v14 = vld [vmem:[%s18871_s3 + $0x14ac] ss:$40 sps:$4 sm:$0xff]   ;;  %v13575_v17 = vld [vmem:[%s18871_s3 + $0x1a0] ss:$40 sps:$4 sm:$0xff]  }
 0x3da   :  { %14294 = vpow2.f32 %v11240_v32  ;;  %v13578_v22 = vld [vmem:[%s18871_s3 + $0x14a8] ss:$40 sps:$4 sm:$0xff]   ;;  %v13583_v23 = vld [vmem:[%s18871_s3 + $0x1f4] ss:$40 sps:$4 sm:$0xff]   ;;  %v13584_v21 = vld [vmem:[%s18871_s3 + $0x14f8] ss:$40 sps:$4 sm:$0xff]  }
 0x3db   :  { %14296 = vpow2.f32 %v11241_v10  ;;  %9744 = vmatpush1.bf16.msra.mxu0 %v13506_v29  ;;  %v13586_v29 = vld [vmem:[%s18871_s3 + $0x14fc] ss:$40 sps:$4 sm:$0xff]   ;;  %v13581_v32 = vld [vmem:[%s18871_s3 + $0x1f0] ss:$40 sps:$4 sm:$0xff]   ;;  %v13592_v10 = vld [vmem:[%s18871_s3 + $0x154c] ss:$40 sps:$4 sm:$0xff]  }
 0x3dc   :  { %9745 = vmatprep.subr.bf16.mxu0 %v13514_v33  ;;  %v13589_v33 = vld [vmem:[%s18871_s3 + $0x244] ss:$40 sps:$4 sm:$0xff]  }
 0x3df   :  { %9746 = vmatpush1.bf16.msra.mxu0 %v13512_v34  ;;  %v13587_v34 = vld [vmem:[%s18871_s3 + $0x240] ss:$40 sps:$4 sm:$0xff]  }
 0x3e0   :  { %9747 = vmatprep.subr.bf16.mxu0 %v13520_v36  ;;  %v13590_v36 = vld [vmem:[%s18871_s3 + $0x1548] ss:$40 sps:$4 sm:$0xff]  }
 0x3e3   :  { %9748 = vmatpush1.bf16.msra.mxu0 %v13518_v37  ;;  %v13595_v37 = vld [vmem:[%s18871_s3 + $0x294] ss:$40 sps:$4 sm:$0xff]  }
 0x3e4   :  { %v14295_v40 = vpop.eup %14294  ;;  %9749 = vmatprep.subr.bf16.mxu0 %v13526_v15  ;;  %v13598_v15 = vld [vmem:[%s18871_s3 + $0x159c] ss:$40 sps:$4 sm:$0xff]  }
 0x3e5   :  { %v14297_v41 = vpop.eup %14296  ;;  %v4813_v42 = vadd.f32 1.0, %v14295_v40  ;;  %v13596_v40 = vld [vmem:[%s18871_s3 + $0x1598] ss:$40 sps:$4 sm:$0xff]  }
 0x3e6   :  { %v4814_v13 = vadd.f32 1.0, %v14297_v41  ;;  %v13604_v41 = vld [vmem:[%s18871_s3 + $0x15ec] ss:$40 sps:$4 sm:$0xff]  }
 0x3e7   :  { %14298 = vrcp.f32 %v4813_v42  ;;  %9750 = vmatpush1.bf16.msra.mxu0 %v13524_v38  ;;  %v13593_v38 = vld [vmem:[%s18871_s3 + $0x290] ss:$40 sps:$4 sm:$0xff]   ;;  %v13599_v42 = vld [vmem:[%s18871_s3 + $0x2e0] ss:$40 sps:$4 sm:$0xff]  }
 0x3e8   :  { %14300 = vrcp.f32 %v4814_v13  ;;  %9751 = vmatprep.subr.bf16.mxu0 %v13532_v25  ;;  %v13601_v25 = vld [vmem:[%s18871_s3 + $0x2e4] ss:$40 sps:$4 sm:$0xff]   ;;  %v13602_v13 = vld [vmem:[%s18871_s3 + $0x15e8] ss:$40 sps:$4 sm:$0xff]  }
 0x3eb   :  { %9752 = vmatpush1.bf16.msra.mxu0 %v13530_v45  ;;  %v13607_v45 = vld [vmem:[%s18871_s3 + $0x334] ss:$40 sps:$4 sm:$0xff]  }
 0x3ec   :  { %9753 = vmatprep.subr.bf16.mxu0 %v13538_v47  ;;  %v13610_v47 = vld [vmem:[%s18871_s3 + $0x163c] ss:$40 sps:$4 sm:$0xff]  }
 0x3ef   :  { %9754 = vmatpush1.bf16.msra.mxu0 %v13536_v50  ;;  %v13605_v50 = vld [vmem:[%s18871_s3 + $0x330] ss:$40 sps:$4 sm:$0xff]  }
 0x3f0   :  { %9755 = vmatprep.subr.bf16.mxu0 %v13544_v51  ;;  %v13608_v51 = vld [vmem:[%s18871_s3 + $0x1638] ss:$40 sps:$4 sm:$0xff]  }
 0x3f1   :  { %v14299_v54 = vpop.eup %14298 }
 0x3f2   :  { %v14301_v57 = vpop.eup %14300  ;;  %v17331_v63 = vpack.c.bf16 %v14299_v54, %v14299_v54  ;;  %v13611_v54 = vld [vmem:[%s18871_s3 + $0x380] ss:$40 sps:$4 sm:$0xff]  }
 0x3f3   :  { %v17323_v58 = vpack.c.bf16 %v14301_v57, %v14301_v57  ;;  %9756 = vmatpush1.bf16.msra.mxu0 %v13542_v53  ;;  %v13613_v53 = vld [vmem:[%s18871_s3 + $0x384] ss:$40 sps:$4 sm:$0xff]   ;;  %v13614_v57 = vld [vmem:[%s18871_s3 + $0x1688] ss:$40 sps:$4 sm:$0xff]  }
 0x3f4   :  { %9757 = vmatprep.subr.bf16.mxu0 %v13550_v31  ;;  %v13616_v31 = vld [vmem:[%s18871_s3 + $0x168c] ss:$40 sps:$4 sm:$0xff]  }
 0x3f5   :  { %11992 = vmatprep.mubr.msk.bf16.mxu1 %vm9399_vm0, %v17323_v58 }
 0x3f6   :  { %9600 = vmatmul.mubr.bf16.vlgmr.msra.gmra.mrb[8].mxu1 %v17331_v63 }
 0x3f7   :  { %9814 = vmatpush1.bf16.msra.mxu1 %v13545_v59  ;;  %9758 = vmatpush1.bf16.msra.mxu0 %v13548_v61  ;;  %v13619_v59 = vld [vmem:[%s18871_s3 + $0x3d4] ss:$40 sps:$4 sm:$0xff]  }
 0x3f8   :  { %9845 = vmatprep.mubr.bf16.mxu1 %v16044_v35  ;;  %9815 = vmatprep.subr.bf16.mxu1 %v13553_v0  ;;  %v13622_v61 = vld [vmem:[%s18871_s3 + $0x16dc] ss:$40 sps:$4 sm:$0xff]   ;;  %v13617_v0 = vld [vmem:[%s18871_s3 + $0x3d0] ss:$40 sps:$4 sm:$0xff]  }
 0x3f9   :  { %9759 = vmatprep.subr.bf16.mxu0 %v13556_v1  ;;  %v13620_v1 = vld [vmem:[%s18871_s3 + $0x16d8] ss:$40 sps:$4 sm:$0xff]  }
 0x3fb   :  { %9816 = vmatpush1.bf16.msra.mxu1 %v13551_v5  ;;  %9760 = vmatpush1.bf16.msra.mxu0 %v13554_v28  ;;  %v13625_v5 = vld [vmem:[%s18871_s3 + $0x424] ss:$40 sps:$4 sm:$0xff]  }
 0x3fc   :  { %9817 = vmatprep.subr.bf16.mxu1 %v13559_v2  ;;  %9761 = vmatprep.subr.bf16.mxu0 %v13562_v30  ;;  %v13628_v28 = vld [vmem:[%s18871_s3 + $0x172c] ss:$40 sps:$4 sm:$0xff]   ;;  %v13623_v2 = vld [vmem:[%s18871_s3 + $0x420] ss:$40 sps:$4 sm:$0xff]  }
 0x3fd   :  { %v13626_v30 = vld [vmem:[%s18871_s3 + $0x1728] ss:$40 sps:$4 sm:$0xff]  }
 0x3ff   :  { %9818 = vmatpush1.bf16.msra.mxu1 %v13557_v11  ;;  %9762 = vmatpush1.bf16.msra.mxu0 %v13560_v24  ;;  %v13631_v11 = vld [vmem:[%s18871_s3 + $0x474] ss:$40 sps:$4 sm:$0xff]  }
 0x400   :  { %9819 = vmatprep.subr.bf16.mxu1 %v13565_v4  ;;  %9772 = vmatprep.subr.bf16.mxu0 %v13568_v6  ;;  %v13634_v24 = vld [vmem:[%s18871_s3 + $0x1c] ss:$40 sps:$4 sm:$0xff]   ;;  %v13629_v4 = vld [vmem:[%s18871_s3 + $0x470] ss:$40 sps:$4 sm:$0xff]  }
 0x401   :  { %v13632_v6 = vld [vmem:[%s18871_s3 + $0x18] ss:$40 sps:$4 sm:$0xff]  }
 0x402   :  { %9764 = vmatmul.mubr.bf16.vlgmr.msra.gmra.mrb[12].mxu0 %v16955_v3 }
 0x403   :  { %9820 = vmatpush1.bf16.msra.mxu1 %v13563_v27  ;;  %9773 = vmatpush1.bf16.msra.mxu0 %v13566_v49  ;;  %v13637_v27 = vld [vmem:[%s18871_s3 + $0x4c4] ss:$40 sps:$4 sm:$0xff]  }
 0x404   :  { %11993 = vmatprep.mubr.msk.bf16.mxu0 %vm9399_vm0, %v17323_v58  ;;  %9821 = vmatprep.subr.bf16.mxu1 %v13571_v7  ;;  %v13640_v49 = vld [vmem:[%s18871_s3 + $0x6c] ss:$40 sps:$4 sm:$0xff]   ;;  %v13635_v7 = vld [vmem:[%s18871_s3 + $0x4c0] ss:$40 sps:$4 sm:$0xff]  }
 0x405   :  { %9774 = vmatprep.subr.bf16.mxu0 %v13574_v8  ;;  %v13638_v8 = vld [vmem:[%s18871_s3 + $0x68] ss:$40 sps:$4 sm:$0xff]  }
 0x407   :  { %9822 = vmatpush1.bf16.msra.mxu1 %v13569_v9  ;;  %9775 = vmatpush1.bf16.msra.mxu0 %v13572_v12  ;;  %v13643_v9 = vld [vmem:[%s18871_s3 + $0x514] ss:$40 sps:$4 sm:$0xff]  }
 0x408   :  { %9823 = vmatprep.subr.bf16.mxu1 %v13577_v56  ;;  %9776 = vmatprep.subr.bf16.mxu0 %v13580_v14  ;;  %v13646_v12 = vld [vmem:[%s18871_s3 + $0xbc] ss:$40 sps:$4 sm:$0xff]   ;;  %v13641_v56 = vld [vmem:[%s18871_s3 + $0x510] ss:$40 sps:$4 sm:$0xff]  }
 0x409   :  { %v13644_v14 = vld [vmem:[%s18871_s3 + $0xb8] ss:$40 sps:$4 sm:$0xff]  }
 0x40b   :  { %9824 = vmatpush1.bf16.msra.mxu1 %v13575_v17  ;;  %9777 = vmatpush1.bf16.msra.mxu0 %v13578_v22  ;;  %v13649_v17 = vld [vmem:[%s18871_s3 + $0x564] ss:$40 sps:$4 sm:$0xff]  }
 0x40c   :  { %9825 = vmatprep.subr.bf16.mxu1 %v13583_v23  ;;  %9778 = vmatprep.subr.bf16.mxu0 %v13586_v29  ;;  %v13652_v22 = vld [vmem:[%s18871_s3 + $0x10c] ss:$40 sps:$4 sm:$0xff]   ;;  %v13647_v23 = vld [vmem:[%s18871_s3 + $0x560] ss:$40 sps:$4 sm:$0xff]  }
 0x40d   :  { %v13650_v29 = vld [vmem:[%s18871_s3 + $0x108] ss:$40 sps:$4 sm:$0xff]  }
 0x40f   :  { %9826 = vmatpush1.bf16.msra.mxu1 %v13581_v32  ;;  %9779 = vmatpush1.bf16.msra.mxu0 %v13584_v21  ;;  %v13655_v32 = vld [vmem:[%s18871_s3 + $0x5b4] ss:$40 sps:$4 sm:$0xff]  }
 0x410   :  { %9827 = vmatprep.subr.bf16.mxu1 %v13589_v33  ;;  %9780 = vmatprep.subr.bf16.mxu0 %v13592_v10  ;;  %v13658_v21 = vld [vmem:[%s18871_s3 + $0x15c] ss:$40 sps:$4 sm:$0xff]   ;;  %v13653_v33 = vld [vmem:[%s18871_s3 + $0x5b0] ss:$40 sps:$4 sm:$0xff]  }
 0x411   :  { %v13656_v10 = vld [vmem:[%s18871_s3 + $0x158] ss:$40 sps:$4 sm:$0xff]  }
 0x413   :  { %9828 = vmatpush1.bf16.msra.mxu1 %v13587_v34  ;;  %9781 = vmatpush1.bf16.msra.mxu0 %v13590_v36  ;;  %v13661_v34 = vld [vmem:[%s18871_s3 + $0x604] ss:$40 sps:$4 sm:$0xff]  }
 0x414   :  { %9829 = vmatprep.subr.bf16.mxu1 %v13595_v37  ;;  %9782 = vmatprep.subr.bf16.mxu0 %v13598_v15  ;;  %v13664_v36 = vld [vmem:[%s18871_s3 + $0x1ac] ss:$40 sps:$4 sm:$0xff]   ;;  %v13659_v37 = vld [vmem:[%s18871_s3 + $0x600] ss:$40 sps:$4 sm:$0xff]  }
 0x415   :  { %v13662_v15 = vld [vmem:[%s18871_s3 + $0x1a8] ss:$40 sps:$4 sm:$0xff]  }
 0x417   :  { %9830 = vmatpush1.bf16.msra.mxu1 %v13593_v38  ;;  %9783 = vmatpush1.bf16.msra.mxu0 %v13596_v40  ;;  %v13667_v38 = vld [vmem:[%s18871_s3 + $0x654] ss:$40 sps:$4 sm:$0xff]  }
 0x418   :  { %9831 = vmatprep.subr.bf16.mxu1 %v13601_v25  ;;  %9784 = vmatprep.subr.bf16.mxu0 %v13604_v41  ;;  %v13670_v40 = vld [vmem:[%s18871_s3 + $0x1fc] ss:$40 sps:$4 sm:$0xff]   ;;  %v13665_v25 = vld [vmem:[%s18871_s3 + $0x650] ss:$40 sps:$4 sm:$0xff]  }
 0x419   :  { %v13668_v41 = vld [vmem:[%s18871_s3 + $0x1f8] ss:$40 sps:$4 sm:$0xff]  }
 0x41b   :  { %9832 = vmatpush1.bf16.msra.mxu1 %v13599_v42  ;;  %9785 = vmatpush1.bf16.msra.mxu0 %v13602_v13  ;;  %v13673_v42 = vld [vmem:[%s18871_s3 + $0x6a4] ss:$40 sps:$4 sm:$0xff]  }
 0x41c   :  { %9833 = vmatprep.subr.bf16.mxu1 %v13607_v45  ;;  %9786 = vmatprep.subr.bf16.mxu0 %v13610_v47  ;;  %v13676_v13 = vld [vmem:[%s18871_s3 + $0x24c] ss:$40 sps:$4 sm:$0xff]   ;;  %v13671_v45 = vld [vmem:[%s18871_s3 + $0x6a0] ss:$40 sps:$4 sm:$0xff]  }
 0x41d   :  { %v13674_v47 = vld [vmem:[%s18871_s3 + $0x248] ss:$40 sps:$4 sm:$0xff]  }
 0x41f   :  { %9834 = vmatpush1.bf16.msra.mxu1 %v13605_v50  ;;  %9787 = vmatpush1.bf16.msra.mxu0 %v13608_v51  ;;  %v13679_v50 = vld [vmem:[%s18871_s3 + $0x6f4] ss:$40 sps:$4 sm:$0xff]  }
 0x420   :  { %9835 = vmatprep.subr.bf16.mxu1 %v13613_v53  ;;  %9788 = vmatprep.subr.bf16.mxu0 %v13616_v31  ;;  %v13682_v51 = vld [vmem:[%s18871_s3 + $0x29c] ss:$40 sps:$4 sm:$0xff]   ;;  %v13677_v53 = vld [vmem:[%s18871_s3 + $0x6f0] ss:$40 sps:$4 sm:$0xff]  }
 0x421   :  { %v13680_v31 = vld [vmem:[%s18871_s3 + $0x298] ss:$40 sps:$4 sm:$0xff]  }
 0x423   :  { %9836 = vmatpush1.bf16.msra.mxu1 %v13611_v54  ;;  %9789 = vmatpush1.bf16.msra.mxu0 %v13614_v57  ;;  %v13685_v54 = vld [vmem:[%s18871_s3 + $0x744] ss:$40 sps:$4 sm:$0xff]  }
 0x424   :  { %9837 = vmatprep.subr.bf16.mxu1 %v13619_v59  ;;  %9790 = vmatprep.subr.bf16.mxu0 %v13622_v61  ;;  %v13688_v57 = vld [vmem:[%s18871_s3 + $0x2ec] ss:$40 sps:$4 sm:$0xff]   ;;  %v13683_v59 = vld [vmem:[%s18871_s3 + $0x740] ss:$40 sps:$4 sm:$0xff]  }
 0x425   :  { %v13686_v61 = vld [vmem:[%s18871_s3 + $0x2e8] ss:$40 sps:$4 sm:$0xff]  }
 0x427   :  { %9838 = vmatpush1.bf16.msra.mxu1 %v13617_v0  ;;  %9791 = vmatpush1.bf16.msra.mxu0 %v13620_v1  ;;  %v13691_v0 = vld [vmem:[%s18871_s3 + $0x794] ss:$40 sps:$4 sm:$0xff]  }
 0x428   :  { %9839 = vmatprep.subr.bf16.mxu1 %v13625_v5  ;;  %9792 = vmatprep.subr.bf16.mxu0 %v13628_v28  ;;  %v13694_v1 = vld [vmem:[%s18871_s3 + $0x33c] ss:$40 sps:$4 sm:$0xff]   ;;  %v13689_v5 = vld [vmem:[%s18871_s3 + $0x790] ss:$40 sps:$4 sm:$0xff]  }
 0x429   :  { %v13692_v28 = vld [vmem:[%s18871_s3 + $0x338] ss:$40 sps:$4 sm:$0xff]  }
 0x42b   :  { %9840 = vmatpush1.bf16.msra.mxu1 %v13623_v2  ;;  %9793 = vmatpush1.bf16.msra.mxu0 %v13626_v30  ;;  %v13697_v2 = vld [vmem:[%s18871_s3 + $0x7e4] ss:$40 sps:$4 sm:$0xff]  }
 0x42c   :  { %9841 = vmatprep.subr.bf16.mxu1 %v13631_v11  ;;  %10018 = vmatprep.subr.bf16.mxu0 %v13634_v24  ;;  %v13700_v30 = vld [vmem:[%s18871_s3 + $0x38c] ss:$40 sps:$4 sm:$0xff]   ;;  %v13695_v11 = vld [vmem:[%s18871_s3 + $0x7e0] ss:$40 sps:$4 sm:$0xff]  }
 0x42d   :  { %v13698_v24 = vld [vmem:[%s18871_s3 + $0x388] ss:$40 sps:$4 sm:$0xff]  }
 0x42e   :  { %9805 = vmatmul.mubr.bf16.vlgmr.msra.gmra.mrb[12].mxu0 %v17331_v63 }
 0x42f   :  { %9842 = vmatpush1.bf16.msra.mxu1 %v13629_v4  ;;  %10019 = vmatpush1.bf16.msra.mxu0 %v13632_v6  ;;  %v13703_v4 = vld [vmem:[%s18871_s3 + $0x834] ss:$40 sps:$4 sm:$0xff]  }
 0x430   :  { %10050 = vmatprep.mubr.bf16.mxu0 %v16044_v35  ;;  %9843 = vmatprep.subr.bf16.mxu1 %v13637_v27  ;;  %v13706_v6 = vld [vmem:[%s18871_s3 + $0x3dc] ss:$40 sps:$4 sm:$0xff]   ;;  %v13701_v27 = vld [vmem:[%s18871_s3 + $0x830] ss:$40 sps:$4 sm:$0xff]  }
 0x431   :  { %10020 = vmatprep.subr.bf16.mxu0 %v13640_v49  ;;  %v13704_v49 = vld [vmem:[%s18871_s3 + $0x3d8] ss:$40 sps:$4 sm:$0xff]  }
 0x433   :  { %9844 = vmatpush1.bf16.msra.mxu1 %v13635_v7  ;;  %10021 = vmatpush1.bf16.msra.mxu0 %v13638_v8  ;;  %v13709_v7 = vld [vmem:[%s18871_s3 + $0x884] ss:$40 sps:$4 sm:$0xff]  }
 0x434   :  { %9854 = vmatprep.subr.bf16.mxu1 %v13643_v9  ;;  %10022 = vmatprep.subr.bf16.mxu0 %v13646_v12  ;;  %v13712_v8 = vld [vmem:[%s18871_s3 + $0x42c] ss:$40 sps:$4 sm:$0xff]   ;;  %v13707_v9 = vld [vmem:[%s18871_s3 + $0x880] ss:$40 sps:$4 sm:$0xff]  }
 0x435   :  { %v13710_v12 = vld [vmem:[%s18871_s3 + $0x428] ss:$40 sps:$4 sm:$0xff]  }
 0x436   :  { %9846 = vmatmul.mubr.bf16.vlgmr.msra.gmra.mrb[12].mxu1 %v16245_v60 }
 0x437   :  { %9855 = vmatpush1.bf16.msra.mxu1 %v13641_v56  ;;  %9886 = vmatprep.mubr.bf16.mxu1 %v16250_v62  ;;  %v13715_v56 = vld [vmem:[%s18871_s3 + $0x8d4] ss:$40 sps:$4 sm:$0xff]  }
 0x438   :  { %10023 = vmatpush1.bf16.msra.mxu0 %v13644_v14  ;;  %9856 = vmatprep.subr.bf16.mxu1 %v13649_v17  ;;  %v13718_v14 = vld [vmem:[%s18871_s3 + $0x47c] ss:$40 sps:$4 sm:$0xff]   ;;  %v13713_v17 = vld [vmem:[%s18871_s3 + $0x8d0] ss:$40 sps:$4 sm:$0xff]  }
 0x439   :  { %10024 = vmatprep.subr.bf16.mxu0 %v13652_v22  ;;  %v13716_v22 = vld [vmem:[%s18871_s3 + $0x478] ss:$40 sps:$4 sm:$0xff]  }
 0x43b   :  { %9857 = vmatpush1.bf16.msra.mxu1 %v13647_v23  ;;  %v13721_v23 = vld [vmem:[%s18871_s3 + $0x924] ss:$40 sps:$4 sm:$0xff]  }
 0x43c   :  { %10025 = vmatpush1.bf16.msra.mxu0 %v13650_v29  ;;  %9858 = vmatprep.subr.bf16.mxu1 %v13655_v32  ;;  %v13724_v29 = vld [vmem:[%s18871_s3 + $0x4cc] ss:$40 sps:$4 sm:$0xff]   ;;  %v13719_v32 = vld [vmem:[%s18871_s3 + $0x920] ss:$40 sps:$4 sm:$0xff]  }
 0x43d   :  { %10026 = vmatprep.subr.bf16.mxu0 %v13658_v21  ;;  %v13722_v21 = vld [vmem:[%s18871_s3 + $0x4c8] ss:$40 sps:$4 sm:$0xff]  }
 0x43f   :  { %9859 = vmatpush1.bf16.msra.mxu1 %v13653_v33  ;;  %v13727_v33 = vld [vmem:[%s18871_s3 + $0x974] ss:$40 sps:$4 sm:$0xff]  }
 0x440   :  { %10027 = vmatpush1.bf16.msra.mxu0 %v13656_v10  ;;  %9860 = vmatprep.subr.bf16.mxu1 %v13661_v34  ;;  %v13730_v10 = vld [vmem:[%s18871_s3 + $0x51c] ss:$40 sps:$4 sm:$0xff]   ;;  %v13725_v34 = vld [vmem:[%s18871_s3 + $0x970] ss:$40 sps:$4 sm:$0xff]  }
 0x441   :  { %10028 = vmatprep.subr.bf16.mxu0 %v13664_v36  ;;  %v13728_v36 = vld [vmem:[%s18871_s3 + $0x518] ss:$40 sps:$4 sm:$0xff]  }
 0x443   :  { %9861 = vmatpush1.bf16.msra.mxu1 %v13659_v37  ;;  %v13733_v37 = vld [vmem:[%s18871_s3 + $0x9c4] ss:$40 sps:$4 sm:$0xff]  }
 0x444   :  { %10029 = vmatpush1.bf16.msra.mxu0 %v13662_v15  ;;  %9862 = vmatprep.subr.bf16.mxu1 %v13667_v38  ;;  %v13736_v15 = vld [vmem:[%s18871_s3 + $0x56c] ss:$40 sps:$4 sm:$0xff]   ;;  %v13731_v38 = vld [vmem:[%s18871_s3 + $0x9c0] ss:$40 sps:$4 sm:$0xff]  }
 0x445   :  { %10030 = vmatprep.subr.bf16.mxu0 %v13670_v40  ;;  %v13734_v40 = vld [vmem:[%s18871_s3 + $0x568] ss:$40 sps:$4 sm:$0xff]  }
 0x447   :  { %9863 = vmatpush1.bf16.msra.mxu1 %v13665_v25  ;;  %v13739_v25 = vld [vmem:[%s18871_s3 + $0xa14] ss:$40 sps:$4 sm:$0xff]  }
 0x448   :  { %10031 = vmatpush1.bf16.msra.mxu0 %v13668_v41  ;;  %9864 = vmatprep.subr.bf16.mxu1 %v13673_v42  ;;  %v13742_v41 = vld [vmem:[%s18871_s3 + $0x5bc] ss:$40 sps:$4 sm:$0xff]   ;;  %v13737_v42 = vld [vmem:[%s18871_s3 + $0xa10] ss:$40 sps:$4 sm:$0xff]  }
 0x449   :  { %10032 = vmatprep.subr.bf16.mxu0 %v13676_v13  ;;  %v13740_v13 = vld [vmem:[%s18871_s3 + $0x5b8] ss:$40 sps:$4 sm:$0xff]  }
 0x44b   :  { %9865 = vmatpush1.bf16.msra.mxu1 %v13671_v45  ;;  %v13745_v45 = vld [vmem:[%s18871_s3 + $0xa64] ss:$40 sps:$4 sm:$0xff]  }
 0x44c   :  { %10033 = vmatpush1.bf16.msra.mxu0 %v13674_v47  ;;  %9866 = vmatprep.subr.bf16.mxu1 %v13679_v50  ;;  %v13748_v47 = vld [vmem:[%s18871_s3 + $0x60c] ss:$40 sps:$4 sm:$0xff]   ;;  %v13743_v50 = vld [vmem:[%s18871_s3 + $0xa60] ss:$40 sps:$4 sm:$0xff]  }
 0x44d   :  { %10034 = vmatprep.subr.bf16.mxu0 %v13682_v51  ;;  %v13746_v51 = vld [vmem:[%s18871_s3 + $0x608] ss:$40 sps:$4 sm:$0xff]  }
 0x44f   :  { %9867 = vmatpush1.bf16.msra.mxu1 %v13677_v53  ;;  %v13751_v53 = vld [vmem:[%s18871_s3 + $0xab4] ss:$40 sps:$4 sm:$0xff]  }
 0x450   :  { %10035 = vmatpush1.bf16.msra.mxu0 %v13680_v31  ;;  %9868 = vmatprep.subr.bf16.mxu1 %v13685_v54  ;;  %v13754_v31 = vld [vmem:[%s18871_s3 + $0x65c] ss:$40 sps:$4 sm:$0xff]   ;;  %v13749_v54 = vld [vmem:[%s18871_s3 + $0xab0] ss:$40 sps:$4 sm:$0xff]  }
 0x451   :  { %10036 = vmatprep.subr.bf16.mxu0 %v13688_v57  ;;  %v13752_v57 = vld [vmem:[%s18871_s3 + $0x658] ss:$40 sps:$4 sm:$0xff]  }
 0x453   :  { %9869 = vmatpush1.bf16.msra.mxu1 %v13683_v59  ;;  %v13757_v59 = vld [vmem:[%s18871_s3 + $0xb04] ss:$40 sps:$4 sm:$0xff]  }
 0x454   :  { %10037 = vmatpush1.bf16.msra.mxu0 %v13686_v61  ;;  %9870 = vmatprep.subr.bf16.mxu1 %v13691_v0  ;;  %v13760_v61 = vld [vmem:[%s18871_s3 + $0x6ac] ss:$40 sps:$4 sm:$0xff]   ;;  %v13755_v0 = vld [vmem:[%s18871_s3 + $0xb00] ss:$40 sps:$4 sm:$0xff]  }
 0x455   :  { %10038 = vmatprep.subr.bf16.mxu0 %v13694_v1  ;;  %v13758_v1 = vld [vmem:[%s18871_s3 + $0x6a8] ss:$40 sps:$4 sm:$0xff]  }
 0x457   :  { %9871 = vmatpush1.bf16.msra.mxu1 %v13689_v5  ;;  %v13763_v5 = vld [vmem:[%s18871_s3 + $0xb54] ss:$40 sps:$4 sm:$0xff]  }
 0x458   :  { %10039 = vmatpush1.bf16.msra.mxu0 %v13692_v28  ;;  %9872 = vmatprep.subr.bf16.mxu1 %v13697_v2  ;;  %v13766_v28 = vld [vmem:[%s18871_s3 + $0x6fc] ss:$40 sps:$4 sm:$0xff]   ;;  %v13761_v2 = vld [vmem:[%s18871_s3 + $0xb50] ss:$40 sps:$4 sm:$0xff]  }
 0x459   :  { %10040 = vmatprep.subr.bf16.mxu0 %v13700_v30  ;;  %v13764_v30 = vld [vmem:[%s18871_s3 + $0x6f8] ss:$40 sps:$4 sm:$0xff]  }
 0x45b   :  { %9873 = vmatpush1.bf16.msra.mxu1 %v13695_v11  ;;  %v13769_v11 = vld [vmem:[%s18871_s3 + $0xba4] ss:$40 sps:$4 sm:$0xff]  }
 0x45c   :  { %10041 = vmatpush1.bf16.msra.mxu0 %v13698_v24  ;;  %9874 = vmatprep.subr.bf16.mxu1 %v13703_v4  ;;  %v13772_v24 = vld [vmem:[%s18871_s3 + $0x74c] ss:$40 sps:$4 sm:$0xff]   ;;  %v13767_v4 = vld [vmem:[%s18871_s3 + $0xba0] ss:$40 sps:$4 sm:$0xff]  }
 0x45d   :  { %10042 = vmatprep.subr.bf16.mxu0 %v13706_v6  ;;  %v13770_v6 = vld [vmem:[%s18871_s3 + $0x748] ss:$40 sps:$4 sm:$0xff]  }
 0x45f   :  { %9875 = vmatpush1.bf16.msra.mxu1 %v13701_v27  ;;  %v13775_v27 = vld [vmem:[%s18871_s3 + $0xbf4] ss:$40 sps:$4 sm:$0xff]  }
 0x460   :  { %10043 = vmatpush1.bf16.msra.mxu0 %v13704_v49  ;;  %9876 = vmatprep.subr.bf16.mxu1 %v13709_v7  ;;  %v13778_v49 = vld [vmem:[%s18871_s3 + $0x79c] ss:$40 sps:$4 sm:$0xff]   ;;  %v13773_v7 = vld [vmem:[%s18871_s3 + $0xbf0] ss:$40 sps:$4 sm:$0xff]  }
 0x461   :  { %10044 = vmatprep.subr.bf16.mxu0 %v13712_v8  ;;  %v13776_v8 = vld [vmem:[%s18871_s3 + $0x798] ss:$40 sps:$4 sm:$0xff]  }
 0x463   :  { %9877 = vmatpush1.bf16.msra.mxu1 %v13707_v9  ;;  %v13781_v9 = vld [vmem:[%s18871_s3 + $0xc44] ss:$40 sps:$4 sm:$0xff]  }
 0x464   :  { %10045 = vmatpush1.bf16.msra.mxu0 %v13710_v12  ;;  %9878 = vmatprep.subr.bf16.mxu1 %v13715_v56  ;;  %v13784_v12 = vld [vmem:[%s18871_s3 + $0x7ec] ss:$40 sps:$4 sm:$0xff]   ;;  %v13779_v56 = vld [vmem:[%s18871_s3 + $0xc40] ss:$40 sps:$4 sm:$0xff]  }
 0x465   :  { %10046 = vmatprep.subr.bf16.mxu0 %v13718_v14  ;;  %v13782_v14 = vld [vmem:[%s18871_s3 + $0x7e8] ss:$40 sps:$4 sm:$0xff]  }
 0x467   :  { %9879 = vmatpush1.bf16.msra.mxu1 %v13713_v17  ;;  %v13787_v17 = vld [vmem:[%s18871_s3 + $0xc94] ss:$40 sps:$4 sm:$0xff]  }
 0x468   :  { %10047 = vmatpush1.bf16.msra.mxu0 %v13716_v22  ;;  %9880 = vmatprep.subr.bf16.mxu1 %v13721_v23  ;;  %v13790_v22 = vld [vmem:[%s18871_s3 + $0x83c] ss:$40 sps:$4 sm:$0xff]   ;;  %v13785_v23 = vld [vmem:[%s18871_s3 + $0xc90] ss:$40 sps:$4 sm:$0xff]  }
 0x469   :  { %10048 = vmatprep.subr.bf16.mxu0 %v13724_v29  ;;  %v13788_v29 = vld [vmem:[%s18871_s3 + $0x838] ss:$40 sps:$4 sm:$0xff]  }
 0x46b   :  { %9881 = vmatpush1.bf16.msra.mxu1 %v13719_v32  ;;  %v13793_v32 = vld [vmem:[%s18871_s3 + $0xce4] ss:$40 sps:$4 sm:$0xff]  }
 0x46c   :  { %10049 = vmatpush1.bf16.msra.mxu0 %v13722_v21  ;;  %9882 = vmatprep.subr.bf16.mxu1 %v13727_v33  ;;  %v13796_v21 = vld [vmem:[%s18871_s3 + $0x88c] ss:$40 sps:$4 sm:$0xff]   ;;  %v13791_v33 = vld [vmem:[%s18871_s3 + $0xce0] ss:$40 sps:$4 sm:$0xff]  }
 0x46d   :  { %10059 = vmatprep.subr.bf16.mxu0 %v13730_v10  ;;  %v13794_v10 = vld [vmem:[%s18871_s3 + $0x888] ss:$40 sps:$4 sm:$0xff]  }
 0x46f   :  { %9883 = vmatpush1.bf16.msra.mxu1 %v13725_v34  ;;  %10051 = vmatmul.mubr.bf16.vlgmr.msra.gmra.mrb[16].mxu0 %v16245_v60  ;;  %v13799_v34 = vld [vmem:[%s18871_s3 + $0xd34] ss:$40 sps:$4 sm:$0xff]  }
 0x470   :  { %10060 = vmatpush1.bf16.msra.mxu0 %v13728_v36  ;;  %10091 = vmatprep.mubr.bf16.mxu0 %v16250_v62  ;;  %v13802_v36 = vld [vmem:[%s18871_s3 + $0x8dc] ss:$40 sps:$4 sm:$0xff]  }
 0x471   :  { %9884 = vmatprep.subr.bf16.mxu1 %v13733_v37  ;;  %10061 = vmatprep.subr.bf16.mxu0 %v13736_v15  ;;  %v13797_v37 = vld [vmem:[%s18871_s3 + $0xd30] ss:$40 sps:$4 sm:$0xff]  }
 0x472   :  { %v13800_v15 = vld [vmem:[%s18871_s3 + $0x8d8] ss:$40 sps:$4 sm:$0xff]  }
 0x473   :  { %9885 = vmatpush1.bf16.msra.mxu1 %v13731_v38  ;;  %v13805_v38 = vld [vmem:[%s18871_s3 + $0xd84] ss:$40 sps:$4 sm:$0xff]  }
 0x474   :  { %10062 = vmatpush1.bf16.msra.mxu0 %v13734_v40  ;;  %9895 = vmatprep.subr.bf16.mxu1 %v13739_v25  ;;  %v13808_v40 = vld [vmem:[%s18871_s3 + $0x92c] ss:$40 sps:$4 sm:$0xff]   ;;  %v13803_v25 = vld [vmem:[%s18871_s3 + $0xd80] ss:$40 sps:$4 sm:$0xff]  }
 0x475   :  { %10063 = vmatprep.subr.bf16.mxu0 %v13742_v41  ;;  %v13806_v41 = vld [vmem:[%s18871_s3 + $0x928] ss:$40 sps:$4 sm:$0xff]  }
 0x476   :  { %9887 = vmatmul.mubr.bf16.vlgmr.msra.gmra.mrb[12].mxu1 %v16459_v26 }
 0x477   :  { %9896 = vmatpush1.bf16.msra.mxu1 %v13737_v42  ;;  %9927 = vmatprep.mubr.bf16.mxu1 %v16746_v39  ;;  %v13811_v42 = vld [vmem:[%s18871_s3 + $0xdd4] ss:$40 sps:$4 sm:$0xff]  }
 0x478   :  { %10064 = vmatpush1.bf16.msra.mxu0 %v13740_v13  ;;  %9897 = vmatprep.subr.bf16.mxu1 %v13745_v45  ;;  %v13814_v13 = vld [vmem:[%s18871_s3 + $0x97c] ss:$40 sps:$4 sm:$0xff]   ;;  %v13809_v45 = vld [vmem:[%s18871_s3 + $0xdd0] ss:$40 sps:$4 sm:$0xff]  }
 0x479   :  { %10065 = vmatprep.subr.bf16.mxu0 %v13748_v47  ;;  %v13812_v47 = vld [vmem:[%s18871_s3 + $0x978] ss:$40 sps:$4 sm:$0xff]  }
 0x47b   :  { %9898 = vmatpush1.bf16.msra.mxu1 %v13743_v50  ;;  %v13817_v50 = vld [vmem:[%s18871_s3 + $0xe24] ss:$40 sps:$4 sm:$0xff]  }
 0x47c   :  { %10066 = vmatpush1.bf16.msra.mxu0 %v13746_v51  ;;  %9899 = vmatprep.subr.bf16.mxu1 %v13751_v53  ;;  %v13820_v51 = vld [vmem:[%s18871_s3 + $0x9cc] ss:$40 sps:$4 sm:$0xff]   ;;  %v13815_v53 = vld [vmem:[%s18871_s3 + $0xe20] ss:$40 sps:$4 sm:$0xff]  }
 0x47d   :  { %10067 = vmatprep.subr.bf16.mxu0 %v13754_v31  ;;  %v13818_v31 = vld [vmem:[%s18871_s3 + $0x9c8] ss:$40 sps:$4 sm:$0xff]  }
 0x47f   :  { %9900 = vmatpush1.bf16.msra.mxu1 %v13749_v54  ;;  %v13823_v54 = vld [vmem:[%s18871_s3 + $0xe74] ss:$40 sps:$4 sm:$0xff]  }
 0x480   :  { %10068 = vmatpush1.bf16.msra.mxu0 %v13752_v57  ;;  %9901 = vmatprep.subr.bf16.mxu1 %v13757_v59  ;;  %v13826_v57 = vld [vmem:[%s18871_s3 + $0xa1c] ss:$40 sps:$4 sm:$0xff]   ;;  %v13821_v59 = vld [vmem:[%s18871_s3 + $0xe70] ss:$40 sps:$4 sm:$0xff]  }
 0x481   :  { %10069 = vmatprep.subr.bf16.mxu0 %v13760_v61  ;;  %v13824_v61 = vld [vmem:[%s18871_s3 + $0xa18] ss:$40 sps:$4 sm:$0xff]  }
 0x483   :  { %9902 = vmatpush1.bf16.msra.mxu1 %v13755_v0  ;;  %v13829_v0 = vld [vmem:[%s18871_s3 + $0xec4] ss:$40 sps:$4 sm:$0xff]  }
 0x484   :  { %10070 = vmatpush1.bf16.msra.mxu0 %v13758_v1  ;;  %9903 = vmatprep.subr.bf16.mxu1 %v13763_v5  ;;  %v13832_v1 = vld [vmem:[%s18871_s3 + $0xa6c] ss:$40 sps:$4 sm:$0xff]   ;;  %v13827_v5 = vld [vmem:[%s18871_s3 + $0xec0] ss:$40 sps:$4 sm:$0xff]  }
 0x485   :  { %10071 = vmatprep.subr.bf16.mxu0 %v13766_v28  ;;  %v13830_v28 = vld [vmem:[%s18871_s3 + $0xa68] ss:$40 sps:$4 sm:$0xff]  }
 0x487   :  { %9904 = vmatpush1.bf16.msra.mxu1 %v13761_v2  ;;  %v13835_v2 = vld [vmem:[%s18871_s3 + $0xf14] ss:$40 sps:$4 sm:$0xff]  }
 0x488   :  { %10072 = vmatpush1.bf16.msra.mxu0 %v13764_v30  ;;  %9905 = vmatprep.subr.bf16.mxu1 %v13769_v11  ;;  %v13838_v30 = vld [vmem:[%s18871_s3 + $0xabc] ss:$40 sps:$4 sm:$0xff]   ;;  %v13833_v11 = vld [vmem:[%s18871_s3 + $0xf10] ss:$40 sps:$4 sm:$0xff]  }
 0x489   :  { %10073 = vmatprep.subr.bf16.mxu0 %v13772_v24  ;;  %v13836_v24 = vld [vmem:[%s18871_s3 + $0xab8] ss:$40 sps:$4 sm:$0xff]  }
 0x48b   :  { %9906 = vmatpush1.bf16.msra.mxu1 %v13767_v4  ;;  %v13841_v4 = vld [vmem:[%s18871_s3 + $0xf64] ss:$40 sps:$4 sm:$0xff]  }
 0x48c   :  { %10074 = vmatpush1.bf16.msra.mxu0 %v13770_v6  ;;  %9907 = vmatprep.subr.bf16.mxu1 %v13775_v27  ;;  %v13844_v6 = vld [vmem:[%s18871_s3 + $0xb0c] ss:$40 sps:$4 sm:$0xff]   ;;  %v13839_v27 = vld [vmem:[%s18871_s3 + $0xf60] ss:$40 sps:$4 sm:$0xff]  }
 0x48d   :  { %10075 = vmatprep.subr.bf16.mxu0 %v13778_v49  ;;  %v13842_v49 = vld [vmem:[%s18871_s3 + $0xb08] ss:$40 sps:$4 sm:$0xff]  }
 0x48f   :  { %9908 = vmatpush1.bf16.msra.mxu1 %v13773_v7  ;;  %v13847_v7 = vld [vmem:[%s18871_s3 + $0xfb4] ss:$40 sps:$4 sm:$0xff]  }
 0x490   :  { %10076 = vmatpush1.bf16.msra.mxu0 %v13776_v8  ;;  %9909 = vmatprep.subr.bf16.mxu1 %v13781_v9  ;;  %v13850_v8 = vld [vmem:[%s18871_s3 + $0xb5c] ss:$40 sps:$4 sm:$0xff]   ;;  %v13845_v9 = vld [vmem:[%s18871_s3 + $0xfb0] ss:$40 sps:$4 sm:$0xff]  }
 0x491   :  { %10077 = vmatprep.subr.bf16.mxu0 %v13784_v12  ;;  %v13848_v12 = vld [vmem:[%s18871_s3 + $0xb58] ss:$40 sps:$4 sm:$0xff]  }
 0x493   :  { %9910 = vmatpush1.bf16.msra.mxu1 %v13779_v56  ;;  %v13853_v56 = vld [vmem:[%s18871_s3 + $0x1004] ss:$40 sps:$4 sm:$0xff]  }
 0x494   :  { %10078 = vmatpush1.bf16.msra.mxu0 %v13782_v14  ;;  %9911 = vmatprep.subr.bf16.mxu1 %v13787_v17  ;;  %v13856_v14 = vld [vmem:[%s18871_s3 + $0xbac] ss:$40 sps:$4 sm:$0xff]   ;;  %v13851_v17 = vld [vmem:[%s18871_s3 + $0x1000] ss:$40 sps:$4 sm:$0xff]  }
 0x495   :  { %10079 = vmatprep.subr.bf16.mxu0 %v13790_v22  ;;  %v13854_v22 = vld [vmem:[%s18871_s3 + $0xba8] ss:$40 sps:$4 sm:$0xff]  }
 0x497   :  { %9912 = vmatpush1.bf16.msra.mxu1 %v13785_v23  ;;  %v13859_v23 = vld [vmem:[%s18871_s3 + $0x1054] ss:$40 sps:$4 sm:$0xff]  }
 0x498   :  { %10080 = vmatpush1.bf16.msra.mxu0 %v13788_v29  ;;  %9913 = vmatprep.subr.bf16.mxu1 %v13793_v32  ;;  %v13862_v29 = vld [vmem:[%s18871_s3 + $0xbfc] ss:$40 sps:$4 sm:$0xff]   ;;  %v13857_v32 = vld [vmem:[%s18871_s3 + $0x1050] ss:$40 sps:$4 sm:$0xff]  }
 0x499   :  { %10081 = vmatprep.subr.bf16.mxu0 %v13796_v21  ;;  %v17976_v21 = vld [vmem:[%s18873_s4] sm:$0xff] }
 0x49b   :  { %9914 = vmatpush1.bf16.msra.mxu1 %v13791_v33  ;;  %v13860_v33 = vld [vmem:[%s18871_s3 + $0xbf8] ss:$40 sps:$4 sm:$0xff]  }
 0x49c   :  { %10082 = vmatpush1.bf16.msra.mxu0 %v13794_v10  ;;  %9915 = vmatprep.subr.bf16.mxu1 %v13799_v34  ;;  %v13865_v10 = vld [vmem:[%s18871_s3 + $0x10a4] ss:$40 sps:$4 sm:$0xff]  }
 0x49d   :  { %10083 = vmatprep.subr.bf16.mxu0 %v13802_v36  ;;  %v13868_v34 = vld [vmem:[%s18871_s3 + $0xc4c] ss:$40 sps:$4 sm:$0xff]   ;;  %v5602_v36 = vrot.slane %v17976_v21, %v16099_v52 }
 0x49f   :  { %9916 = vmatpush1.bf16.msra.mxu1 %v13797_v37  ;;  %v13863_v37 = vld [vmem:[%s18871_s3 + $0x10a0] ss:$40 sps:$4 sm:$0xff]  }
 0x4a0   :  { %10084 = vmatpush1.bf16.msra.mxu0 %v13800_v15  ;;  %9917 = vmatprep.subr.bf16.mxu1 %v13805_v38  ;;  %v5606_v15 = vrot.slane %v17976_v21, %v15890_v19  ;;  %v13866_v38 = vld [vmem:[%s18871_s3 + $0xc48] ss:$40 sps:$4 sm:$0xff]  }
 0x4a1   :  { %10085 = vmatprep.subr.bf16.mxu0 %v13808_v40  ;;  %v13871_v40 = vld [vmem:[%s18871_s3 + $0x10f4] ss:$40 sps:$4 sm:$0xff]  }
 0x4a3   :  { %9918 = vmatpush1.bf16.msra.mxu1 %v13803_v25 }
 0x4a4   :  { %10086 = vmatpush1.bf16.msra.mxu0 %v13806_v41  ;;  %9919 = vmatprep.subr.bf16.mxu1 %v13811_v42  ;;  %v13874_v41 = vld [vmem:[%s18871_s3 + $0xc9c] ss:$40 sps:$4 sm:$0xff]  }
 0x4a5   :  { %10087 = vmatprep.subr.bf16.mxu0 %v13814_v13 }
 0x4a7   :  { %9920 = vmatpush1.bf16.msra.mxu1 %v13809_v45 }
 0x4a8   :  { %10088 = vmatpush1.bf16.msra.mxu0 %v13812_v47  ;;  %9921 = vmatprep.subr.bf16.mxu1 %v13817_v50  ;;  %v13869_v50 = vld [vmem:[%s18871_s3 + $0x10f0] ss:$40 sps:$4 sm:$0xff]  }
 0x4a9   :  { %10089 = vmatprep.subr.bf16.mxu0 %v13820_v51  ;;  %v13872_v51 = vld [vmem:[%s18871_s3 + $0xc98] ss:$40 sps:$4 sm:$0xff]  }
 0x4ab   :  { %9922 = vmatpush1.bf16.msra.mxu1 %v13815_v53 }
 0x4ac   :  { %10090 = vmatpush1.bf16.msra.mxu0 %v13818_v31  ;;  %9923 = vmatprep.subr.bf16.mxu1 %v13823_v54  ;;  %v13877_v54 = vld [vmem:[%s18871_s3 + $0x1144] ss:$40 sps:$4 sm:$0xff]  }
 0x4ad   :  { %10100 = vmatprep.subr.bf16.mxu0 %v13826_v57 }
 0x4af   :  { %9924 = vmatpush1.bf16.msra.mxu1 %v13821_v59  ;;  %10092 = vmatmul.mubr.bf16.vlgmr.msra.gmra.mrb[16].mxu0 %v16459_v26  ;;  %v13880_v59 = vld [vmem:[%s18871_s3 + $0xcec] ss:$40 sps:$4 sm:$0xff]  }
 0x4b0   :  { %10101 = vmatpush1.bf16.msra.mxu0 %v13824_v61  ;;  %10132 = vmatprep.mubr.bf16.mxu0 %v16746_v39  ;;  %v13875_v61 = vld [vmem:[%s18871_s3 + $0x1140] ss:$40 sps:$4 sm:$0xff]  }
 0x4b1   :  { %9925 = vmatprep.subr.bf16.mxu1 %v13829_v0  ;;  %10102 = vmatprep.subr.bf16.mxu0 %v13832_v1  ;;  %v13878_v0 = vld [vmem:[%s18871_s3 + $0xce8] ss:$40 sps:$4 sm:$0xff]   ;;  %v13883_v1 = vld [vmem:[%s18871_s3 + $0x1194] ss:$40 sps:$4 sm:$0xff]  }
 0x4b3   :  { %9926 = vmatpush1.bf16.msra.mxu1 %v13827_v5  ;;  %v13886_v5 = vld [vmem:[%s18871_s3 + $0xd3c] ss:$40 sps:$4 sm:$0xff]  }
 0x4b4   :  { %10103 = vmatpush1.bf16.msra.mxu0 %v13830_v28  ;;  %9936 = vmatprep.subr.bf16.mxu1 %v13835_v2  ;;  %v13881_v28 = vld [vmem:[%s18871_s3 + $0x1190] ss:$40 sps:$4 sm:$0xff]  }
 0x4b5   :  { %10104 = vmatprep.subr.bf16.mxu0 %v13838_v30  ;;  %v13884_v2 = vld [vmem:[%s18871_s3 + $0xd38] ss:$40 sps:$4 sm:$0xff]   ;;  %v13889_v30 = vld [vmem:[%s18871_s3 + $0x11e4] ss:$40 sps:$4 sm:$0xff]  }
 0x4b6   :  { %9928 = vmatmul.mubr.bf16.vlgmr.msra.gmra.mrb[12].mxu1 %v16754_v20 }
 0x4b7   :  { %9937 = vmatpush1.bf16.msra.mxu1 %v13833_v11  ;;  %9968 = vmatprep.mubr.bf16.mxu1 %v16762_v48  ;;  %v13892_v11 = vld [vmem:[%s18871_s3 + $0xd8c] ss:$40 sps:$4 sm:$0xff]  }
 0x4b8   :  { %10105 = vmatpush1.bf16.msra.mxu0 %v13836_v24  ;;  %9938 = vmatprep.subr.bf16.mxu1 %v13841_v4  ;;  %v13887_v24 = vld [vmem:[%s18871_s3 + $0x11e0] ss:$40 sps:$4 sm:$0xff]  }
 0x4b9   :  { %10106 = vmatprep.subr.bf16.mxu0 %v13844_v6  ;;  %v13890_v6 = vld [vmem:[%s18871_s3 + $0xd88] ss:$40 sps:$4 sm:$0xff]  }
 0x4bb   :  { %9939 = vmatpush1.bf16.msra.mxu1 %v13839_v27  ;;  %v13895_v27 = vld [vmem:[%s18871_s3 + $0x1234] ss:$40 sps:$4 sm:$0xff]  }
 0x4bc   :  { %10107 = vmatpush1.bf16.msra.mxu0 %v13842_v49  ;;  %9940 = vmatprep.subr.bf16.mxu1 %v13847_v7 }
 0x4bd   :  { %10108 = vmatprep.subr.bf16.mxu0 %v13850_v8  ;;  %v13898_v8 = vld [vmem:[%s18871_s3 + $0xddc] ss:$40 sps:$4 sm:$0xff]  }
 0x4bf   :  { %9941 = vmatpush1.bf16.msra.mxu1 %v13845_v9 }
 0x4c0   :  { %10109 = vmatpush1.bf16.msra.mxu0 %v13848_v12  ;;  %9942 = vmatprep.subr.bf16.mxu1 %v13853_v56  ;;  %v13893_v12 = vld [vmem:[%s18871_s3 + $0x1230] ss:$40 sps:$4 sm:$0xff]  }
 0x4c1   :  { %10110 = vmatprep.subr.bf16.mxu0 %v13856_v14  ;;  %v13896_v56 = vld [vmem:[%s18871_s3 + $0xdd8] ss:$40 sps:$4 sm:$0xff]   ;;  %v13901_v14 = vld [vmem:[%s18871_s3 + $0x1284] ss:$40 sps:$4 sm:$0xff]  }
 0x4c3   :  { %9943 = vmatpush1.bf16.msra.mxu1 %v13851_v17  ;;  %v13904_v17 = vld [vmem:[%s18871_s3 + $0xe2c] ss:$40 sps:$4 sm:$0xff]  }
 0x4c4   :  { %10111 = vmatpush1.bf16.msra.mxu0 %v13854_v22  ;;  %9944 = vmatprep.subr.bf16.mxu1 %v13859_v23  ;;  %v13899_v22 = vld [vmem:[%s18871_s3 + $0x1280] ss:$40 sps:$4 sm:$0xff]  }
 0x4c5   :  { %10112 = vmatprep.subr.bf16.mxu0 %v13862_v29  ;;  %v18069_v23 = vld [vmem:[%s18874_s5] sm:$0xff]  ;;  %v13902_v29 = vld [vmem:[%s18871_s3 + $0xe28] ss:$40 sps:$4 sm:$0xff]  }
 0x4c7   :  { %9945 = vmatpush1.bf16.msra.mxu1 %v13857_v32  ;;  %v13907_v32 = vld [vmem:[%s18871_s3 + $0x12d4] ss:$40 sps:$4 sm:$0xff]  }
 0x4c8   :  { %10113 = vmatpush1.bf16.msra.mxu0 %v13860_v33  ;;  %9946 = vmatprep.subr.bf16.mxu1 %v13865_v10  ;;  %v13910_v33 = vld [vmem:[%s18871_s3 + $0xe7c] ss:$40 sps:$4 sm:$0xff]   ;;  %v10495_v10 = vrot.slane %v18069_v23, %v16099_v52 }
 0x4c9   :  { %v9601_v25 = vpop.f32.mrb[8].mxu1  ;;  %10114 = vmatprep.subr.bf16.mxu0 %v13868_v34  ;;  %v13905_v34 = vld [vmem:[%s18871_s3 + $0x12d0] ss:$40 sps:$4 sm:$0xff]  }
 0x4ca   :  { %v12019_v42 = vadd.f32 %v9601_v25, %v5602_v36  ;;  %v9603_v13 = vpop.f32.mrb[9].mxu1  ;;  %v10499_v36 = vrot.slane %v18069_v23, %v15890_v19 }
 0x4cb   :  { %v12020_v45 = vadd.f32 %v9603_v13, %v5606_v15  ;;  %9947 = vmatpush1.bf16.msra.mxu1 %v13863_v37  ;;  %v9605_v47 = vpop.f32.mrb[10].mxu1  ;;  %v13908_v37 = vld [vmem:[%s18871_s3 + $0xe78] ss:$40 sps:$4 sm:$0xff]   ;;  %v13913_v15 = vld [vmem:[%s18871_s3 + $0x1324] ss:$40 sps:$4 sm:$0xff]  }
 0x4cc   :  { %v11997_v53 = vmul.f32 -1.442695, %v12019_v42  ;;  %10115 = vmatpush1.bf16.msra.mxu0 %v13866_v38  ;;  %v9606_v31 = vpop.f32.mrb[11].mxu1  ;;  %9948 = vmatprep.subr.bf16.mxu1 %v13871_v40  ;;  %v13916_v40 = vld [vmem:[%s18871_s3 + $0xecc] ss:$40 sps:$4 sm:$0xff]  }
 0x4cd   :  { %v11998_v57 = vmul.f32 -1.442695, %v12020_v45  ;;  %10116 = vmatprep.subr.bf16.mxu0 %v13874_v41  ;;  %v13911_v42 = vld [vmem:[%s18871_s3 + $0x1320] ss:$40 sps:$4 sm:$0xff]   ;;  %v13919_v47 = vld [vmem:[%s18871_s3 + $0x1374] ss:$40 sps:$4 sm:$0xff]  }
 0x4ce   :  { %14302 = vpow2.f32 %v11997_v53  ;;  %v13914_v45 = vld [vmem:[%s18871_s3 + $0xec8] ss:$40 sps:$4 sm:$0xff]   ;;  %v13920_v31 = vld [vmem:[%s18871_s3 + $0xf18] ss:$40 sps:$4 sm:$0xff]  }
 0x4cf   :  { %14304 = vpow2.f32 %v11998_v57  ;;  %9949 = vmatpush1.bf16.msra.mxu1 %v13869_v50  ;;  %v13922_v50 = vld [vmem:[%s18871_s3 + $0xf1c] ss:$40 sps:$4 sm:$0xff]   ;;  %v13917_v53 = vld [vmem:[%s18871_s3 + $0x1370] ss:$40 sps:$4 sm:$0xff]   ;;  %v13928_v57 = vld [vmem:[%s18871_s3 + $0xf6c] ss:$40 sps:$4 sm:$0xff]  }
 0x4d0   :  { %10117 = vmatpush1.bf16.msra.mxu0 %v13872_v51  ;;  %9950 = vmatprep.subr.bf16.mxu1 %v13877_v54  ;;  %v13925_v54 = vld [vmem:[%s18871_s3 + $0x13c4] ss:$40 sps:$4 sm:$0xff]  }
 0x4d1   :  { %10118 = vmatprep.subr.bf16.mxu0 %v13880_v59  ;;  %v13923_v59 = vld [vmem:[%s18871_s3 + $0x13c0] ss:$40 sps:$4 sm:$0xff]  }
 0x4d3   :  { %9951 = vmatpush1.bf16.msra.mxu1 %v13875_v61  ;;  %v13926_v61 = vld [vmem:[%s18871_s3 + $0xf68] ss:$40 sps:$4 sm:$0xff]  }
 0x4d4   :  { %10119 = vmatpush1.bf16.msra.mxu0 %v13878_v0  ;;  %9952 = vmatprep.subr.bf16.mxu1 %v13883_v1  ;;  %v13931_v0 = vld [vmem:[%s18871_s3 + $0x1414] ss:$40 sps:$4 sm:$0xff]  }
 0x4d5   :  { %10120 = vmatprep.subr.bf16.mxu0 %v13886_v5  ;;  %v13934_v1 = vld [vmem:[%s18871_s3 + $0xfbc] ss:$40 sps:$4 sm:$0xff]   ;;  %v13929_v5 = vld [vmem:[%s18871_s3 + $0x1410] ss:$40 sps:$4 sm:$0xff]  }
 0x4d7   :  { %9953 = vmatpush1.bf16.msra.mxu1 %v13881_v28  ;;  %v13932_v28 = vld [vmem:[%s18871_s3 + $0xfb8] ss:$40 sps:$4 sm:$0xff]  }
 0x4d8   :  { %v14303_v4 = vpop.eup %14302  ;;  %10121 = vmatpush1.bf16.msra.mxu0 %v13884_v2  ;;  %9954 = vmatprep.subr.bf16.mxu1 %v13889_v30  ;;  %v13937_v2 = vld [vmem:[%s18871_s3 + $0x1464] ss:$40 sps:$4 sm:$0xff]  }
 0x4d9   :  { %v14305_v49 = vpop.eup %14304  ;;  %v10458_v7 = vadd.f32 1.0, %v14303_v4  ;;  %10122 = vmatprep.subr.bf16.mxu0 %v13892_v11  ;;  %v13940_v30 = vld [vmem:[%s18871_s3 + $0x100c] ss:$40 sps:$4 sm:$0xff]   ;;  %v13935_v11 = vld [vmem:[%s18871_s3 + $0x1460] ss:$40 sps:$4 sm:$0xff]  }
 0x4da   :  { %v10459_v9 = vadd.f32 1.0, %v14305_v49  ;;  %v13943_v4 = vld [vmem:[%s18871_s3 + $0x14b4] ss:$40 sps:$4 sm:$0xff]   ;;  %v13944_v49 = vld [vmem:[%s18871_s3 + $0x1058] ss:$40 sps:$4 sm:$0xff]  }
 0x4db   :  { %14306 = vrcp.f32 %v10458_v7  ;;  %9955 = vmatpush1.bf16.msra.mxu1 %v13887_v24  ;;  %v13938_v24 = vld [vmem:[%s18871_s3 + $0x1008] ss:$40 sps:$4 sm:$0xff]   ;;  %v13949_v7 = vld [vmem:[%s18871_s3 + $0x1504] ss:$40 sps:$4 sm:$0xff]  }
 0x4dc   :  { %14308 = vrcp.f32 %v10459_v9  ;;  %10123 = vmatpush1.bf16.msra.mxu0 %v13890_v6  ;;  %9956 = vmatprep.subr.bf16.mxu1 %v13895_v27  ;;  %v13946_v6 = vld [vmem:[%s18871_s3 + $0x105c] ss:$40 sps:$4 sm:$0xff]   ;;  %v13941_v27 = vld [vmem:[%s18871_s3 + $0x14b0] ss:$40 sps:$4 sm:$0xff]   ;;  %v5610_v9 = vrot.slane %v17976_v21, %v16311_v18 }
 0x4dd   :  { %10124 = vmatprep.subr.bf16.mxu0 %v13898_v8  ;;  %v13952_v8 = vld [vmem:[%s18871_s3 + $0x10ac] ss:$40 sps:$4 sm:$0xff]  }
 0x4df   :  { %9957 = vmatpush1.bf16.msra.mxu1 %v13893_v12  ;;  %v13947_v12 = vld [vmem:[%s18871_s3 + $0x1500] ss:$40 sps:$4 sm:$0xff]  }
 0x4e0   :  { %10125 = vmatpush1.bf16.msra.mxu0 %v13896_v56  ;;  %9958 = vmatprep.subr.bf16.mxu1 %v13901_v14  ;;  %v5614_v56 = vrot.slane %v17976_v21, %v16108_v55  ;;  %v13950_v14 = vld [vmem:[%s18871_s3 + $0x10a8] ss:$40 sps:$4 sm:$0xff]  }
 0x4e1   :  { %10126 = vmatprep.subr.bf16.mxu0 %v13904_v17  ;;  %v13955_v17 = vld [vmem:[%s18871_s3 + $0x1554] ss:$40 sps:$4 sm:$0xff]  }
 0x4e3   :  { %9959 = vmatpush1.bf16.msra.mxu1 %v13899_v22 }
 0x4e4   :  { %10127 = vmatpush1.bf16.msra.mxu0 %v13902_v29  ;;  %9960 = vmatprep.subr.bf16.mxu1 %v13907_v32  ;;  %v13958_v29 = vld [vmem:[%s18871_s3 + $0x10fc] ss:$40 sps:$4 sm:$0xff]  }
 0x4e5   :  { %v14307_v38 = vpop.eup %14306  ;;  %10128 = vmatprep.subr.bf16.mxu0 %v13910_v33 }
 0x4e6   :  { %v14309_v25 = vpop.eup %14308  ;;  %v10542_v41 = vmul.f32 %v14307_v38, %v10495_v10  ;;  %v13961_v38 = vld [vmem:[%s18871_s3 + $0x15a4] ss:$40 sps:$4 sm:$0xff]  }
 0x4e7   :  { %9961 = vmatpush1.bf16.msra.mxu1 %v13905_v34  ;;  %v10543_v13 = vmul.f32 %v14309_v25, %v10499_v36  ;;  %v13953_v34 = vld [vmem:[%s18871_s3 + $0x1550] ss:$40 sps:$4 sm:$0xff]   ;;  %v13964_v25 = vld [vmem:[%s18871_s3 + $0x114c] ss:$40 sps:$4 sm:$0xff]  }
 0x4e8   :  { %10129 = vmatpush1.bf16.msra.mxu0 %v13908_v37  ;;  %9962 = vmatprep.subr.bf16.mxu1 %v13913_v15  ;;  %v13956_v36 = vld [vmem:[%s18871_s3 + $0x10f8] ss:$40 sps:$4 sm:$0xff]  }
 0x4e9   :  { %10130 = vmatprep.subr.bf16.mxu0 %v13916_v40  ;;  %v18108_v51 = vadd.f32 %v10543_v13, %v10542_v41  ;;  %v13959_v41 = vld [vmem:[%s18871_s3 + $0x15a0] ss:$40 sps:$4 sm:$0xff]   ;;  %v13967_v13 = vld [vmem:[%s18871_s3 + $0x15f4] ss:$40 sps:$4 sm:$0xff]  }
 0x4eb   :  { %9963 = vmatpush1.bf16.msra.mxu1 %v13911_v42  ;;  %v13962_v42 = vld [vmem:[%s18871_s3 + $0x1148] ss:$40 sps:$4 sm:$0xff]  }
 0x4ec   :  { %10131 = vmatpush1.bf16.msra.mxu0 %v13914_v45  ;;  %9964 = vmatprep.subr.bf16.mxu1 %v13919_v47  ;;  %v13970_v45 = vld [vmem:[%s18871_s3 + $0x119c] ss:$40 sps:$4 sm:$0xff]   ;;  %v13965_v47 = vld [vmem:[%s18871_s3 + $0x15f0] ss:$40 sps:$4 sm:$0xff]  }
 0x4ed   :  { %10141 = vmatprep.subr.bf16.mxu0 %v13922_v50  ;;  %v13968_v50 = vld [vmem:[%s18871_s3 + $0x1198] ss:$40 sps:$4 sm:$0xff]  }
 0x4ef   :  { %9965 = vmatpush1.bf16.msra.mxu1 %v13917_v53  ;;  %10133 = vmatmul.mubr.bf16.vlgmr.msra.gmra.mrb[16].mxu0 %v16754_v20  ;;  %v13973_v53 = vld [vmem:[%s18871_s3 + $0x1644] ss:$40 sps:$4 sm:$0xff]  }
 0x4f0   :  { %10142 = vmatpush1.bf16.msra.mxu0 %v13920_v31  ;;  %10173 = vmatprep.mubr.bf16.mxu0 %v16762_v48  ;;  %v13976_v31 = vld [vmem:[%s18871_s3 + $0x11ec] ss:$40 sps:$4 sm:$0xff]  }
 0x4f1   :  { %9966 = vmatprep.subr.bf16.mxu1 %v13925_v54  ;;  %10143 = vmatprep.subr.bf16.mxu0 %v13928_v57  ;;  %v13971_v54 = vld [vmem:[%s18871_s3 + $0x1640] ss:$40 sps:$4 sm:$0xff]  }
 0x4f3   :  { %9967 = vmatpush1.bf16.msra.mxu1 %v13923_v59  ;;  %v13974_v59 = vld [vmem:[%s18871_s3 + $0x11e8] ss:$40 sps:$4 sm:$0xff]  }
 0x4f4   :  { %10144 = vmatpush1.bf16.msra.mxu0 %v13926_v61  ;;  %9977 = vmatprep.subr.bf16.mxu1 %v13931_v0  ;;  %v13979_v61 = vld [vmem:[%s18871_s3 + $0x1694] ss:$40 sps:$4 sm:$0xff]  }
 0x4f5   :  { %10145 = vmatprep.subr.bf16.mxu0 %v13934_v1 }
 0x4f6   :  { %9969 = vmatmul.mubr.bf16.vlgmr.msra.gmra.mrb[12].mxu1 %v16955_v3 }
 0x4f7   :  { %9978 = vmatpush1.bf16.msra.mxu1 %v13929_v5  ;;  %11994 = vmatprep.mubr.msk.bf16.mxu1 %vm9399_vm0, %v17323_v58  ;;  %v13982_v5 = vld [vmem:[%s18871_s3 + $0x123c] ss:$40 sps:$4 sm:$0xff]  }
 0x4f8   :  { %10146 = vmatpush1.bf16.msra.mxu0 %v13932_v28  ;;  %9979 = vmatprep.subr.bf16.mxu1 %v13937_v2  ;;  %v13977_v2 = vld [vmem:[%s18871_s3 + $0x1690] ss:$40 sps:$4 sm:$0xff]  }
 0x4f9   :  { %10147 = vmatprep.subr.bf16.mxu0 %v13940_v30  ;;  %v13980_v30 = vld [vmem:[%s18871_s3 + $0x1238] ss:$40 sps:$4 sm:$0xff]  }
 0x4fb   :  { %9980 = vmatpush1.bf16.msra.mxu1 %v13935_v11  ;;  %v13985_v11 = vld [vmem:[%s18871_s3 + $0x16e4] ss:$40 sps:$4 sm:$0xff]  }
 0x4fc   :  { %10148 = vmatpush1.bf16.msra.mxu0 %v13938_v24  ;;  %9981 = vmatprep.subr.bf16.mxu1 %v13943_v4  ;;  %v13988_v24 = vld [vmem:[%s18871_s3 + $0x128c] ss:$40 sps:$4 sm:$0xff]   ;;  %v13983_v4 = vld [vmem:[%s18871_s3 + $0x16e0] ss:$40 sps:$4 sm:$0xff]  }
 0x4fd   :  { %10149 = vmatprep.subr.bf16.mxu0 %v13946_v6  ;;  %v13986_v6 = vld [vmem:[%s18871_s3 + $0x1288] ss:$40 sps:$4 sm:$0xff]  }
 0x4ff   :  { %9982 = vmatpush1.bf16.msra.mxu1 %v13941_v27  ;;  %v13991_v27 = vld [vmem:[%s18871_s3 + $0x1734] ss:$40 sps:$4 sm:$0xff]  }
 0x500   :  { %10150 = vmatpush1.bf16.msra.mxu0 %v13944_v49  ;;  %9983 = vmatprep.subr.bf16.mxu1 %v13949_v7  ;;  %v13994_v49 = vld [vmem:[%s18871_s3 + $0x12dc] ss:$40 sps:$4 sm:$0xff]   ;;  %v10503_v7 = vrot.slane %v18069_v23, %v16311_v18  ;;  %v14000_v18 = vld [vmem:[%s18871_s3 + $0x132c] ss:$40 sps:$4 sm:$0xff]  }
 0x501   :  { %v9806_v22 = vpop.f32.mrb[12].mxu0  ;;  %10151 = vmatprep.subr.bf16.mxu0 %v13952_v8  ;;  %v13989_v8 = vld [vmem:[%s18871_s3 + $0x1730] ss:$40 sps:$4 sm:$0xff]  }
 0x502   :  { %v12021_v32 = vadd.f32 %v9806_v22, %v5610_v9  ;;  %v9808_v33 = vpop.f32.mrb[13].mxu0  ;;  %v10507_v9 = vrot.slane %v18069_v23, %v16108_v55  ;;  %v13995_v55 = vld [vmem:[%s18871_s3 + $0x20] ss:$40 sps:$4 sm:$0xff]  }
 0x503   :  { %v12022_v10 = vadd.f32 %v9808_v33, %v5614_v56  ;;  %9984 = vmatpush1.bf16.msra.mxu1 %v13947_v12  ;;  %v9810_v21 = vpop.f32.mrb[14].mxu0  ;;  %v13992_v12 = vld [vmem:[%s18871_s3 + $0x12d8] ss:$40 sps:$4 sm:$0xff]   ;;  %v13997_v56 = vld [vmem:[%s18871_s3 + $0x24] ss:$40 sps:$4 sm:$0xff]  }
 0x504   :  { %v11999_v37 = vmul.f32 -1.442695, %v12021_v32  ;;  %10152 = vmatpush1.bf16.msra.mxu0 %v13950_v14  ;;  %v9811_v15 = vpop.f32.mrb[15].mxu0  ;;  %9985 = vmatprep.subr.bf16.mxu1 %v13955_v17  ;;  %v13998_v32 = vld [vmem:[%s18871_s3 + $0x1328] ss:$40 sps:$4 sm:$0xff]  }
 0x505   :  { %v12000_v40 = vmul.f32 -1.442695, %v12022_v10  ;;  %10153 = vmatprep.subr.bf16.mxu0 %v13958_v29  ;;  %v14003_v33 = vld [vmem:[%s18871_s3 + $0x74] ss:$40 sps:$4 sm:$0xff]  }
 0x506   :  { %14310 = vpow2.f32 %v11999_v37  ;;  %v14006_v21 = vld [vmem:[%s18871_s3 + $0x137c] ss:$40 sps:$4 sm:$0xff]   ;;  %v14012_v15 = vld [vmem:[%s18871_s3 + $0x13cc] ss:$40 sps:$4 sm:$0xff]  }
 0x507   :  { %14312 = vpow2.f32 %v12000_v40  ;;  %9986 = vmatpush1.bf16.msra.mxu1 %v13953_v34  ;;  %v14009_v37 = vld [vmem:[%s18871_s3 + $0xc4] ss:$40 sps:$4 sm:$0xff]   ;;  %v14015_v40 = vld [vmem:[%s18871_s3 + $0x114] ss:$40 sps:$4 sm:$0xff]  }
 0x508   :  { %10154 = vmatpush1.bf16.msra.mxu0 %v13956_v36  ;;  %9987 = vmatprep.subr.bf16.mxu1 %v13961_v38  ;;  %v14001_v36 = vld [vmem:[%s18871_s3 + $0x70] ss:$40 sps:$4 sm:$0xff]  }
 0x509   :  { %10155 = vmatprep.subr.bf16.mxu0 %v13964_v25  ;;  %v14010_v38 = vld [vmem:[%s18871_s3 + $0x13c8] ss:$40 sps:$4 sm:$0xff]   ;;  %v14018_v25 = vld [vmem:[%s18871_s3 + $0x141c] ss:$40 sps:$4 sm:$0xff]  }
 0x50b   :  { %9988 = vmatpush1.bf16.msra.mxu1 %v13959_v41  ;;  %v14013_v41 = vld [vmem:[%s18871_s3 + $0x110] ss:$40 sps:$4 sm:$0xff]  }
 0x50c   :  { %10156 = vmatpush1.bf16.msra.mxu0 %v13962_v42  ;;  %9989 = vmatprep.subr.bf16.mxu1 %v13967_v13  ;;  %v14016_v42 = vld [vmem:[%s18871_s3 + $0x1418] ss:$40 sps:$4 sm:$0xff]   ;;  %v14021_v13 = vld [vmem:[%s18871_s3 + $0x164] ss:$40 sps:$4 sm:$0xff]  }
 0x50d   :  { %10157 = vmatprep.subr.bf16.mxu0 %v13970_v45  ;;  %v14024_v45 = vld [vmem:[%s18871_s3 + $0x146c] ss:$40 sps:$4 sm:$0xff]  }
 0x50f   :  { %9990 = vmatpush1.bf16.msra.mxu1 %v13965_v47  ;;  %v14019_v47 = vld [vmem:[%s18871_s3 + $0x160] ss:$40 sps:$4 sm:$0xff]  }
 0x510   :  { %v14311_v57 = vpop.eup %14310  ;;  %10158 = vmatpush1.bf16.msra.mxu0 %v13968_v50  ;;  %9991 = vmatprep.subr.bf16.mxu1 %v13973_v53  ;;  %v14022_v50 = vld [vmem:[%s18871_s3 + $0x1468] ss:$40 sps:$4 sm:$0xff]   ;;  %v14027_v53 = vld [vmem:[%s18871_s3 + $0x1b4] ss:$40 sps:$4 sm:$0xff]  }
 0x511   :  { %v14313_v0 = vpop.eup %14312  ;;  %v10460_v1 = vadd.f32 1.0, %v14311_v57  ;;  %10159 = vmatprep.subr.bf16.mxu0 %v13976_v31  ;;  %v14030_v31 = vld [vmem:[%s18871_s3 + $0x14bc] ss:$40 sps:$4 sm:$0xff]   ;;  %v14028_v57 = vld [vmem:[%s18871_s3 + $0x14b8] ss:$40 sps:$4 sm:$0xff]  }
 0x512   :  { %v10461_v28 = vadd.f32 1.0, %v14313_v0  ;;  %v14031_v0 = vld [vmem:[%s18871_s3 + $0x200] ss:$40 sps:$4 sm:$0xff]  }
 0x513   :  { %14314 = vrcp.f32 %v10460_v1  ;;  %9992 = vmatpush1.bf16.msra.mxu1 %v13971_v54  ;;  %v14025_v54 = vld [vmem:[%s18871_s3 + $0x1b0] ss:$40 sps:$4 sm:$0xff]  }
 0x514   :  { %14316 = vrcp.f32 %v10461_v28  ;;  %10160 = vmatpush1.bf16.msra.mxu0 %v13974_v59  ;;  %9993 = vmatprep.subr.bf16.mxu1 %v13979_v61  ;;  %v14033_v59 = vld [vmem:[%s18871_s3 + $0x204] ss:$40 sps:$4 sm:$0xff]   ;;  %v14034_v1 = vld [vmem:[%s18871_s3 + $0x1508] ss:$40 sps:$4 sm:$0xff]  }
 0x515   :  { %10161 = vmatprep.subr.bf16.mxu0 %v13982_v5  ;;  %v14036_v61 = vld [vmem:[%s18871_s3 + $0x150c] ss:$40 sps:$4 sm:$0xff]   ;;  %v14042_v28 = vld [vmem:[%s18871_s3 + $0x155c] ss:$40 sps:$4 sm:$0xff]  }
 0x516   :  { %v14039_v5 = vld [vmem:[%s18871_s3 + $0x254] ss:$40 sps:$4 sm:$0xff]  }
 0x517   :  { %9994 = vmatpush1.bf16.msra.mxu1 %v13977_v2  ;;  %v14037_v2 = vld [vmem:[%s18871_s3 + $0x250] ss:$40 sps:$4 sm:$0xff]  }
 0x518   :  { %10162 = vmatpush1.bf16.msra.mxu0 %v13980_v30  ;;  %9995 = vmatprep.subr.bf16.mxu1 %v13985_v11  ;;  %v14040_v30 = vld [vmem:[%s18871_s3 + $0x1558] ss:$40 sps:$4 sm:$0xff]   ;;  %v14045_v11 = vld [vmem:[%s18871_s3 + $0x2a4] ss:$40 sps:$4 sm:$0xff]  }
 0x519   :  { %10163 = vmatprep.subr.bf16.mxu0 %v13988_v24  ;;  %v14048_v24 = vld [vmem:[%s18871_s3 + $0x15ac] ss:$40 sps:$4 sm:$0xff]  }
 0x51b   :  { %9996 = vmatpush1.bf16.msra.mxu1 %v13983_v4  ;;  %v14043_v4 = vld [vmem:[%s18871_s3 + $0x2a0] ss:$40 sps:$4 sm:$0xff]  }
 0x51c   :  { %10164 = vmatpush1.bf16.msra.mxu0 %v13986_v6  ;;  %9997 = vmatprep.subr.bf16.mxu1 %v13991_v27  ;;  %v14046_v6 = vld [vmem:[%s18871_s3 + $0x15a8] ss:$40 sps:$4 sm:$0xff]   ;;  %v14051_v27 = vld [vmem:[%s18871_s3 + $0x2f4] ss:$40 sps:$4 sm:$0xff]  }
 0x51d   :  { %v14315_v14 = vpop.eup %14314  ;;  %10165 = vmatprep.subr.bf16.mxu0 %v13994_v49  ;;  %v14054_v49 = vld [vmem:[%s18871_s3 + $0x15fc] ss:$40 sps:$4 sm:$0xff]  }
 0x51e   :  { %v14317_v17 = vpop.eup %14316  ;;  %v10544_v22 = vmul.f32 %v14315_v14, %v10503_v7  ;;  %v14049_v7 = vld [vmem:[%s18871_s3 + $0x2f0] ss:$40 sps:$4 sm:$0xff]  }
 0x51f   :  { %9998 = vmatpush1.bf16.msra.mxu1 %v13989_v8  ;;  %v10545_v29 = vmul.f32 %v14317_v17, %v10507_v9  ;;  %v14052_v8 = vld [vmem:[%s18871_s3 + $0x15f8] ss:$40 sps:$4 sm:$0xff]   ;;  %v14057_v9 = vld [vmem:[%s18871_s3 + $0x344] ss:$40 sps:$4 sm:$0xff]   ;;  %v14058_v14 = vld [vmem:[%s18871_s3 + $0x1648] ss:$40 sps:$4 sm:$0xff]  }
 0x520   :  { %10166 = vmatpush1.bf16.msra.mxu0 %v13992_v12  ;;  %10223 = vmatprep.subr.bf16.mxu1 %v13997_v56  ;;  %v10553_v10 = vadd.f32 %v18108_v51, %v10544_v22  ;;  %v14004_v51 = vld [vmem:[%s18871_s3 + $0x1378] ss:$40 sps:$4 sm:$0xff]   ;;  %v14060_v12 = vld [vmem:[%s18871_s3 + $0x164c] ss:$40 sps:$4 sm:$0xff]   ;;  %v14066_v17 = vld [vmem:[%s18871_s3 + $0x169c] ss:$40 sps:$4 sm:$0xff]  }
 0x521   :  { %10167 = vmatprep.subr.bf16.mxu0 %v14000_v18  ;;  %v14055_v56 = vld [vmem:[%s18871_s3 + $0x340] ss:$40 sps:$4 sm:$0xff]   ;;  %v14063_v18 = vld [vmem:[%s18871_s3 + $0x394] ss:$40 sps:$4 sm:$0xff]   ;;  %v14061_v22 = vld [vmem:[%s18871_s3 + $0x390] ss:$40 sps:$4 sm:$0xff]  }
 0x522   :  { %10010 = vmatmul.mubr.bf16.vlgmr.msra.gmra.mrb[12].mxu1 %v17331_v63  ;;  %v18293_v34 = vadd.f32 %v10553_v10, %v10545_v29  ;;  %v14069_v29 = vld [vmem:[%s18871_s3 + $0x3e4] ss:$40 sps:$4 sm:$0xff]   ;;  %v14070_v10 = vld [vmem:[%s18871_s3 + $0x16e8] ss:$40 sps:$4 sm:$0xff]  }
 0x523   :  { %10224 = vmatpush1.bf16.msra.mxu1 %v13995_v55  ;;  %10255 = vmatprep.mubr.bf16.mxu1 %v16044_v35  ;;  %v14007_v35 = vld [vmem:[%s18871_s3 + $0xc0] ss:$40 sps:$4 sm:$0xff]  }
 0x524   :  { %10168 = vmatpush1.bf16.msra.mxu0 %v13998_v32  ;;  %10225 = vmatprep.subr.bf16.mxu1 %v14003_v33  ;;  %v14064_v55 = vld [vmem:[%s18871_s3 + $0x1698] ss:$40 sps:$4 sm:$0xff]   ;;  %v14072_v32 = vld [vmem:[%s18871_s3 + $0x16ec] ss:$40 sps:$4 sm:$0xff]  }
 0x525   :  { %10169 = vmatprep.subr.bf16.mxu0 %v14006_v21  ;;  %v14067_v33 = vld [vmem:[%s18871_s3 + $0x3e0] ss:$40 sps:$4 sm:$0xff]   ;;  %v14075_v21 = vld [vmem:[%s18871_s3 + $0x434] ss:$40 sps:$4 sm:$0xff]  }
 0x527   :  { %10226 = vmatpush1.bf16.msra.mxu1 %v14001_v36  ;;  %v14078_v36 = vld [vmem:[%s18871_s3 + $0x173c] ss:$40 sps:$4 sm:$0xff]  }
 0x528   :  { %10170 = vmatpush1.bf16.msra.mxu0 %v14004_v51  ;;  %10227 = vmatprep.subr.bf16.mxu1 %v14009_v37  ;;  %v14073_v51 = vld [vmem:[%s18871_s3 + $0x430] ss:$40 sps:$4 sm:$0xff]  }
 0x529   :  { %10171 = vmatprep.subr.bf16.mxu0 %v14012_v15  ;;  %v14076_v37 = vld [vmem:[%s18871_s3 + $0x1738] ss:$40 sps:$4 sm:$0xff]   ;;  %v14081_v15 = vld [vmem:[%s18871_s3 + $0x484] ss:$40 sps:$4 sm:$0xff]  }
 0x52b   :  { %10228 = vmatpush1.bf16.msra.mxu1 %v14007_v35  ;;  %v14079_v35 = vld [vmem:[%s18871_s3 + $0x480] ss:$40 sps:$4 sm:$0xff]  }
 0x52c   :  { %10172 = vmatpush1.bf16.msra.mxu0 %v14010_v38  ;;  %10229 = vmatprep.subr.bf16.mxu1 %v14015_v40  ;;  %v14084_v38 = vld [vmem:[%s18871_s3 + $0x4d4] ss:$40 sps:$4 sm:$0xff]   ;;  %v14082_v40 = vld [vmem:[%s18871_s3 + $0x4d0] ss:$40 sps:$4 sm:$0xff]  }
 0x52d   :  { %10182 = vmatprep.subr.bf16.mxu0 %v14018_v25  ;;  %v14087_v25 = vld [vmem:[%s18871_s3 + $0x524] ss:$40 sps:$4 sm:$0xff]  }
 0x52f   :  { %10174 = vmatmul.mubr.bf16.vlgmr.msra.gmra.mrb[16].mxu0 %v16955_v3  ;;  %10230 = vmatpush1.bf16.msra.mxu1 %v14013_v41  ;;  %v14085_v41 = vld [vmem:[%s18871_s3 + $0x520] ss:$40 sps:$4 sm:$0xff]  }
 0x530   :  { %10183 = vmatpush1.bf16.msra.mxu0 %v14016_v42  ;;  %11995 = vmatprep.mubr.msk.bf16.mxu0 %vm9399_vm0, %v17323_v58  ;;  %v14090_v42 = vld [vmem:[%s18871_s3 + $0x574] ss:$40 sps:$4 sm:$0xff]  }
 0x531   :  { %10231 = vmatprep.subr.bf16.mxu1 %v14021_v13  ;;  %10184 = vmatprep.subr.bf16.mxu0 %v14024_v45  ;;  %v14088_v13 = vld [vmem:[%s18871_s3 + $0x570] ss:$40 sps:$4 sm:$0xff]   ;;  %v14093_v45 = vld [vmem:[%s18871_s3 + $0x5c4] ss:$40 sps:$4 sm:$0xff]  }
 0x533   :  { %10232 = vmatpush1.bf16.msra.mxu1 %v14019_v47  ;;  %v14091_v47 = vld [vmem:[%s18871_s3 + $0x5c0] ss:$40 sps:$4 sm:$0xff]  }
 0x534   :  { %10185 = vmatpush1.bf16.msra.mxu0 %v14022_v50  ;;  %10233 = vmatprep.subr.bf16.mxu1 %v14027_v53  ;;  %v14099_v50 = vld [vmem:[%s18871_s3 + $0x664] ss:$40 sps:$4 sm:$0xff]   ;;  %v14097_v53 = vld [vmem:[%s18871_s3 + $0x660] ss:$40 sps:$4 sm:$0xff]  }
 0x535   :  { %10186 = vmatprep.subr.bf16.mxu0 %v14030_v31  ;;  %v14102_v31 = vld [vmem:[%s18871_s3 + $0x6b4] ss:$40 sps:$4 sm:$0xff]  }
 0x537   :  { %10234 = vmatpush1.bf16.msra.mxu1 %v14025_v54  ;;  %v14100_v54 = vld [vmem:[%s18871_s3 + $0x6b0] ss:$40 sps:$4 sm:$0xff]  }
 0x538   :  { %10187 = vmatpush1.bf16.msra.mxu0 %v14028_v57  ;;  %10235 = vmatprep.subr.bf16.mxu1 %v14033_v59  ;;  %v14105_v57 = vld [vmem:[%s18871_s3 + $0x704] ss:$40 sps:$4 sm:$0xff]   ;;  %v14103_v59 = vld [vmem:[%s18871_s3 + $0x700] ss:$40 sps:$4 sm:$0xff]  }
 0x539   :  { %10188 = vmatprep.subr.bf16.mxu0 %v14036_v61  ;;  %v14108_v61 = vld [vmem:[%s18871_s3 + $0x754] ss:$40 sps:$4 sm:$0xff]  }
 0x53b   :  { %10236 = vmatpush1.bf16.msra.mxu1 %v14031_v0  ;;  %v14106_v0 = vld [vmem:[%s18871_s3 + $0x750] ss:$40 sps:$4 sm:$0xff]  }
 0x53c   :  { %10189 = vmatpush1.bf16.msra.mxu0 %v14034_v1  ;;  %10237 = vmatprep.subr.bf16.mxu1 %v14039_v5  ;;  %v14111_v1 = vld [vmem:[%s18871_s3 + $0x7a4] ss:$40 sps:$4 sm:$0xff]   ;;  %v14109_v5 = vld [vmem:[%s18871_s3 + $0x7a0] ss:$40 sps:$4 sm:$0xff]  }
 0x53d   :  { %10190 = vmatprep.subr.bf16.mxu0 %v14042_v28  ;;  %v14114_v28 = vld [vmem:[%s18871_s3 + $0x7f4] ss:$40 sps:$4 sm:$0xff]  }
 0x53f   :  { %10238 = vmatpush1.bf16.msra.mxu1 %v14037_v2  ;;  %v14112_v2 = vld [vmem:[%s18871_s3 + $0x7f0] ss:$40 sps:$4 sm:$0xff]  }
 0x540   :  { %10191 = vmatpush1.bf16.msra.mxu0 %v14040_v30  ;;  %10239 = vmatprep.subr.bf16.mxu1 %v14045_v11  ;;  %v14117_v30 = vld [vmem:[%s18871_s3 + $0x844] ss:$40 sps:$4 sm:$0xff]   ;;  %v14115_v11 = vld [vmem:[%s18871_s3 + $0x840] ss:$40 sps:$4 sm:$0xff]  }
 0x541   :  { %10192 = vmatprep.subr.bf16.mxu0 %v14048_v24  ;;  %v14120_v24 = vld [vmem:[%s18871_s3 + $0x894] ss:$40 sps:$4 sm:$0xff]  }
 0x543   :  { %10240 = vmatpush1.bf16.msra.mxu1 %v14043_v4  ;;  %v14118_v4 = vld [vmem:[%s18871_s3 + $0x890] ss:$40 sps:$4 sm:$0xff]  }
 0x544   :  { %10193 = vmatpush1.bf16.msra.mxu0 %v14046_v6  ;;  %10241 = vmatprep.subr.bf16.mxu1 %v14051_v27  ;;  %v14123_v6 = vld [vmem:[%s18871_s3 + $0x8e4] ss:$40 sps:$4 sm:$0xff]   ;;  %v14121_v27 = vld [vmem:[%s18871_s3 + $0x8e0] ss:$40 sps:$4 sm:$0xff]  }
 0x545   :  { %10194 = vmatprep.subr.bf16.mxu0 %v14054_v49  ;;  %v14126_v49 = vld [vmem:[%s18871_s3 + $0x934] ss:$40 sps:$4 sm:$0xff]  }
 0x547   :  { %10242 = vmatpush1.bf16.msra.mxu1 %v14049_v7  ;;  %v14124_v7 = vld [vmem:[%s18871_s3 + $0x930] ss:$40 sps:$4 sm:$0xff]  }
 0x548   :  { %10195 = vmatpush1.bf16.msra.mxu0 %v14052_v8  ;;  %10243 = vmatprep.subr.bf16.mxu1 %v14057_v9  ;;  %v14129_v8 = vld [vmem:[%s18871_s3 + $0x984] ss:$40 sps:$4 sm:$0xff]   ;;  %v14127_v9 = vld [vmem:[%s18871_s3 + $0x980] ss:$40 sps:$4 sm:$0xff]  }
 0x549   :  { %10196 = vmatprep.subr.bf16.mxu0 %v14060_v12  ;;  %v14132_v12 = vld [vmem:[%s18871_s3 + $0x9d4] ss:$40 sps:$4 sm:$0xff]  }
 0x54b   :  { %10244 = vmatpush1.bf16.msra.mxu1 %v14055_v56  ;;  %v14130_v56 = vld [vmem:[%s18871_s3 + $0x9d0] ss:$40 sps:$4 sm:$0xff]  }
 0x54c   :  { %10197 = vmatpush1.bf16.msra.mxu0 %v14058_v14  ;;  %10245 = vmatprep.subr.bf16.mxu1 %v14063_v18  ;;  %v14135_v14 = vld [vmem:[%s18871_s3 + $0xa24] ss:$40 sps:$4 sm:$0xff]   ;;  %v14133_v18 = vld [vmem:[%s18871_s3 + $0xa20] ss:$40 sps:$4 sm:$0xff]  }
 0x54d   :  { %10198 = vmatprep.subr.bf16.mxu0 %v14066_v17  ;;  %v14138_v17 = vld [vmem:[%s18871_s3 + $0xa74] ss:$40 sps:$4 sm:$0xff]  }
 0x54f   :  { %10246 = vmatpush1.bf16.msra.mxu1 %v14061_v22  ;;  %v14136_v22 = vld [vmem:[%s18871_s3 + $0xa70] ss:$40 sps:$4 sm:$0xff]  }
 0x550   :  { %10199 = vmatpush1.bf16.msra.mxu0 %v14064_v55  ;;  %10247 = vmatprep.subr.bf16.mxu1 %v14069_v29  ;;  %v14141_v55 = vld [vmem:[%s18871_s3 + $0xac4] ss:$40 sps:$4 sm:$0xff]   ;;  %v14139_v29 = vld [vmem:[%s18871_s3 + $0xac0] ss:$40 sps:$4 sm:$0xff]  }
 0x551   :  { %10200 = vmatprep.subr.bf16.mxu0 %v14072_v32  ;;  %v14147_v32 = vld [vmem:[%s18871_s3 + $0xb64] ss:$40 sps:$4 sm:$0xff]  }
 0x553   :  { %10248 = vmatpush1.bf16.msra.mxu1 %v14067_v33  ;;  %v14145_v33 = vld [vmem:[%s18871_s3 + $0xb60] ss:$40 sps:$4 sm:$0xff]  }
 0x554   :  { %10201 = vmatpush1.bf16.msra.mxu0 %v14070_v10  ;;  %10249 = vmatprep.subr.bf16.mxu1 %v14075_v21  ;;  %v14150_v10 = vld [vmem:[%s18871_s3 + $0xbb4] ss:$40 sps:$4 sm:$0xff]   ;;  %v14148_v21 = vld [vmem:[%s18871_s3 + $0xbb0] ss:$40 sps:$4 sm:$0xff]  }
 0x555   :  { %10202 = vmatprep.subr.bf16.mxu0 %v14078_v36  ;;  %v14153_v36 = vld [vmem:[%s18871_s3 + $0xc04] ss:$40 sps:$4 sm:$0xff]  }
 0x557   :  { %10250 = vmatpush1.bf16.msra.mxu1 %v14073_v51  ;;  %v14151_v51 = vld [vmem:[%s18871_s3 + $0xc00] ss:$40 sps:$4 sm:$0xff]  }
 0x558   :  { %10203 = vmatpush1.bf16.msra.mxu0 %v14076_v37  ;;  %10251 = vmatprep.subr.bf16.mxu1 %v14081_v15  ;;  %v14156_v37 = vld [vmem:[%s18871_s3 + $0xc54] ss:$40 sps:$4 sm:$0xff]   ;;  %v14154_v15 = vld [vmem:[%s18871_s3 + $0xc50] ss:$40 sps:$4 sm:$0xff]  }
 0x55b   :  { %10215 = vmatmul.mubr.bf16.vlgmr.msra.gmra.mrb[16].mxu0 %v17331_v63  ;;  %10252 = vmatpush1.bf16.msra.mxu1 %v14079_v35  ;;  %v14159_v35 = vld [vmem:[%s18871_s3 + $0xca4] ss:$40 sps:$4 sm:$0xff]  }
 0x55c   :  { %10253 = vmatprep.subr.bf16.mxu1 %v14084_v38  ;;  %v14157_v38 = vld [vmem:[%s18871_s3 + $0xca0] ss:$40 sps:$4 sm:$0xff]  }
 0x55f   :  { %10254 = vmatpush1.bf16.msra.mxu1 %v14082_v40  ;;  %v14162_v40 = vld [vmem:[%s18871_s3 + $0xcf4] ss:$40 sps:$4 sm:$0xff]  }
 0x560   :  { %10264 = vmatprep.subr.bf16.mxu1 %v14087_v25  ;;  %v14160_v25 = vld [vmem:[%s18871_s3 + $0xcf0] ss:$40 sps:$4 sm:$0xff]  }
 0x562   :  { %10256 = vmatmul.mubr.bf16.vlgmr.msra.gmra.mrb[16].mxu1 %v16245_v60  ;;  %v14096_v60 = vld [vmem:[%s18871_s3 + $0x614] ss:$40 sps:$4 sm:$0xff]  }
 0x563   :  { %10265 = vmatpush1.bf16.msra.mxu1 %v14085_v41  ;;  %10296 = vmatprep.mubr.bf16.mxu1 %v16250_v62  ;;  %v14094_v62 = vld [vmem:[%s18871_s3 + $0x610] ss:$40 sps:$4 sm:$0xff]   ;;  %v14165_v41 = vld [vmem:[%s18871_s3 + $0xd44] ss:$40 sps:$4 sm:$0xff]  }
 0x564   :  { %10266 = vmatprep.subr.bf16.mxu1 %v14090_v42  ;;  %v14163_v42 = vld [vmem:[%s18871_s3 + $0xd40] ss:$40 sps:$4 sm:$0xff]  }
 0x567   :  { %10267 = vmatpush1.bf16.msra.mxu1 %v14088_v13  ;;  %v14168_v13 = vld [vmem:[%s18871_s3 + $0xd94] ss:$40 sps:$4 sm:$0xff]  }
 0x568   :  { %10268 = vmatprep.subr.bf16.mxu1 %v14093_v45  ;;  %v14166_v45 = vld [vmem:[%s18871_s3 + $0xd90] ss:$40 sps:$4 sm:$0xff]  }
 0x56b   :  { %10269 = vmatpush1.bf16.msra.mxu1 %v14091_v47  ;;  %v14171_v47 = vld [vmem:[%s18871_s3 + $0xde4] ss:$40 sps:$4 sm:$0xff]  }
 0x56c   :  { %10270 = vmatprep.subr.bf16.mxu1 %v14096_v60  ;;  %v14169_v60 = vld [vmem:[%s18871_s3 + $0xde0] ss:$40 sps:$4 sm:$0xff]  }
 0x56f   :  { %10271 = vmatpush1.bf16.msra.mxu1 %v14094_v62  ;;  %v14174_v62 = vld [vmem:[%s18871_s3 + $0xe34] ss:$40 sps:$4 sm:$0xff]  }
 0x570   :  { %10272 = vmatprep.subr.bf16.mxu1 %v14099_v50  ;;  %v14172_v50 = vld [vmem:[%s18871_s3 + $0xe30] ss:$40 sps:$4 sm:$0xff]  }
 0x573   :  { %10273 = vmatpush1.bf16.msra.mxu1 %v14097_v53  ;;  %v14177_v53 = vld [vmem:[%s18871_s3 + $0xe84] ss:$40 sps:$4 sm:$0xff]  }
 0x574   :  { %10274 = vmatprep.subr.bf16.mxu1 %v14102_v31  ;;  %v14175_v31 = vld [vmem:[%s18871_s3 + $0xe80] ss:$40 sps:$4 sm:$0xff]  }
 0x577   :  { %10275 = vmatpush1.bf16.msra.mxu1 %v14100_v54  ;;  %v14180_v54 = vld [vmem:[%s18871_s3 + $0xed4] ss:$40 sps:$4 sm:$0xff]  }
 0x578   :  { %10276 = vmatprep.subr.bf16.mxu1 %v14105_v57  ;;  %v14178_v57 = vld [vmem:[%s18871_s3 + $0xed0] ss:$40 sps:$4 sm:$0xff]  }
 0x57b   :  { %10277 = vmatpush1.bf16.msra.mxu1 %v14103_v59  ;;  %v14183_v59 = vld [vmem:[%s18871_s3 + $0xf24] ss:$40 sps:$4 sm:$0xff]  }
 0x57c   :  { %10278 = vmatprep.subr.bf16.mxu1 %v14108_v61  ;;  %v14181_v61 = vld [vmem:[%s18871_s3 + $0xf20] ss:$40 sps:$4 sm:$0xff]  }
 0x57f   :  { %10279 = vmatpush1.bf16.msra.mxu1 %v14106_v0  ;;  %v14186_v0 = vld [vmem:[%s18871_s3 + $0xf74] ss:$40 sps:$4 sm:$0xff]  }
 0x580   :  { %10280 = vmatprep.subr.bf16.mxu1 %v14111_v1  ;;  %v14184_v1 = vld [vmem:[%s18871_s3 + $0xf70] ss:$40 sps:$4 sm:$0xff]  }
 0x583   :  { %10281 = vmatpush1.bf16.msra.mxu1 %v14109_v5  ;;  %v14189_v5 = vld [vmem:[%s18871_s3 + $0xfc4] ss:$40 sps:$4 sm:$0xff]  }
 0x584   :  { %10282 = vmatprep.subr.bf16.mxu1 %v14114_v28  ;;  %v14187_v28 = vld [vmem:[%s18871_s3 + $0xfc0] ss:$40 sps:$4 sm:$0xff]  }
 0x587   :  { %10283 = vmatpush1.bf16.msra.mxu1 %v14112_v2  ;;  %v14195_v2 = vld [vmem:[%s18871_s3 + $0x1064] ss:$40 sps:$4 sm:$0xff]  }
 0x588   :  { %10284 = vmatprep.subr.bf16.mxu1 %v14117_v30  ;;  %v14193_v30 = vld [vmem:[%s18871_s3 + $0x1060] ss:$40 sps:$4 sm:$0xff]  }
 0x58b   :  { %10285 = vmatpush1.bf16.msra.mxu1 %v14115_v11  ;;  %v14198_v11 = vld [vmem:[%s18871_s3 + $0x10b4] ss:$40 sps:$4 sm:$0xff]  }
 0x58c   :  { %10286 = vmatprep.subr.bf16.mxu1 %v14120_v24  ;;  %v18696_v24 = vld [vmem:[%s18873_s4] sm:$0xff] }
 0x58f   :  { %10287 = vmatpush1.bf16.msra.mxu1 %v14118_v4  ;;  %v5618_v4 = vrot.slane %v18696_v24, %v16674_v43 }
 0x590   :  { %10288 = vmatprep.subr.bf16.mxu1 %v14123_v6  ;;  %v5622_v6 = vrot.slane %v18696_v24, %v16677_v44 }
 0x593   :  { %10289 = vmatpush1.bf16.msra.mxu1 %v14121_v27  ;;  %v14196_v27 = vld [vmem:[%s18871_s3 + $0x10b0] ss:$40 sps:$4 sm:$0xff]  }
 0x594   :  { %10290 = vmatprep.subr.bf16.mxu1 %v14126_v49  ;;  %v14201_v49 = vld [vmem:[%s18871_s3 + $0x1104] ss:$40 sps:$4 sm:$0xff]  }
 0x597   :  { %10291 = vmatpush1.bf16.msra.mxu1 %v14124_v7 }
 0x598   :  { %10292 = vmatprep.subr.bf16.mxu1 %v14129_v8 }
 0x59b   :  { %10293 = vmatpush1.bf16.msra.mxu1 %v14127_v9 }
 0x59c   :  { %10294 = vmatprep.subr.bf16.mxu1 %v14132_v12 }
 0x59f   :  { %10295 = vmatpush1.bf16.msra.mxu1 %v14130_v56 }
 0x5a0   :  { %10305 = vmatprep.subr.bf16.mxu1 %v14135_v14  ;;  %v14199_v14 = vld [vmem:[%s18871_s3 + $0x1100] ss:$40 sps:$4 sm:$0xff]  }
 0x5a2   :  { %10297 = vmatmul.mubr.bf16.vlgmr.msra.gmra.mrb[16].mxu1 %v16459_v26  ;;  %v14144_v26 = vld [vmem:[%s18871_s3 + $0xb14] ss:$40 sps:$4 sm:$0xff]  }
 0x5a3   :  { %10306 = vmatpush1.bf16.msra.mxu1 %v14133_v18  ;;  %10337 = vmatprep.mubr.bf16.mxu1 %v16746_v39  ;;  %v14142_v39 = vld [vmem:[%s18871_s3 + $0xb10] ss:$40 sps:$4 sm:$0xff]  }
 0x5a4   :  { %10307 = vmatprep.subr.bf16.mxu1 %v14138_v17 }
 0x5a7   :  { %10308 = vmatpush1.bf16.msra.mxu1 %v14136_v22  ;;  %v14204_v22 = vld [vmem:[%s18871_s3 + $0x1154] ss:$40 sps:$4 sm:$0xff]  }
 0x5a8   :  { %10309 = vmatprep.subr.bf16.mxu1 %v14141_v55 }
 0x5ab   :  { %10310 = vmatpush1.bf16.msra.mxu1 %v14139_v29  ;;  %v14202_v29 = vld [vmem:[%s18871_s3 + $0x1150] ss:$40 sps:$4 sm:$0xff]  }
 0x5ac   :  { %10311 = vmatprep.subr.bf16.mxu1 %v14144_v26  ;;  %v14207_v26 = vld [vmem:[%s18871_s3 + $0x11a4] ss:$40 sps:$4 sm:$0xff]  }
 0x5af   :  { %10312 = vmatpush1.bf16.msra.mxu1 %v14142_v39  ;;  %v14205_v39 = vld [vmem:[%s18871_s3 + $0x11a0] ss:$40 sps:$4 sm:$0xff]  }
 0x5b0   :  { %10313 = vmatprep.subr.bf16.mxu1 %v14147_v32  ;;  %v14210_v32 = vld [vmem:[%s18871_s3 + $0x11f4] ss:$40 sps:$4 sm:$0xff]  }
 0x5b3   :  { %10314 = vmatpush1.bf16.msra.mxu1 %v14145_v33  ;;  %v14208_v33 = vld [vmem:[%s18871_s3 + $0x11f0] ss:$40 sps:$4 sm:$0xff]  }
 0x5b4   :  { %10315 = vmatprep.subr.bf16.mxu1 %v14150_v10 }
 0x5b7   :  { %10316 = vmatpush1.bf16.msra.mxu1 %v14148_v21  ;;  %v14213_v21 = vld [vmem:[%s18871_s3 + $0x1244] ss:$40 sps:$4 sm:$0xff]  }
 0x5b8   :  { %10317 = vmatprep.subr.bf16.mxu1 %v14153_v36 }
 0x5bb   :  { %10318 = vmatpush1.bf16.msra.mxu1 %v14151_v51 }
 0x5bc   :  { %10319 = vmatprep.subr.bf16.mxu1 %v14156_v37 }
 0x5bf   :  { %10320 = vmatpush1.bf16.msra.mxu1 %v14154_v15  ;;  %v14211_v15 = vld [vmem:[%s18871_s3 + $0x1240] ss:$40 sps:$4 sm:$0xff]  }
 0x5c0   :  { %10321 = vmatprep.subr.bf16.mxu1 %v14159_v35  ;;  %v14216_v35 = vld [vmem:[%s18871_s3 + $0x1294] ss:$40 sps:$4 sm:$0xff]  }
 0x5c3   :  { %10322 = vmatpush1.bf16.msra.mxu1 %v14157_v38  ;;  %v14214_v38 = vld [vmem:[%s18871_s3 + $0x1290] ss:$40 sps:$4 sm:$0xff]  }
 0x5c4   :  { %10323 = vmatprep.subr.bf16.mxu1 %v14162_v40  ;;  %v14219_v40 = vld [vmem:[%s18871_s3 + $0x12e4] ss:$40 sps:$4 sm:$0xff]  }
 0x5c7   :  { %10324 = vmatpush1.bf16.msra.mxu1 %v14160_v25  ;;  %v10511_v25 = vrot.slane %v18069_v23, %v16674_v43  ;;  %v14220_v43 = vld [vmem:[%s18871_s3 + $0x1330] ss:$40 sps:$4 sm:$0xff]  }
 0x5c8   :  { %10325 = vmatprep.subr.bf16.mxu1 %v14165_v41  ;;  %v14217_v41 = vld [vmem:[%s18871_s3 + $0x12e0] ss:$40 sps:$4 sm:$0xff]  }
 0x5cb   :  { %10326 = vmatpush1.bf16.msra.mxu1 %v14163_v42  ;;  %v10515_v42 = vrot.slane %v18069_v23, %v16677_v44 }
 0x5cc   :  { %10327 = vmatprep.subr.bf16.mxu1 %v14168_v13  ;;  %v14222_v13 = vld [vmem:[%s18871_s3 + $0x1334] ss:$40 sps:$4 sm:$0xff]  }
 0x5cf   :  { %10328 = vmatpush1.bf16.msra.mxu1 %v14166_v45 }
 0x5d0   :  { %10329 = vmatprep.subr.bf16.mxu1 %v14171_v47 }
 0x5d3   :  { %10330 = vmatpush1.bf16.msra.mxu1 %v14169_v60 }
 0x5d4   :  { %10331 = vmatprep.subr.bf16.mxu1 %v14174_v62 }
 0x5d7   :  { %10332 = vmatpush1.bf16.msra.mxu1 %v14172_v50  ;;  %v14225_v50 = vld [vmem:[%s18871_s3 + $0x1384] ss:$40 sps:$4 sm:$0xff]  }
 0x5d8   :  { %10333 = vmatprep.subr.bf16.mxu1 %v14177_v53  ;;  %v14223_v53 = vld [vmem:[%s18871_s3 + $0x1380] ss:$40 sps:$4 sm:$0xff]  }
 0x5db   :  { %10334 = vmatpush1.bf16.msra.mxu1 %v14175_v31  ;;  %v14228_v31 = vld [vmem:[%s18871_s3 + $0x13d4] ss:$40 sps:$4 sm:$0xff]  }
 0x5dc   :  { %10335 = vmatprep.subr.bf16.mxu1 %v14180_v54  ;;  %v14226_v54 = vld [vmem:[%s18871_s3 + $0x13d0] ss:$40 sps:$4 sm:$0xff]  }
 0x5df   :  { %10336 = vmatpush1.bf16.msra.mxu1 %v14178_v57  ;;  %v14229_v57 = vld [vmem:[%s18871_s3 + $0x1420] ss:$40 sps:$4 sm:$0xff]  }
 0x5e0   :  { %10346 = vmatprep.subr.bf16.mxu1 %v14183_v59  ;;  %v14234_v59 = vld [vmem:[%s18871_s3 + $0x1474] ss:$40 sps:$4 sm:$0xff]  }
 0x5e2   :  { %10338 = vmatmul.mubr.bf16.vlgmr.msra.gmra.mrb[16].mxu1 %v16754_v20  ;;  %v14192_v20 = vld [vmem:[%s18871_s3 + $0x1014] ss:$40 sps:$4 sm:$0xff]  }
 0x5e3   :  { %10347 = vmatpush1.bf16.msra.mxu1 %v14181_v61  ;;  %10378 = vmatprep.mubr.bf16.mxu1 %v16762_v48  ;;  %v14190_v48 = vld [vmem:[%s18871_s3 + $0x1010] ss:$40 sps:$4 sm:$0xff]  }
 0x5e4   :  { %10348 = vmatprep.subr.bf16.mxu1 %v14186_v0  ;;  %v14232_v61 = vld [vmem:[%s18871_s3 + $0x1470] ss:$40 sps:$4 sm:$0xff]   ;;  %v14237_v0 = vld [vmem:[%s18871_s3 + $0x14c4] ss:$40 sps:$4 sm:$0xff]  }
 0x5e7   :  { %10349 = vmatpush1.bf16.msra.mxu1 %v14184_v1  ;;  %v14235_v1 = vld [vmem:[%s18871_s3 + $0x14c0] ss:$40 sps:$4 sm:$0xff]  }
 0x5e8   :  { %10350 = vmatprep.subr.bf16.mxu1 %v14189_v5  ;;  %v14238_v5 = vld [vmem:[%s18871_s3 + $0x1510] ss:$40 sps:$4 sm:$0xff]  }
 0x5eb   :  { %10351 = vmatpush1.bf16.msra.mxu1 %v14187_v28  ;;  %v5630_v28 = vrot.slane %v18696_v24, %v16683_v46 }
 0x5ec   :  { %10352 = vmatprep.subr.bf16.mxu1 %v14192_v20  ;;  %v14243_v20 = vld [vmem:[%s18871_s3 + $0x1564] ss:$40 sps:$4 sm:$0xff]  }
 0x5ef   :  { %10353 = vmatpush1.bf16.msra.mxu1 %v14190_v48 }
 0x5f0   :  { %10354 = vmatprep.subr.bf16.mxu1 %v14195_v2 }
 0x5f3   :  { %10355 = vmatpush1.bf16.msra.mxu1 %v14193_v30 }
 0x5f4   :  { %10356 = vmatprep.subr.bf16.mxu1 %v14198_v11  ;;  %v14241_v11 = vld [vmem:[%s18871_s3 + $0x1560] ss:$40 sps:$4 sm:$0xff]  }
 0x5f5   :  { %v10011_v7 = vpop.f32.mrb[12].mxu1 }
 0x5f6   :  { %v12023_v8 = vadd.f32 %v10011_v7, %v5618_v4  ;;  %v10013_v9 = vpop.f32.mrb[13].mxu1 }
 0x5f7   :  { %v12024_v12 = vadd.f32 %v10013_v9, %v5622_v6  ;;  %v10015_v56 = vpop.f32.mrb[14].mxu1  ;;  %10357 = vmatpush1.bf16.msra.mxu1 %v14196_v27  ;;  %v14246_v27 = vld [vmem:[%s18871_s3 + $0x15b4] ss:$40 sps:$4 sm:$0xff]   ;;  %v14249_v9 = vld [vmem:[%s18871_s3 + $0x1604] ss:$40 sps:$4 sm:$0xff]  }
 0x5f8   :  { %v12001_v18 = vmul.f32 -1.442695, %v12023_v8  ;;  %v10016_v17 = vpop.f32.mrb[15].mxu1  ;;  %10358 = vmatprep.subr.bf16.mxu1 %v14201_v49  ;;  %v14244_v8 = vld [vmem:[%s18871_s3 + $0x15b0] ss:$40 sps:$4 sm:$0xff]  }
 0x5f9   :  { %v12002_v55 = vmul.f32 -1.442695, %v12024_v12  ;;  %v14247_v12 = vld [vmem:[%s18871_s3 + $0x1600] ss:$40 sps:$4 sm:$0xff]   ;;  %v14252_v56 = vld [vmem:[%s18871_s3 + $0x1654] ss:$40 sps:$4 sm:$0xff]  }
 0x5fa   :  { %14318 = vpow2.f32 %v12001_v18  ;;  %v14255_v18 = vld [vmem:[%s18871_s3 + $0x16a4] ss:$40 sps:$4 sm:$0xff]  }
 0x5fb   :  { %14320 = vpow2.f32 %v12002_v55  ;;  %10359 = vmatpush1.bf16.msra.mxu1 %v14199_v14  ;;  %v14250_v14 = vld [vmem:[%s18871_s3 + $0x1650] ss:$40 sps:$4 sm:$0xff]  }
 0x5fc   :  { %10360 = vmatprep.subr.bf16.mxu1 %v14204_v22 }
 0x5ff   :  { %10361 = vmatpush1.bf16.msra.mxu1 %v14202_v29 }
 0x600   :  { %10362 = vmatprep.subr.bf16.mxu1 %v14207_v26  ;;  %v14253_v26 = vld [vmem:[%s18871_s3 + $0x16a0] ss:$40 sps:$4 sm:$0xff]  }
 0x603   :  { %10363 = vmatpush1.bf16.msra.mxu1 %v14205_v39  ;;  %v14258_v39 = vld [vmem:[%s18871_s3 + $0x16f4] ss:$40 sps:$4 sm:$0xff]  }
 0x604   :  { %v14319_v10 = vpop.eup %14318  ;;  %10364 = vmatprep.subr.bf16.mxu1 %v14210_v32  ;;  %v14256_v32 = vld [vmem:[%s18871_s3 + $0x16f0] ss:$40 sps:$4 sm:$0xff]  }
 0x605   :  { %v14321_v36 = vpop.eup %14320  ;;  %v10462_v51 = vadd.f32 1.0, %v14319_v10  ;;  %v14259_v10 = vld [vmem:[%s18871_s3 + $0x1740] ss:$40 sps:$4 sm:$0xff]  }
 0x606   :  { %v10463_v37 = vadd.f32 1.0, %v14321_v36 }
 0x607   :  { %14322 = vrcp.f32 %v10462_v51  ;;  %10365 = vmatpush1.bf16.msra.mxu1 %v14208_v33  ;;  %v14261_v33 = vld [vmem:[%s18871_s3 + $0x1744] ss:$40 sps:$4 sm:$0xff]  }
 0x608   :  { %14324 = vrcp.f32 %v10463_v37  ;;  %10366 = vmatprep.subr.bf16.mxu1 %v14213_v21  ;;  %v14349_v21 = vld [vmem:[%s18874_s5] sm:$0xff] }
 0x609   :  { %v10519_v36 = vrot.slane %v14349_v21, %v16818_v16  ;;  %v10523_v51 = vrot.slane %v14349_v21, %v16683_v46 }
 0x60b   :  { %10367 = vmatpush1.bf16.msra.mxu1 %v14211_v15 }
 0x60c   :  { %10368 = vmatprep.subr.bf16.mxu1 %v14216_v35 }
 0x60f   :  { %10369 = vmatpush1.bf16.msra.mxu1 %v14214_v38 }
 0x610   :  { %10370 = vmatprep.subr.bf16.mxu1 %v14219_v40 }
 0x611   :  { %v14323_v45 = vpop.eup %14322 }
 0x612   :  { %v14325_v47 = vpop.eup %14324  ;;  %v10546_v60 = vmul.f32 %v14323_v45, %v10511_v25 }
 0x613   :  { %10371 = vmatpush1.bf16.msra.mxu1 %v14217_v41  ;;  %v10547_v62 = vmul.f32 %v14325_v47, %v10515_v42  ;;  %v12_v41 = vstv %s18875_s6 }
 0x614   :  { %10372 = vmatprep.subr.bf16.mxu1 %v14222_v13  ;;  %v10555_v44 = vadd.f32 %v18293_v34, %v10546_v60  ;;  %v14231_v34 = vld [vmem:[%s18871_s3 + $0x1424] ss:$40 sps:$4 sm:$0xff]   ;;  %13 = vst [vmem:[#allocation2] sm:$0x1] %v12_v41 }
 0x616   :  { %v18761_v23 = vadd.f32 %v10555_v44, %v10547_v62 }
 0x617   :  { %10373 = vmatpush1.bf16.msra.mxu1 %v14220_v43 }
 0x618   :  { %10374 = vmatprep.subr.bf16.mxu1 %v14225_v50 }
 0x61b   :  { %10375 = vmatpush1.bf16.msra.mxu1 %v14223_v53 }
 0x61c   :  { %10376 = vmatprep.subr.bf16.mxu1 %v14228_v31 }
 0x61f   :  { %10377 = vmatpush1.bf16.msra.mxu1 %v14226_v54  ;;  %v10489_v54 = vld [vmem:[%s18874_s5 + $0x8] sm:$0x3] }
 0x620   :  { %10387 = vmatprep.subr.bf16.mxu1 %v14231_v34  ;;  %v10527_v34 = vrot.slane %v10489_v54, %v16099_v52 }
 0x622   :  { %10379 = vmatmul.mubr.bf16.vlgmr.msra.gmra.mrb[16].mxu1 %v16955_v3  ;;  %v14240_v3 = vld [vmem:[%s18871_s3 + $0x1514] ss:$40 sps:$4 sm:$0xff]  }
 0x623   :  { %10388 = vmatpush1.bf16.msra.mxu1 %v14229_v57  ;;  %11996 = vmatprep.mubr.msk.bf16.mxu1 %vm9399_vm0, %v17323_v58  ;;  %v5626_v58 = vrot.slane %v18696_v24, %v16818_v16  ;;  %v5596_v16 = vld [vmem:[%s18873_s4 + $0x8] sm:$0x3]  ;;  %v10531_v57 = vrot.slane %v10489_v54, %v15890_v19 }
 0x624   :  { %10389 = vmatprep.subr.bf16.mxu1 %v14234_v59  ;;  %v5634_v46 = vrot.slane %v5596_v16, %v16099_v52  ;;  %v5638_v42 = vrot.slane %v5596_v16, %v15890_v19 }
 0x627   :  { %10390 = vmatpush1.bf16.msra.mxu1 %v14232_v61 }
 0x628   :  { %10391 = vmatprep.subr.bf16.mxu1 %v14237_v0 }
 0x62b   :  { %10392 = vmatpush1.bf16.msra.mxu1 %v14235_v1 }
 0x62c   :  { %10393 = vmatprep.subr.bf16.mxu1 %v14240_v3 }
 0x62e   :  { %v10216_v48 = vpop.f32.mrb[16].mxu0 }
 0x62f   :  { %v12025_v2 = vadd.f32 %v10216_v48, %v5626_v58  ;;  %v10218_v30 = vpop.f32.mrb[17].mxu0  ;;  %10394 = vmatpush1.bf16.msra.mxu1 %v14238_v5 }
 0x630   :  { %v12026_v4 = vadd.f32 %v10218_v30, %v5630_v28  ;;  %v10220_v6 = vpop.f32.mrb[18].mxu0  ;;  %10395 = vmatprep.subr.bf16.mxu1 %v14243_v20  ;;  %v12007_v28 = vld [vmem:[#allocation2] ss:$0 sm:$0xff] }
 0x631   :  { %v12003_v24 = vmul.f32 -1.442695, %v12025_v2  ;;  %v10221_v49 = vpop.f32.mrb[19].mxu0 }
 0x632   :  { %v12004_v7 = vmul.f32 -1.442695, %v12026_v4 }
 0x633   :  { %14326 = vpow2.f32 %v12003_v24  ;;  %10396 = vmatpush1.bf16.msra.mxu1 %v14241_v11 }
 0x634   :  { %14328 = vpow2.f32 %v12004_v7  ;;  %10397 = vmatprep.subr.bf16.mxu1 %v14246_v27 }
 0x637   :  { %10398 = vmatpush1.bf16.msra.mxu1 %v14244_v8 }
 0x638   :  { %10399 = vmatprep.subr.bf16.mxu1 %v14249_v9 }
 0x63b   :  { %10400 = vmatpush1.bf16.msra.mxu1 %v14247_v12 }
 0x63c   :  { %10401 = vmatprep.subr.bf16.mxu1 %v14252_v56 }
 0x63d   :  { %v14327_v17 = vpop.eup %14326 }
 0x63e   :  { %v14329_v22 = vpop.eup %14328  ;;  %v10464_v55 = vadd.f32 1.0, %v14327_v17 }
 0x63f   :  { %v10465_v29 = vadd.f32 1.0, %v14329_v22  ;;  %10402 = vmatpush1.bf16.msra.mxu1 %v14250_v14 }
 0x640   :  { %14330 = vrcp.f32 %v10464_v55  ;;  %10403 = vmatprep.subr.bf16.mxu1 %v14255_v18 }
 0x641   :  { %14332 = vrcp.f32 %v10465_v29 }
 0x643   :  { %10404 = vmatpush1.bf16.msra.mxu1 %v14253_v26 }
 0x644   :  { %10405 = vmatprep.subr.bf16.mxu1 %v14258_v39 }
 0x647   :  { %10406 = vmatpush1.bf16.msra.mxu1 %v14256_v32 }
 0x648   :  { %10407 = vmatprep.subr.bf16.mxu1 %v14261_v33 }
 0x64a   :  { %v14331_v37 = vpop.eup %14330 }
 0x64b   :  { %v14333_v15 = vpop.eup %14332  ;;  %10408 = vmatpush1.bf16.msra.mxu1 %v14259_v10  ;;  %v10548_v35 = vmul.f32 %v14331_v37, %v10519_v36 }
 0x64c   :  { %v10549_v38 = vmul.f32 %v14333_v15, %v10523_v51 }
 0x64d   :  { %v10557_v40 = vadd.f32 %v18761_v23, %v10548_v35 }
 0x64e   :  { %10420 = vmatmul.mubr.bf16.vlgmr.msra.gmra.mrb[16].mxu1 %v17331_v63 }
 0x64f   :  { %v10558_v25 = vadd.f32 %v10557_v40, %v10549_v38 }
 0x721   :  { %v10421_v13 = vpop.f32.mrb[16].mxu1 }
 0x722   :  { %v12027_v45 = vadd.f32 %v10421_v13, %v5634_v46  ;;  %v10423_v47 = vpop.f32.mrb[17].mxu1 }
 0x723   :  { %v12028_v60 = vadd.f32 %v10423_v47, %v5638_v42  ;;  %v10425_v43 = vpop.f32.mrb[18].mxu1 }
 0x724   :  { %v12005_v63 = vmul.f32 -1.442695, %v12027_v45  ;;  %v10426_v62 = vpop.f32.mrb[19].mxu1 }
 0x725   :  { %v12006_v50 = vmul.f32 -1.442695, %v12028_v60 }
 0x726   :  { %14334 = vpow2.f32 %v12005_v63 }
 0x727   :  { %14336 = vpow2.f32 %v12006_v50 }
 0x730   :  { %v14335_v44 = vpop.eup %14334 }
 0x731   :  { %v14337_v23 = vpop.eup %14336  ;;  %v10466_v53 = vadd.f32 1.0, %v14335_v44 }
 0x732   :  { %v10467_v31 = vadd.f32 1.0, %v14337_v23 }
 0x733   :  { %14338 = vrcp.f32 %v10466_v53 }
 0x734   :  { %14340 = vrcp.f32 %v10467_v31 }
 0x73d   :  { %v14339_v59 = vpop.eup %14338 }
 0x73e   :  { %v14341_v61 = vpop.eup %14340  ;;  %v10550_v0 = vmul.f32 %v14339_v59, %v10527_v34 }
 0x73f   :  { %v10551_v1 = vmul.f32 %v14341_v61, %v10531_v57 }
 0x740   :  { %v10559_v3 = vadd.f32 %v10558_v25, %v10550_v0 }
 0x741   :  { %v10560_v58 = vsel %vm9399_vm0, %v10551_v1, 0.0 }
 0x742   :  { %v10561_v5 = vadd.f32 %v10560_v58, %v10559_v3 }
 0x744   :  { %10562 = vadd.xlane.f32.xlu0 %v10561_v5 }
 0x7d1   :  { %v10563_v20 = vpop.xlane.xlu0 %10562 }
 0x7d2   :  { %v10571_v48 = vadd.f32 %v12007_v28, %v10563_v20 }
 0x7d4   :  { %v12008_v2 = vmul.f32 -1.442695, %v10571_v48 }
 0x7d6   :  { %14342 = vpow2.f32 %v12008_v2 }
 0x7e0   :  { %v14343_v30 = vpop.eup %14342 }
 0x7e1   :  { %v10575_v11 = vadd.f32 1.0, %v14343_v30 }
 0x7e3   :  { %14344 = vrcp.f32 %v10575_v11 }
 0x7ed   :  { %v14345_v52 = vpop.eup %14344 }
 0x7ee   :  { %10579 = vst.msk [vmem:[%s18876_s7] sm:$0xff] %vm10578_vm1, %v14345_v52 }

</bundles_post_ra>
